<compile_context>
chip_gen: v5e
topology: v5e:2x2
jax: 0.10.0
libtpu: 0.0.40
codegen_flags: <defaults>
</compile_context>

<pallas_src>
import math
import functools

import jax
import jax.numpy as jnp
from jax.experimental import pallas as pl
from jax.experimental.pallas import tpu as pltpu


_F32 = jnp.float32
_BF16 = jnp.bfloat16


# ---------------------------------------------------------------------------
# In-kernel helpers (pure functions on traced values, called inside kernels)
# ---------------------------------------------------------------------------

def _softmax(s):
    s = s - jnp.max(s, axis=-1, keepdims=True)
    p = jnp.exp(s)
    return p * pl.reciprocal(jnp.sum(p, axis=-1, keepdims=True), approx=True)


def _layernorm(y, g, b, eps=1e-5):
    mu = jnp.mean(y, axis=-1, keepdims=True)
    var = jnp.mean((y - mu) * (y - mu), axis=-1, keepdims=True)
    return (y - mu) * jax.lax.rsqrt(var + eps) * g + b


def _dense(x_f32, w_bf16, b_f32):
    return jnp.dot(x_f32.astype(_BF16), w_bf16,
                   preferred_element_type=_F32) + b_f32


def _conv_proj(x, w_bf16, b_f32, B, S, ksize):
    """'same'-padded Conv1d over the seq axis on the flat (B*S, D) slab.

    out = sum_t shift(x, t - pad) @ W_t + b.  The shift is pltpu.roll on the
    sublane axis (rides the XLU slot); rows whose source index falls outside
    their own batch segment are zeroed with an iota mask.  One matmul per
    tap on the whole slab -- no per-batch loop, no im2col concatenation."""
    N, D = x.shape
    pad_l = (ksize - 1) // 2
    s_idx = jax.lax.broadcasted_iota(jnp.int32, (N, D), 0) % S
    acc = None
    for t in range(ksize):
        off = t - pad_l
        if off == 0:
            xt = x
        else:
            rolled = pltpu.roll(x, shift=(-off) % N, axis=0)
            if off < 0:
                valid = s_idx >= -off
            else:
                valid = s_idx < S - off
            xt = jnp.where(valid, rolled, 0.0)
        y = jnp.dot(xt.astype(_BF16), w_bf16[t * D:(t + 1) * D, :],
                    preferred_element_type=_F32)
        acc = y if acc is None else acc + y
    return acc + b_f32


def _mha(q, k, v, wo_bf16, bo_f32, attn_sc, B, Sq, Sk, n_heads, causal):
    """Multi-head attention fused with the output projection.

    QK^T / PV are einsums batched over B (one pair of dots per head instead
    of B*H tiny dots); each head's context is written to a static lane slice
    of the VMEM scratch `attn_sc`, then ONE (B*Sq, D) @ (D, D) Wo matmul.
    Softmax / masking stay f32; matmul operands are bf16."""
    D = q.shape[-1]
    hd = D // n_heads
    scale = 1.0 / math.sqrt(hd)
    qb = q.reshape(B, Sq, D).astype(_BF16)
    kb = k.reshape(B, Sk, D).astype(_BF16)
    vb = v.reshape(B, Sk, D).astype(_BF16)
    if causal:
        ri = jax.lax.broadcasted_iota(jnp.int32, (Sq, Sk), 0)
        ci = jax.lax.broadcasted_iota(jnp.int32, (Sq, Sk), 1)
        neg = jnp.where(ci <= ri, 0.0, -1e30).astype(_F32)[None, :, :]
    for h in range(n_heads):
        sl = slice(h * hd, (h + 1) * hd)
        s = jnp.einsum('bqd,bkd->bqk', qb[:, :, sl], kb[:, :, sl],
                       preferred_element_type=_F32) * scale
        if causal:
            s = s + neg                               # additive mask in f32
        p = _softmax(s)
        oh = jnp.einsum('bqk,bkd->bqd', p.astype(_BF16), vb[:, :, sl],
                        preferred_element_type=_F32)
        attn_sc[:, sl] = oh.reshape(B * Sq, hd)
    return jnp.dot(attn_sc[...].astype(_BF16), wo_bf16,
                   preferred_element_type=_F32) + bo_f32


# ---------------------------------------------------------------------------
# Fused stack kernels (grid axis = layer; activation carried in o_ref)
# ---------------------------------------------------------------------------

def _make_encoder_kernel(B, S, ksize, n_heads, n_layers):
    def kern(x_ref, wqkv_ref, bqkv_ref, wo_ref, bo_ref,
             w1_ref, b1_ref, w2_ref, b2_ref,
             g1_ref, be1_ref, g2_ref, be2_ref,
             gf_ref, bf_ref,
             o_ref, attn_sc):
        l = pl.program_id(0)

        @pl.when(l == 0)
        def _():
            o_ref[...] = x_ref[...]                    # seed the carried act

        x = o_ref[...]                                 # (B*S, D) f32 carry
        D = x.shape[-1]

        # fused Q/K/V Conv1d projection over the whole slab
        qkv = _conv_proj(x, wqkv_ref[...], bqkv_ref[...], B, S, ksize)
        q, k, v = qkv[:, :D], qkv[:, D:2 * D], qkv[:, 2 * D:]

        a = _mha(q, k, v, wo_ref[...], bo_ref[...], attn_sc,
                 B, S, S, n_heads, causal=False)
        x1 = _layernorm(x + a, g1_ref[...], be1_ref[...])

        h = jnp.maximum(_dense(x1, w1_ref[...], b1_ref[...]), 0.0)
        f = _dense(h, w2_ref[...], b2_ref[...])
        y = _layernorm(x1 + f, g2_ref[...], be2_ref[...])

        o_ref[...] = y

        @pl.when(l == n_layers - 1)
        def _():                                       # fused encoder_norm
            o_ref[...] = _layernorm(y, gf_ref[...], bf_ref[...])
    return kern


def _make_decoder_kernel(B, St, Ss, ksize, n_heads, n_layers):
    def kern(x_ref, m_ref,
             swqkv_ref, sbqkv_ref, swo_ref, sbo_ref,
             cwq_ref, cbq_ref, cwkv_ref, cbkv_ref, cwo_ref, cbo_ref,
             w1_ref, b1_ref, w2_ref, b2_ref,
             g1_ref, be1_ref, g2_ref, be2_ref, g3_ref, be3_ref,
             gf_ref, bf_ref,
             o_ref, attn_sc):
        l = pl.program_id(0)

        @pl.when(l == 0)
        def _():
            o_ref[...] = x_ref[...]

        x = o_ref[...]                                 # (B*St, D) f32 carry
        m = m_ref[...]                                 # (B*Ss, D) f32 memory
        D = x.shape[-1]

        # --- masked (causal) convolutional self-attention ---
        qkv = _conv_proj(x, swqkv_ref[...], sbqkv_ref[...], B, St, ksize)
        q, k, v = qkv[:, :D], qkv[:, D:2 * D], qkv[:, 2 * D:]
        a = _mha(q, k, v, swo_ref[...], sbo_ref[...], attn_sc,
                 B, St, St, n_heads, causal=True)
        x1 = _layernorm(x + a, g1_ref[...], be1_ref[...])

        # --- convolutional cross-attention over encoder memory ---
        q = _conv_proj(x1, cwq_ref[...], cbq_ref[...], B, St, ksize)
        kv = _conv_proj(m, cwkv_ref[...], cbkv_ref[...], B, Ss, ksize)
        k, v = kv[:, :D], kv[:, D:]
        c = _mha(q, k, v, cwo_ref[...], cbo_ref[...], attn_sc,
                 B, St, Ss, n_heads, causal=False)
        x2 = _layernorm(x1 + c, g2_ref[...], be2_ref[...])

        # --- feed-forward ---
        h = jnp.maximum(_dense(x2, w1_ref[...], b1_ref[...]), 0.0)
        f = _dense(h, w2_ref[...], b2_ref[...])
        y = _layernorm(x2 + f, g3_ref[...], be3_ref[...])

        o_ref[...] = y

        @pl.when(l == n_layers - 1)
        def _():                                       # fused decoder_norm
            o_ref[...] = _layernorm(y, gf_ref[...], bf_ref[...])
    return kern


# ---------------------------------------------------------------------------
# pallas_call wrappers (one call per stack; layer axis is the grid)
# ---------------------------------------------------------------------------

def _stacked_spec(a):
    """Weight stacked along a leading layer axis: pick layer `l` per step."""
    return pl.BlockSpec((None,) + a.shape[1:], lambda l: (l, 0, 0))


def _shared_spec(a):
    """Array shared across all layers (constant block index)."""
    nd = len(a.shape)
    return pl.BlockSpec(a.shape, lambda l, nd=nd: (0,) * nd)


def _bytes_accessed(args, out_shape):
    tot = math.prod(out_shape) * 4
    for a in args:
        tot += int(a.size) * a.dtype.itemsize
    return int(tot)


def encoder_stack_fwd(p, final_norm, x_flat, B, S, ksize, n_heads):
    L = p["wqkv"].shape[0]
    N, D = x_flat.shape
    F = p["w1"].shape[-1]
    gf, bf = final_norm
    weights = (p["wqkv"], p["bqkv"], p["wo"], p["bo"],
               p["w1"], p["b1"], p["w2"], p["b2"],
               p["ln1_g"], p["ln1_b"], p["ln2_g"], p["ln2_b"])
    args = (x_flat,) + weights + (gf, bf)
    in_specs = ([_shared_spec(x_flat)]
                + [_stacked_spec(w) for w in weights]
                + [_shared_spec(gf), _shared_spec(bf)])
    KD = ksize * D
    flops = L * (2 * N * KD * 3 * D          # conv QKV
                 + 4 * B * S * S * D         # QK^T + PV (all heads)
                 + 2 * N * D * D             # Wo
                 + 4 * N * D * F)            # FFN
    cost = pl.CostEstimate(flops=int(flops),
                           transcendentals=int(L * B * n_heads * S * S),
                           bytes_accessed=_bytes_accessed(args, (N, D)))
    return pl.pallas_call(
        _make_encoder_kernel(B, S, ksize, n_heads, L),
        out_shape=jax.ShapeDtypeStruct((N, D), _F32),
        grid=(L,),
        in_specs=in_specs,
        out_specs=pl.BlockSpec((N, D), lambda l: (0, 0)),
        scratch_shapes=[pltpu.VMEM((N, D), _F32)],
        compiler_params=pltpu.CompilerParams(
            dimension_semantics=("arbitrary",)),
        cost_estimate=cost,
    )(*args)


def decoder_stack_fwd(p, final_norm, x_flat, mem_flat, B, St, Ss, ksize,
                      n_heads):
    L = p["s_wqkv"].shape[0]
    Nt, D = x_flat.shape
    Ns = mem_flat.shape[0]
    F = p["w1"].shape[-1]
    gf, bf = final_norm
    weights = (p["s_wqkv"], p["s_bqkv"], p["s_wo"], p["s_bo"],
               p["c_wq"], p["c_bq"], p["c_wkv"], p["c_bkv"],
               p["c_wo"], p["c_bo"],
               p["w1"], p["b1"], p["w2"], p["b2"],
               p["ln1_g"], p["ln1_b"], p["ln2_g"], p["ln2_b"],
               p["ln3_g"], p["ln3_b"])
    args = (x_flat, mem_flat) + weights + (gf, bf)
    in_specs = ([_shared_spec(x_flat), _shared_spec(mem_flat)]
                + [_stacked_spec(w) for w in weights]
                + [_shared_spec(gf), _shared_spec(bf)])
    KD = ksize * D
    flops = L * (2 * Nt * KD * 3 * D + 4 * B * St * St * D + 2 * Nt * D * D
                 + 2 * Nt * KD * D + 2 * Ns * KD * 2 * D
                 + 4 * B * St * Ss * D + 2 * Nt * D * D
                 + 4 * Nt * D * F)
    cost = pl.CostEstimate(
        flops=int(flops),
        transcendentals=int(L * B * n_heads * (St * St + St * Ss)),
        bytes_accessed=_bytes_accessed(args, (Nt, D)))
    return pl.pallas_call(
        _make_decoder_kernel(B, St, Ss, ksize, n_heads, L),
        out_shape=jax.ShapeDtypeStruct((Nt, D), _F32),
        grid=(L,),
        in_specs=in_specs,
        out_specs=pl.BlockSpec((Nt, D), lambda l: (0, 0)),
        scratch_shapes=[pltpu.VMEM((Nt, D), _F32)],
        compiler_params=pltpu.CompilerParams(
            dimension_semantics=("arbitrary",)),
        cost_estimate=cost,
    )(*args)


# ---------------------------------------------------------------------------
# Parameter init (deterministic, synthetic; layer-stacked) + model glue
# ---------------------------------------------------------------------------

def sinusoidal_pe(max_len, d_model):
    pos = jnp.arange(max_len, dtype=_F32)[:, None]
    i = jnp.arange(0, d_model, 2, dtype=_F32)
    div = jnp.exp(-math.log(10000.0) * i / d_model)
    pe = jnp.zeros((max_len, d_model), _F32)
    pe = pe.at[:, 0::2].set(jnp.sin(pos * div))
    pe = pe.at[:, 1::2].set(jnp.cos(pos * div))
    return pe


class _KeyGen:
    def __init__(self, key):
        self.key = key

    def __call__(self):
        self.key, sub = jax.random.split(self.key)
        return sub


def _init_stacked_dense(kg, L, din, dout):
    w = (jax.random.normal(kg(), (L, din, dout), _F32) * 0.02).astype(_BF16)
    return w, jnp.zeros((L, 1, dout), _F32)


def _init_stacked_ln(L, d):
    return jnp.ones((L, 1, d), _F32), jnp.zeros((L, 1, d), _F32)


def _init_ln(d):
    return jnp.ones((1, d), _F32), jnp.zeros((1, d), _F32)


def init_encoder_stack(kg, L, d_model, d_ff, ksize):
    p = {}
    # Conv1d weights stored directly in tap-major im2col layout:
    # rows = [tap0 (d rows) | tap1 | ... | tapK-1], cols = output channels.
    p["wqkv"], p["bqkv"] = _init_stacked_dense(kg, L, ksize * d_model,
                                               3 * d_model)
    p["wo"], p["bo"] = _init_stacked_dense(kg, L, d_model, d_model)
    p["w1"], p["b1"] = _init_stacked_dense(kg, L, d_model, d_ff)
    p["w2"], p["b2"] = _init_stacked_dense(kg, L, d_ff, d_model)
    p["ln1_g"], p["ln1_b"] = _init_stacked_ln(L, d_model)
    p["ln2_g"], p["ln2_b"] = _init_stacked_ln(L, d_model)
    return p


def init_decoder_stack(kg, L, d_model, d_ff, ksize):
    p = {}
    p["s_wqkv"], p["s_bqkv"] = _init_stacked_dense(kg, L, ksize * d_model,
                                                   3 * d_model)
    p["s_wo"], p["s_bo"] = _init_stacked_dense(kg, L, d_model, d_model)
    p["c_wq"], p["c_bq"] = _init_stacked_dense(kg, L, ksize * d_model, d_model)
    p["c_wkv"], p["c_bkv"] = _init_stacked_dense(kg, L, ksize * d_model,
                                                 2 * d_model)
    p["c_wo"], p["c_bo"] = _init_stacked_dense(kg, L, d_model, d_model)
    p["w1"], p["b1"] = _init_stacked_dense(kg, L, d_model, d_ff)
    p["w2"], p["b2"] = _init_stacked_dense(kg, L, d_ff, d_model)
    p["ln1_g"], p["ln1_b"] = _init_stacked_ln(L, d_model)
    p["ln2_g"], p["ln2_b"] = _init_stacked_ln(L, d_model)
    p["ln3_g"], p["ln3_b"] = _init_stacked_ln(L, d_model)
    return p


def init_model(key, d_model, n_enc, n_dec, d_ff, ksize, max_len):
    kg = _KeyGen(key)
    return {
        "pe": sinusoidal_pe(max_len, d_model),
        "encoder": init_encoder_stack(kg, n_enc, d_model, d_ff, ksize),
        "decoder": init_decoder_stack(kg, n_dec, d_model, d_ff, ksize),
        "enc_norm": _init_ln(d_model),
        "dec_norm": _init_ln(d_model),
    }


def conv_transformer_forward(params, src, tgt, n_heads, ksize):
    """src: (B, src_len, d_model), tgt: (B, tgt_len, d_model)."""
    B, Ss, D = src.shape
    St = tgt.shape[1]
    pe = params["pe"]

    # positional encoding (trivial elementwise add + flatten kept in XLA)
    x = (src + pe[None, :Ss, :]).reshape(B * Ss, D)
    mem = encoder_stack_fwd(params["encoder"], params["enc_norm"], x,
                            B, Ss, ksize, n_heads)

    y = (tgt + pe[None, :St, :]).reshape(B * St, D)
    out = decoder_stack_fwd(params["decoder"], params["dec_norm"], y, mem,
                            B, St, Ss, ksize, n_heads)
    return out.reshape(B, St, D)


# ---------------------------------------------------------------------------
# Main
# ---------------------------------------------------------------------------

if __name__ == "__main__":
    d_model = 32
    n_heads = 4
    n_encoder_layers = 2
    n_decoder_layers = 2
    d_ff = 64
    kernel_size = 3
    max_seq_length = 16

    B, src_len, tgt_len = 2, 8, 8

    root = jax.random.PRNGKey(0)
    k_params, k_src, k_tgt = jax.random.split(root, 3)

    params = init_model(k_params, d_model, n_encoder_layers, n_decoder_layers,
                        d_ff, kernel_size, max_seq_length)

    src = jax.random.normal(k_src, (B, src_len, d_model), _F32)
    tgt = jax.random.normal(k_tgt, (B, tgt_len, d_model), _F32)

    fwd = jax.jit(functools.partial(conv_transformer_forward,
                                    n_heads=n_heads, ksize=kernel_size))
    out = jax.block_until_ready(fwd(params, src, tgt))

    assert out.shape == (B, tgt_len, d_model), out.shape
    assert bool(jnp.all(jnp.isfinite(out)))
    print("KERNEL_OK")
</pallas_src>

<mosaic_0001>
module attributes {stable_mosaic.version = 11 : i64} {
  func.func @kern(%arg0: i32, %arg1: memref<16x32xf32, #tpu.memory_space<vmem>>, %arg2: memref<1x96x96xbf16, #tpu.memory_space<vmem>>, %arg3: memref<1x1x96xf32, #tpu.memory_space<vmem>>, %arg4: memref<1x32x32xbf16, #tpu.memory_space<vmem>>, %arg5: memref<1x1x32xf32, #tpu.memory_space<vmem>>, %arg6: memref<1x32x64xbf16, #tpu.memory_space<vmem>>, %arg7: memref<1x1x64xf32, #tpu.memory_space<vmem>>, %arg8: memref<1x64x32xbf16, #tpu.memory_space<vmem>>, %arg9: memref<1x1x32xf32, #tpu.memory_space<vmem>>, %arg10: memref<1x1x32xf32, #tpu.memory_space<vmem>>, %arg11: memref<1x1x32xf32, #tpu.memory_space<vmem>>, %arg12: memref<1x1x32xf32, #tpu.memory_space<vmem>>, %arg13: memref<1x1x32xf32, #tpu.memory_space<vmem>>, %arg14: memref<1x32xf32, #tpu.memory_space<vmem>>, %arg15: memref<1x32xf32, #tpu.memory_space<vmem>>, %arg16: memref<16x32xf32, #tpu.memory_space<vmem>>, %arg17: memref<16x32xf32, #tpu.memory_space<vmem>>) attributes {dimension_semantics = [#tpu.dimension_semantics<arbitrary>], iteration_bounds = array<i64: 2>, scalar_prefetch = 0 : i64, scratch_operands = 1 : i64, tpu.core_type = #tpu.core_type<tc>, window_params = [{pipeline_mode = #tpu.pipeline_mode<synchronous>, transform_indices = @transform_0, window_bounds = array<i64: 16, 32>}, {transform_indices = @transform_1, window_bounds = array<i64: 1, 96, 96>}, {transform_indices = @transform_2, window_bounds = array<i64: 1, 1, 96>}, {transform_indices = @transform_3, window_bounds = array<i64: 1, 32, 32>}, {transform_indices = @transform_4, window_bounds = array<i64: 1, 1, 32>}, {transform_indices = @transform_5, window_bounds = array<i64: 1, 32, 64>}, {transform_indices = @transform_6, window_bounds = array<i64: 1, 1, 64>}, {transform_indices = @transform_7, window_bounds = array<i64: 1, 64, 32>}, {transform_indices = @transform_8, window_bounds = array<i64: 1, 1, 32>}, {transform_indices = @transform_9, window_bounds = array<i64: 1, 1, 32>}, {transform_indices = @transform_10, window_bounds = array<i64: 1, 1, 32>}, {transform_indices = @transform_11, window_bounds = array<i64: 1, 1, 32>}, {transform_indices = @transform_12, window_bounds = array<i64: 1, 1, 32>}, {pipeline_mode = #tpu.pipeline_mode<synchronous>, transform_indices = @transform_13, window_bounds = array<i64: 1, 32>}, {pipeline_mode = #tpu.pipeline_mode<synchronous>, transform_indices = @transform_14, window_bounds = array<i64: 1, 32>}, {pipeline_mode = #tpu.pipeline_mode<synchronous>, transform_indices = @transform_15, window_bounds = array<i64: 16, 32>}]} {
    %c0_i32 = arith.constant 0 : i32
    %0 = arith.cmpi eq, %arg0, %c0_i32 : i32
    %1 = arith.extui %0 : i1 to i32
    %c0_i32_0 = arith.constant 0 : i32
    %2 = arith.cmpi ne, %1, %c0_i32_0 : i32
    scf.if %2 {
      %c0_93 = arith.constant 0 : index
      %c0_94 = arith.constant 0 : index
      %226 = vector.load %arg1[%c0_93, %c0_94] : memref<16x32xf32, #tpu.memory_space<vmem>>, vector<16x32xf32>
      %c0_95 = arith.constant 0 : index
      %c0_96 = arith.constant 0 : index
      %227 = vector.load %arg16[%c0_95, %c0_96] : memref<16x32xf32, #tpu.memory_space<vmem>>, vector<16x32xf32>
      tpu.vector_store %arg16[%c0_95, %c0_96], %226 {strides = array<i32>} : memref<16x32xf32, #tpu.memory_space<vmem>>, vector<16x32xf32>,
    } else {
    }
    %c0 = arith.constant 0 : index
    %c0_1 = arith.constant 0 : index
    %3 = vector.load %arg16[%c0, %c0_1] : memref<16x32xf32, #tpu.memory_space<vmem>>, vector<16x32xf32>
    %c0_2 = arith.constant 0 : index
    %c0_3 = arith.constant 0 : index
    %c0_4 = arith.constant 0 : index
    %4 = vector.load %arg2[%c0_2, %c0_3, %c0_4] : memref<1x96x96xbf16, #tpu.memory_space<vmem>>, vector<1x96x96xbf16>
    %5 = vector.shape_cast %4 : vector<1x96x96xbf16> to vector<96x96xbf16>
    %c0_5 = arith.constant 0 : index
    %c0_6 = arith.constant 0 : index
    %c0_7 = arith.constant 0 : index
    %6 = vector.load %arg3[%c0_5, %c0_6, %c0_7] : memref<1x1x96xf32, #tpu.memory_space<vmem>>, vector<1x1x96xf32>
    %7 = vector.shape_cast %6 : vector<1x1x96xf32> to vector<1x96xf32>
    %8 = tpu.iota {dimensions = array<i32: 0>} : vector<16x32xi32>
    %c8_i32 = arith.constant 8 : i32
    %c0_i32_8 = arith.constant 0 : i32
    %9 = arith.cmpi eq, %c8_i32, %c0_i32_8 : i32
    %c1_i32 = arith.constant 1 : i32
    %10 = arith.select %9, %c1_i32, %c8_i32 : i32
    %11 = vector.broadcast %10 : i32 to vector<16x32xi32>
    %12 = arith.remsi %8, %11 : vector<16x32xi32>
    %c0_i32_9 = arith.constant 0 : i32
    %13 = vector.broadcast %c0_i32_9 : i32 to vector<16x32xi32>
    %14 = arith.cmpi ne, %12, %13 : vector<16x32xi32>
    %c0_i32_10 = arith.constant 0 : i32
    %15 = vector.broadcast %c0_i32_10 : i32 to vector<16x32xi32>
    %16 = arith.cmpi slt, %12, %15 : vector<16x32xi32>
    %c0_i32_11 = arith.constant 0 : i32
    %17 = arith.cmpi slt, %10, %c0_i32_11 : i32
    %18 = vector.broadcast %17 : i1 to vector<16x32xi1>
    %19 = vector.broadcast %18 : vector<16x32xi1> to vector<16x32xi1>
    %20 = arith.xori %16, %19 : vector<16x32xi1>
    %21 = arith.andi %20, %14 : vector<16x32xi1>
    %22 = vector.broadcast %10 : i32 to vector<16x32xi32>
    %23 = arith.addi %12, %22 : vector<16x32xi32>
    %24 = arith.select %21, %23, %12 : vector<16x32xi1>, vector<16x32xi32>
    %c1_i32_12 = arith.constant 1 : i32
    %25 = tpu.dynamic_rotate %3 by %c1_i32_12 dim 0 : vector<16x32xf32>, i32 -> vector<16x32xf32>
    %c1_i32_13 = arith.constant 1 : i32
    %26 = vector.broadcast %c1_i32_13 : i32 to vector<16x32xi32>
    %27 = arith.cmpi sge, %24, %26 : vector<16x32xi32>
    %cst = arith.constant 0.000000e+00 : f32
    %28 = vector.broadcast %cst : f32 to vector<16x32xf32>
    %29 = arith.select %27, %25, %28 : vector<16x32xi1>, vector<16x32xf32>
    %30 = arith.truncf %29 : vector<16x32xf32> to vector<16x32xbf16>
    %31 = vector.extract_strided_slice %5 {offsets = [0, 0], sizes = [32, 96], strides = [1, 1]} : vector<96x96xbf16> to vector<32x96xbf16>
    %cst_14 = arith.constant dense<0.000000e+00> : vector<16x96xf32>
    %32 = tpu.matmul %30, %31, %cst_14 {dimension_numbers = #tpu.dot_dimension_numbers<[1], [0], [0], [1], [0, 0, 1, 1], [], []>} : vector<16x32xbf16>, vector<32x96xbf16>, vector<16x96xf32> -> vector<16x96xf32>
    %33 = arith.truncf %3 : vector<16x32xf32> to vector<16x32xbf16>
    %34 = vector.extract_strided_slice %5 {offsets = [32, 0], sizes = [32, 96], strides = [1, 1]} : vector<96x96xbf16> to vector<32x96xbf16>
    %cst_15 = arith.constant dense<0.000000e+00> : vector<16x96xf32>
    %35 = tpu.matmul %33, %34, %cst_15 {dimension_numbers = #tpu.dot_dimension_numbers<[1], [0], [0], [1], [0, 0, 1, 1], [], []>} : vector<16x32xbf16>, vector<32x96xbf16>, vector<16x96xf32> -> vector<16x96xf32>
    %36 = arith.addf %32, %35 : vector<16x96xf32>
    %c15_i32 = arith.constant 15 : i32
    %37 = tpu.dynamic_rotate %3 by %c15_i32 dim 0 : vector<16x32xf32>, i32 -> vector<16x32xf32>
    %c7_i32 = arith.constant 7 : i32
    %38 = vector.broadcast %c7_i32 : i32 to vector<16x32xi32>
    %39 = arith.cmpi slt, %24, %38 : vector<16x32xi32>
    %cst_16 = arith.constant 0.000000e+00 : f32
    %40 = vector.broadcast %cst_16 : f32 to vector<16x32xf32>
    %41 = arith.select %39, %37, %40 : vector<16x32xi1>, vector<16x32xf32>
    %42 = arith.truncf %41 : vector<16x32xf32> to vector<16x32xbf16>
    %43 = vector.extract_strided_slice %5 {offsets = [64, 0], sizes = [32, 96], strides = [1, 1]} : vector<96x96xbf16> to vector<32x96xbf16>
    %cst_17 = arith.constant dense<0.000000e+00> : vector<16x96xf32>
    %44 = tpu.matmul %42, %43, %cst_17 {dimension_numbers = #tpu.dot_dimension_numbers<[1], [0], [0], [1], [0, 0, 1, 1], [], []>} : vector<16x32xbf16>, vector<32x96xbf16>, vector<16x96xf32> -> vector<16x96xf32>
    %45 = arith.addf %36, %44 : vector<16x96xf32>
    %46 = vector.broadcast %7 : vector<1x96xf32> to vector<16x96xf32>
    %47 = arith.addf %45, %46 : vector<16x96xf32>
    %48 = vector.extract_strided_slice %47 {offsets = [0, 0], sizes = [16, 32], strides = [1, 1]} : vector<16x96xf32> to vector<16x32xf32>
    %49 = vector.extract_strided_slice %47 {offsets = [0, 32], sizes = [16, 32], strides = [1, 1]} : vector<16x96xf32> to vector<16x32xf32>
    %50 = vector.extract_strided_slice %47 {offsets = [0, 64], sizes = [16, 32], strides = [1, 1]} : vector<16x96xf32> to vector<16x32xf32>
    %c0_18 = arith.constant 0 : index
    %c0_19 = arith.constant 0 : index
    %c0_20 = arith.constant 0 : index
    %51 = vector.load %arg4[%c0_18, %c0_19, %c0_20] : memref<1x32x32xbf16, #tpu.memory_space<vmem>>, vector<1x32x32xbf16>
    %52 = vector.shape_cast %51 : vector<1x32x32xbf16> to vector<32x32xbf16>
    %c0_21 = arith.constant 0 : index
    %c0_22 = arith.constant 0 : index
    %c0_23 = arith.constant 0 : index
    %53 = vector.load %arg5[%c0_21, %c0_22, %c0_23] : memref<1x1x32xf32, #tpu.memory_space<vmem>>, vector<1x1x32xf32>
    %54 = vector.shape_cast %53 : vector<1x1x32xf32> to vector<1x32xf32>
    %55 = vector.shape_cast %48 : vector<16x32xf32> to vector<2x8x32xf32>
    %56 = arith.truncf %55 : vector<2x8x32xf32> to vector<2x8x32xbf16>
    %57 = vector.shape_cast %49 : vector<16x32xf32> to vector<2x8x32xf32>
    %58 = arith.truncf %57 : vector<2x8x32xf32> to vector<2x8x32xbf16>
    %59 = vector.shape_cast %50 : vector<16x32xf32> to vector<2x8x32xf32>
    %60 = arith.truncf %59 : vector<2x8x32xf32> to vector<2x8x32xbf16>
    %61 = vector.extract_strided_slice %56 {offsets = [0, 0, 0], sizes = [2, 8, 8], strides = [1, 1, 1]} : vector<2x8x32xbf16> to vector<2x8x8xbf16>
    %62 = vector.extract_strided_slice %58 {offsets = [0, 0, 0], sizes = [2, 8, 8], strides = [1, 1, 1]} : vector<2x8x32xbf16> to vector<2x8x8xbf16>
    "tpu.trace_start"() <{level = 10 : i32, message = "bqd,bkd->bqk"}> : () -> ()
    %cst_24 = arith.constant dense<0.000000e+00> : vector<2x8x8xf32>
    %63 = tpu.matmul %61, %62, %cst_24 {dimension_numbers = #tpu.dot_dimension_numbers<[2], [2], [1], [1], [0, 0, 0, 1, 1, 1], [0], [0]>} : vector<2x8x8xbf16>, vector<2x8x8xbf16>, vector<2x8x8xf32> -> vector<2x8x8xf32>
    "tpu.trace_stop"() : () -> ()
    %cst_25 = arith.constant 0.353553385 : f32
    %64 = vector.broadcast %cst_25 : f32 to vector<2x8x8xf32>
    %65 = arith.mulf %63, %64 : vector<2x8x8xf32>
    %cst_26 = arith.constant dense<0xFF800000> : vector<2x8xf32>
    %66 = vector.multi_reduction <maximumf>, %65, %cst_26 [2] : vector<2x8x8xf32> to vector<2x8xf32>
    %67 = vector.shape_cast %66 : vector<2x8xf32> to vector<2x8x1xf32>
    %68 = vector.broadcast %67 : vector<2x8x1xf32> to vector<2x8x8xf32>
    %69 = arith.subf %65, %68 : vector<2x8x8xf32>
    %70 = math.exp %69 : vector<2x8x8xf32>
    %cst_27 = arith.constant dense<0.000000e+00> : vector<2x8xf32>
    %71 = vector.multi_reduction <add>, %70, %cst_27 [2] : vector<2x8x8xf32> to vector<2x8xf32>
    %72 = vector.shape_cast %71 : vector<2x8xf32> to vector<2x8x1xf32>
    %73 = tpu.reciprocal %72 {approx = true} : vector<2x8x1xf32> -> vector<2x8x1xf32>
    %74 = vector.broadcast %73 : vector<2x8x1xf32> to vector<2x8x8xf32>
    %75 = arith.mulf %70, %74 : vector<2x8x8xf32>
    %76 = arith.truncf %75 : vector<2x8x8xf32> to vector<2x8x8xbf16>
    %77 = vector.extract_strided_slice %60 {offsets = [0, 0, 0], sizes = [2, 8, 8], strides = [1, 1, 1]} : vector<2x8x32xbf16> to vector<2x8x8xbf16>
    "tpu.trace_start"() <{level = 10 : i32, message = "bqk,bkd->bqd"}> : () -> ()
    %cst_28 = arith.constant dense<0.000000e+00> : vector<2x8x8xf32>
    %78 = tpu.matmul %76, %77, %cst_28 {dimension_numbers = #tpu.dot_dimension_numbers<[2], [1], [1], [2], [0, 0, 0, 1, 1, 2], [0], [0]>} : vector<2x8x8xbf16>, vector<2x8x8xbf16>, vector<2x8x8xf32> -> vector<2x8x8xf32>
    "tpu.trace_stop"() : () -> ()
    %79 = vector.shape_cast %78 : vector<2x8x8xf32> to vector<16x8xf32>
    %c0_29 = arith.constant 0 : index
    %c0_30 = arith.constant 0 : index
    %80 = vector.load %arg17[%c0_29, %c0_30] : memref<16x32xf32, #tpu.memory_space<vmem>>, vector<16x8xf32>
    tpu.vector_store %arg17[%c0_29, %c0_30], %79 {strides = array<i32>} : memref<16x32xf32, #tpu.memory_space<vmem>>, vector<16x8xf32>,
    %81 = vector.extract_strided_slice %56 {offsets = [0, 0, 8], sizes = [2, 8, 8], strides = [1, 1, 1]} : vector<2x8x32xbf16> to vector<2x8x8xbf16>
    %82 = vector.extract_strided_slice %58 {offsets = [0, 0, 8], sizes = [2, 8, 8], strides = [1, 1, 1]} : vector<2x8x32xbf16> to vector<2x8x8xbf16>
    "tpu.trace_start"() <{level = 10 : i32, message = "bqd,bkd->bqk"}> : () -> ()
    %cst_31 = arith.constant dense<0.000000e+00> : vector<2x8x8xf32>
    %83 = tpu.matmul %81, %82, %cst_31 {dimension_numbers = #tpu.dot_dimension_numbers<[2], [2], [1], [1], [0, 0, 0, 1, 1, 1], [0], [0]>} : vector<2x8x8xbf16>, vector<2x8x8xbf16>, vector<2x8x8xf32> -> vector<2x8x8xf32>
    "tpu.trace_stop"() : () -> ()
    %cst_32 = arith.constant 0.353553385 : f32
    %84 = vector.broadcast %cst_32 : f32 to vector<2x8x8xf32>
    %85 = arith.mulf %83, %84 : vector<2x8x8xf32>
    %cst_33 = arith.constant dense<0xFF800000> : vector<2x8xf32>
    %86 = vector.multi_reduction <maximumf>, %85, %cst_33 [2] : vector<2x8x8xf32> to vector<2x8xf32>
    %87 = vector.shape_cast %86 : vector<2x8xf32> to vector<2x8x1xf32>
    %88 = vector.broadcast %87 : vector<2x8x1xf32> to vector<2x8x8xf32>
    %89 = arith.subf %85, %88 : vector<2x8x8xf32>
    %90 = math.exp %89 : vector<2x8x8xf32>
    %cst_34 = arith.constant dense<0.000000e+00> : vector<2x8xf32>
    %91 = vector.multi_reduction <add>, %90, %cst_34 [2] : vector<2x8x8xf32> to vector<2x8xf32>
    %92 = vector.shape_cast %91 : vector<2x8xf32> to vector<2x8x1xf32>
    %93 = tpu.reciprocal %92 {approx = true} : vector<2x8x1xf32> -> vector<2x8x1xf32>
    %94 = vector.broadcast %93 : vector<2x8x1xf32> to vector<2x8x8xf32>
    %95 = arith.mulf %90, %94 : vector<2x8x8xf32>
    %96 = arith.truncf %95 : vector<2x8x8xf32> to vector<2x8x8xbf16>
    %97 = vector.extract_strided_slice %60 {offsets = [0, 0, 8], sizes = [2, 8, 8], strides = [1, 1, 1]} : vector<2x8x32xbf16> to vector<2x8x8xbf16>
    "tpu.trace_start"() <{level = 10 : i32, message = "bqk,bkd->bqd"}> : () -> ()
    %cst_35 = arith.constant dense<0.000000e+00> : vector<2x8x8xf32>
    %98 = tpu.matmul %96, %97, %cst_35 {dimension_numbers = #tpu.dot_dimension_numbers<[2], [1], [1], [2], [0, 0, 0, 1, 1, 2], [0], [0]>} : vector<2x8x8xbf16>, vector<2x8x8xbf16>, vector<2x8x8xf32> -> vector<2x8x8xf32>
    "tpu.trace_stop"() : () -> ()
    %99 = vector.shape_cast %98 : vector<2x8x8xf32> to vector<16x8xf32>
    %c0_36 = arith.constant 0 : index
    %c8 = arith.constant 8 : index
    %100 = vector.load %arg17[%c0_36, %c8] : memref<16x32xf32, #tpu.memory_space<vmem>>, vector<16x8xf32>
    tpu.vector_store %arg17[%c0_36, %c8], %99 {strides = array<i32>} : memref<16x32xf32, #tpu.memory_space<vmem>>, vector<16x8xf32>,
    %101 = vector.extract_strided_slice %56 {offsets = [0, 0, 16], sizes = [2, 8, 8], strides = [1, 1, 1]} : vector<2x8x32xbf16> to vector<2x8x8xbf16>
    %102 = vector.extract_strided_slice %58 {offsets = [0, 0, 16], sizes = [2, 8, 8], strides = [1, 1, 1]} : vector<2x8x32xbf16> to vector<2x8x8xbf16>
    "tpu.trace_start"() <{level = 10 : i32, message = "bqd,bkd->bqk"}> : () -> ()
    %cst_37 = arith.constant dense<0.000000e+00> : vector<2x8x8xf32>
    %103 = tpu.matmul %101, %102, %cst_37 {dimension_numbers = #tpu.dot_dimension_numbers<[2], [2], [1], [1], [0, 0, 0, 1, 1, 1], [0], [0]>} : vector<2x8x8xbf16>, vector<2x8x8xbf16>, vector<2x8x8xf32> -> vector<2x8x8xf32>
    "tpu.trace_stop"() : () -> ()
    %cst_38 = arith.constant 0.353553385 : f32
    %104 = vector.broadcast %cst_38 : f32 to vector<2x8x8xf32>
    %105 = arith.mulf %103, %104 : vector<2x8x8xf32>
    %cst_39 = arith.constant dense<0xFF800000> : vector<2x8xf32>
    %106 = vector.multi_reduction <maximumf>, %105, %cst_39 [2] : vector<2x8x8xf32> to vector<2x8xf32>
    %107 = vector.shape_cast %106 : vector<2x8xf32> to vector<2x8x1xf32>
    %108 = vector.broadcast %107 : vector<2x8x1xf32> to vector<2x8x8xf32>
    %109 = arith.subf %105, %108 : vector<2x8x8xf32>
    %110 = math.exp %109 : vector<2x8x8xf32>
    %cst_40 = arith.constant dense<0.000000e+00> : vector<2x8xf32>
    %111 = vector.multi_reduction <add>, %110, %cst_40 [2] : vector<2x8x8xf32> to vector<2x8xf32>
    %112 = vector.shape_cast %111 : vector<2x8xf32> to vector<2x8x1xf32>
    %113 = tpu.reciprocal %112 {approx = true} : vector<2x8x1xf32> -> vector<2x8x1xf32>
    %114 = vector.broadcast %113 : vector<2x8x1xf32> to vector<2x8x8xf32>
    %115 = arith.mulf %110, %114 : vector<2x8x8xf32>
    %116 = arith.truncf %115 : vector<2x8x8xf32> to vector<2x8x8xbf16>
    %117 = vector.extract_strided_slice %60 {offsets = [0, 0, 16], sizes = [2, 8, 8], strides = [1, 1, 1]} : vector<2x8x32xbf16> to vector<2x8x8xbf16>
    "tpu.trace_start"() <{level = 10 : i32, message = "bqk,bkd->bqd"}> : () -> ()
    %cst_41 = arith.constant dense<0.000000e+00> : vector<2x8x8xf32>
    %118 = tpu.matmul %116, %117, %cst_41 {dimension_numbers = #tpu.dot_dimension_numbers<[2], [1], [1], [2], [0, 0, 0, 1, 1, 2], [0], [0]>} : vector<2x8x8xbf16>, vector<2x8x8xbf16>, vector<2x8x8xf32> -> vector<2x8x8xf32>
    "tpu.trace_stop"() : () -> ()
    %119 = vector.shape_cast %118 : vector<2x8x8xf32> to vector<16x8xf32>
    %c0_42 = arith.constant 0 : index
    %c16 = arith.constant 16 : index
    %120 = vector.load %arg17[%c0_42, %c16] : memref<16x32xf32, #tpu.memory_space<vmem>>, vector<16x8xf32>
    tpu.vector_store %arg17[%c0_42, %c16], %119 {strides = array<i32>} : memref<16x32xf32, #tpu.memory_space<vmem>>, vector<16x8xf32>,
    %121 = vector.extract_strided_slice %56 {offsets = [0, 0, 24], sizes = [2, 8, 8], strides = [1, 1, 1]} : vector<2x8x32xbf16> to vector<2x8x8xbf16>
    %122 = vector.extract_strided_slice %58 {offsets = [0, 0, 24], sizes = [2, 8, 8], strides = [1, 1, 1]} : vector<2x8x32xbf16> to vector<2x8x8xbf16>
    "tpu.trace_start"() <{level = 10 : i32, message = "bqd,bkd->bqk"}> : () -> ()
    %cst_43 = arith.constant dense<0.000000e+00> : vector<2x8x8xf32>
    %123 = tpu.matmul %121, %122, %cst_43 {dimension_numbers = #tpu.dot_dimension_numbers<[2], [2], [1], [1], [0, 0, 0, 1, 1, 1], [0], [0]>} : vector<2x8x8xbf16>, vector<2x8x8xbf16>, vector<2x8x8xf32> -> vector<2x8x8xf32>
    "tpu.trace_stop"() : () -> ()
    %cst_44 = arith.constant 0.353553385 : f32
    %124 = vector.broadcast %cst_44 : f32 to vector<2x8x8xf32>
    %125 = arith.mulf %123, %124 : vector<2x8x8xf32>
    %cst_45 = arith.constant dense<0xFF800000> : vector<2x8xf32>
    %126 = vector.multi_reduction <maximumf>, %125, %cst_45 [2] : vector<2x8x8xf32> to vector<2x8xf32>
    %127 = vector.shape_cast %126 : vector<2x8xf32> to vector<2x8x1xf32>
    %128 = vector.broadcast %127 : vector<2x8x1xf32> to vector<2x8x8xf32>
    %129 = arith.subf %125, %128 : vector<2x8x8xf32>
    %130 = math.exp %129 : vector<2x8x8xf32>
    %cst_46 = arith.constant dense<0.000000e+00> : vector<2x8xf32>
    %131 = vector.multi_reduction <add>, %130, %cst_46 [2] : vector<2x8x8xf32> to vector<2x8xf32>
    %132 = vector.shape_cast %131 : vector<2x8xf32> to vector<2x8x1xf32>
    %133 = tpu.reciprocal %132 {approx = true} : vector<2x8x1xf32> -> vector<2x8x1xf32>
    %134 = vector.broadcast %133 : vector<2x8x1xf32> to vector<2x8x8xf32>
    %135 = arith.mulf %130, %134 : vector<2x8x8xf32>
    %136 = arith.truncf %135 : vector<2x8x8xf32> to vector<2x8x8xbf16>
    %137 = vector.extract_strided_slice %60 {offsets = [0, 0, 24], sizes = [2, 8, 8], strides = [1, 1, 1]} : vector<2x8x32xbf16> to vector<2x8x8xbf16>
    "tpu.trace_start"() <{level = 10 : i32, message = "bqk,bkd->bqd"}> : () -> ()
    %cst_47 = arith.constant dense<0.000000e+00> : vector<2x8x8xf32>
    %138 = tpu.matmul %136, %137, %cst_47 {dimension_numbers = #tpu.dot_dimension_numbers<[2], [1], [1], [2], [0, 0, 0, 1, 1, 2], [0], [0]>} : vector<2x8x8xbf16>, vector<2x8x8xbf16>, vector<2x8x8xf32> -> vector<2x8x8xf32>
    "tpu.trace_stop"() : () -> ()
    %139 = vector.shape_cast %138 : vector<2x8x8xf32> to vector<16x8xf32>
    %c0_48 = arith.constant 0 : index
    %c24 = arith.constant 24 : index
    %140 = vector.load %arg17[%c0_48, %c24] : memref<16x32xf32, #tpu.memory_space<vmem>>, vector<16x8xf32>
    tpu.vector_store %arg17[%c0_48, %c24], %139 {strides = array<i32>} : memref<16x32xf32, #tpu.memory_space<vmem>>, vector<16x8xf32>,
    %c0_49 = arith.constant 0 : index
    %c0_50 = arith.constant 0 : index
    %141 = vector.load %arg17[%c0_49, %c0_50] : memref<16x32xf32, #tpu.memory_space<vmem>>, vector<16x32xf32>
    %142 = arith.truncf %141 : vector<16x32xf32> to vector<16x32xbf16>
    %cst_51 = arith.constant dense<0.000000e+00> : vector<16x32xf32>
    %143 = tpu.matmul %142, %52, %cst_51 {dimension_numbers = #tpu.dot_dimension_numbers<[1], [0], [0], [1], [0, 0, 1, 1], [], []>} : vector<16x32xbf16>, vector<32x32xbf16>, vector<16x32xf32> -> vector<16x32xf32>
    %144 = vector.broadcast %54 : vector<1x32xf32> to vector<16x32xf32>
    %145 = arith.addf %143, %144 : vector<16x32xf32>
    %146 = arith.addf %3, %145 : vector<16x32xf32>
    %c0_52 = arith.constant 0 : index
    %c0_53 = arith.constant 0 : index
    %c0_54 = arith.constant 0 : index
    %147 = vector.load %arg10[%c0_52, %c0_53, %c0_54] : memref<1x1x32xf32, #tpu.memory_space<vmem>>, vector<1x1x32xf32>
    %148 = vector.shape_cast %147 : vector<1x1x32xf32> to vector<1x32xf32>
    %c0_55 = arith.constant 0 : index
    %c0_56 = arith.constant 0 : index
    %c0_57 = arith.constant 0 : index
    %149 = vector.load %arg11[%c0_55, %c0_56, %c0_57] : memref<1x1x32xf32, #tpu.memory_space<vmem>>, vector<1x1x32xf32>
    %150 = vector.shape_cast %149 : vector<1x1x32xf32> to vector<1x32xf32>
    %cst_58 = arith.constant dense<0.000000e+00> : vector<16xf32>
    %151 = vector.multi_reduction <add>, %146, %cst_58 [1] : vector<16x32xf32> to vector<16xf32>
    %152 = vector.shape_cast %151 : vector<16xf32> to vector<16x1xf32>
    %cst_59 = arith.constant 3.200000e+01 : f32
    %153 = vector.broadcast %cst_59 : f32 to vector<16x1xf32>
    %154 = arith.divf %152, %153 : vector<16x1xf32>
    %155 = vector.broadcast %154 : vector<16x1xf32> to vector<16x32xf32>
    %156 = arith.subf %146, %155 : vector<16x32xf32>
    %157 = vector.broadcast %154 : vector<16x1xf32> to vector<16x32xf32>
    %158 = arith.subf %146, %157 : vector<16x32xf32>
    %159 = arith.mulf %156, %158 : vector<16x32xf32>
    %cst_60 = arith.constant dense<0.000000e+00> : vector<16xf32>
    %160 = vector.multi_reduction <add>, %159, %cst_60 [1] : vector<16x32xf32> to vector<16xf32>
    %161 = vector.shape_cast %160 : vector<16xf32> to vector<16x1xf32>
    %cst_61 = arith.constant 3.200000e+01 : f32
    %162 = vector.broadcast %cst_61 : f32 to vector<16x1xf32>
    %163 = arith.divf %161, %162 : vector<16x1xf32>
    %164 = vector.broadcast %154 : vector<16x1xf32> to vector<16x32xf32>
    %165 = arith.subf %146, %164 : vector<16x32xf32>
    %cst_62 = arith.constant 9.99999974E-6 : f32
    %166 = vector.broadcast %cst_62 : f32 to vector<16x1xf32>
    %167 = arith.addf %163, %166 : vector<16x1xf32>
    %168 = math.rsqrt %167 : vector<16x1xf32>
    %169 = vector.broadcast %168 : vector<16x1xf32> to vector<16x32xf32>
    %170 = arith.mulf %165, %169 : vector<16x32xf32>
    %171 = vector.broadcast %148 : vector<1x32xf32> to vector<16x32xf32>
    %172 = arith.mulf %170, %171 : vector<16x32xf32>
    %173 = vector.broadcast %150 : vector<1x32xf32> to vector<16x32xf32>
    %174 = arith.addf %172, %173 : vector<16x32xf32>
    %c0_63 = arith.constant 0 : index
    %c0_64 = arith.constant 0 : index
    %c0_65 = arith.constant 0 : index
    %175 = vector.load %arg6[%c0_63, %c0_64, %c0_65] : memref<1x32x64xbf16, #tpu.memory_space<vmem>>, vector<1x32x64xbf16>
    %176 = vector.shape_cast %175 : vector<1x32x64xbf16> to vector<32x64xbf16>
    %c0_66 = arith.constant 0 : index
    %c0_67 = arith.constant 0 : index
    %c0_68 = arith.constant 0 : index
    %177 = vector.load %arg7[%c0_66, %c0_67, %c0_68] : memref<1x1x64xf32, #tpu.memory_space<vmem>>, vector<1x1x64xf32>
    %178 = vector.shape_cast %177 : vector<1x1x64xf32> to vector<1x64xf32>
    %179 = arith.truncf %174 : vector<16x32xf32> to vector<16x32xbf16>
    %cst_69 = arith.constant dense<0.000000e+00> : vector<16x64xf32>
    %180 = tpu.matmul %179, %176, %cst_69 {dimension_numbers = #tpu.dot_dimension_numbers<[1], [0], [0], [1], [0, 0, 1, 1], [], []>} : vector<16x32xbf16>, vector<32x64xbf16>, vector<16x64xf32> -> vector<16x64xf32>
    %181 = vector.broadcast %178 : vector<1x64xf32> to vector<16x64xf32>
    %182 = arith.addf %180, %181 : vector<16x64xf32>
    %cst_70 = arith.constant 0.000000e+00 : f32
    %183 = vector.broadcast %cst_70 : f32 to vector<16x64xf32>
    %184 = arith.maximumf %182, %183 : vector<16x64xf32>
    %c0_71 = arith.constant 0 : index
    %c0_72 = arith.constant 0 : index
    %c0_73 = arith.constant 0 : index
    %185 = vector.load %arg8[%c0_71, %c0_72, %c0_73] : memref<1x64x32xbf16, #tpu.memory_space<vmem>>, vector<1x64x32xbf16>
    %186 = vector.shape_cast %185 : vector<1x64x32xbf16> to vector<64x32xbf16>
    %c0_74 = arith.constant 0 : index
    %c0_75 = arith.constant 0 : index
    %c0_76 = arith.constant 0 : index
    %187 = vector.load %arg9[%c0_74, %c0_75, %c0_76] : memref<1x1x32xf32, #tpu.memory_space<vmem>>, vector<1x1x32xf32>
    %188 = vector.shape_cast %187 : vector<1x1x32xf32> to vector<1x32xf32>
    %189 = arith.truncf %184 : vector<16x64xf32> to vector<16x64xbf16>
    %cst_77 = arith.constant dense<0.000000e+00> : vector<16x32xf32>
    %190 = tpu.matmul %189, %186, %cst_77 {dimension_numbers = #tpu.dot_dimension_numbers<[1], [0], [0], [1], [0, 0, 1, 1], [], []>} : vector<16x64xbf16>, vector<64x32xbf16>, vector<16x32xf32> -> vector<16x32xf32>
    %191 = vector.broadcast %188 : vector<1x32xf32> to vector<16x32xf32>
    %192 = arith.addf %190, %191 : vector<16x32xf32>
    %193 = arith.addf %174, %192 : vector<16x32xf32>
    %c0_78 = arith.constant 0 : index
    %c0_79 = arith.constant 0 : index
    %c0_80 = arith.constant 0 : index
    %194 = vector.load %arg12[%c0_78, %c0_79, %c0_80] : memref<1x1x32xf32, #tpu.memory_space<vmem>>, vector<1x1x32xf32>
    %195 = vector.shape_cast %194 : vector<1x1x32xf32> to vector<1x32xf32>
    %c0_81 = arith.constant 0 : index
    %c0_82 = arith.constant 0 : index
    %c0_83 = arith.constant 0 : index
    %196 = vector.load %arg13[%c0_81, %c0_82, %c0_83] : memref<1x1x32xf32, #tpu.memory_space<vmem>>, vector<1x1x32xf32>
    %197 = vector.shape_cast %196 : vector<1x1x32xf32> to vector<1x32xf32>
    %cst_84 = arith.constant dense<0.000000e+00> : vector<16xf32>
    %198 = vector.multi_reduction <add>, %193, %cst_84 [1] : vector<16x32xf32> to vector<16xf32>
    %199 = vector.shape_cast %198 : vector<16xf32> to vector<16x1xf32>
    %cst_85 = arith.constant 3.200000e+01 : f32
    %200 = vector.broadcast %cst_85 : f32 to vector<16x1xf32>
    %201 = arith.divf %199, %200 : vector<16x1xf32>
    %202 = vector.broadcast %201 : vector<16x1xf32> to vector<16x32xf32>
    %203 = arith.subf %193, %202 : vector<16x32xf32>
    %204 = vector.broadcast %201 : vector<16x1xf32> to vector<16x32xf32>
    %205 = arith.subf %193, %204 : vector<16x32xf32>
    %206 = arith.mulf %203, %205 : vector<16x32xf32>
    %cst_86 = arith.constant dense<0.000000e+00> : vector<16xf32>
    %207 = vector.multi_reduction <add>, %206, %cst_86 [1] : vector<16x32xf32> to vector<16xf32>
    %208 = vector.shape_cast %207 : vector<16xf32> to vector<16x1xf32>
    %cst_87 = arith.constant 3.200000e+01 : f32
    %209 = vector.broadcast %cst_87 : f32 to vector<16x1xf32>
    %210 = arith.divf %208, %209 : vector<16x1xf32>
    %211 = vector.broadcast %201 : vector<16x1xf32> to vector<16x32xf32>
    %212 = arith.subf %193, %211 : vector<16x32xf32>
    %cst_88 = arith.constant 9.99999974E-6 : f32
    %213 = vector.broadcast %cst_88 : f32 to vector<16x1xf32>
    %214 = arith.addf %210, %213 : vector<16x1xf32>
    %215 = math.rsqrt %214 : vector<16x1xf32>
    %216 = vector.broadcast %215 : vector<16x1xf32> to vector<16x32xf32>
    %217 = arith.mulf %212, %216 : vector<16x32xf32>
    %218 = vector.broadcast %195 : vector<1x32xf32> to vector<16x32xf32>
    %219 = arith.mulf %217, %218 : vector<16x32xf32>
    %220 = vector.broadcast %197 : vector<1x32xf32> to vector<16x32xf32>
    %221 = arith.addf %219, %220 : vector<16x32xf32>
    %c0_89 = arith.constant 0 : index
    %c0_90 = arith.constant 0 : index
    %222 = vector.load %arg16[%c0_89, %c0_90] : memref<16x32xf32, #tpu.memory_space<vmem>>, vector<16x32xf32>
    tpu.vector_store %arg16[%c0_89, %c0_90], %221 {strides = array<i32>} : memref<16x32xf32, #tpu.memory_space<vmem>>, vector<16x32xf32>,
    %c1_i32_91 = arith.constant 1 : i32
    %223 = arith.cmpi eq, %arg0, %c1_i32_91 : i32
    %224 = arith.extui %223 : i1 to i32
    %c0_i32_92 = arith.constant 0 : i32
    %225 = arith.cmpi ne, %224, %c0_i32_92 : i32
    scf.if %225 {
      %c0_93 = arith.constant 0 : index
      %c0_94 = arith.constant 0 : index
      %226 = vector.load %arg14[%c0_93, %c0_94] : memref<1x32xf32, #tpu.memory_space<vmem>>, vector<1x32xf32>
      %c0_95 = arith.constant 0 : index
      %c0_96 = arith.constant 0 : index
      %227 = vector.load %arg15[%c0_95, %c0_96] : memref<1x32xf32, #tpu.memory_space<vmem>>, vector<1x32xf32>
      %cst_97 = arith.constant dense<0.000000e+00> : vector<16xf32>
      %228 = vector.multi_reduction <add>, %221, %cst_97 [1] : vector<16x32xf32> to vector<16xf32>
      %229 = vector.shape_cast %228 : vector<16xf32> to vector<16x1xf32>
      %cst_98 = arith.constant 3.200000e+01 : f32
      %230 = vector.broadcast %cst_98 : f32 to vector<16x1xf32>
      %231 = arith.divf %229, %230 : vector<16x1xf32>
      %232 = vector.broadcast %231 : vector<16x1xf32> to vector<16x32xf32>
      %233 = arith.subf %221, %232 : vector<16x32xf32>
      %234 = vector.broadcast %231 : vector<16x1xf32> to vector<16x32xf32>
      %235 = arith.subf %221, %234 : vector<16x32xf32>
      %236 = arith.mulf %233, %235 : vector<16x32xf32>
      %cst_99 = arith.constant dense<0.000000e+00> : vector<16xf32>
      %237 = vector.multi_reduction <add>, %236, %cst_99 [1] : vector<16x32xf32> to vector<16xf32>
      %238 = vector.shape_cast %237 : vector<16xf32> to vector<16x1xf32>
      %cst_100 = arith.constant 3.200000e+01 : f32
      %239 = vector.broadcast %cst_100 : f32 to vector<16x1xf32>
      %240 = arith.divf %238, %239 : vector<16x1xf32>
      %241 = vector.broadcast %231 : vector<16x1xf32> to vector<16x32xf32>
      %242 = arith.subf %221, %241 : vector<16x32xf32>
      %cst_101 = arith.constant 9.99999974E-6 : f32
      %243 = vector.broadcast %cst_101 : f32 to vector<16x1xf32>
      %244 = arith.addf %240, %243 : vector<16x1xf32>
      %245 = math.rsqrt %244 : vector<16x1xf32>
      %246 = vector.broadcast %245 : vector<16x1xf32> to vector<16x32xf32>
      %247 = arith.mulf %242, %246 : vector<16x32xf32>
      %248 = vector.broadcast %226 : vector<1x32xf32> to vector<16x32xf32>
      %249 = arith.mulf %247, %248 : vector<16x32xf32>
      %250 = vector.broadcast %227 : vector<1x32xf32> to vector<16x32xf32>
      %251 = arith.addf %249, %250 : vector<16x32xf32>
      %c0_102 = arith.constant 0 : index
      %c0_103 = arith.constant 0 : index
      %252 = vector.load %arg16[%c0_102, %c0_103] : memref<16x32xf32, #tpu.memory_space<vmem>>, vector<16x32xf32>
      tpu.vector_store %arg16[%c0_102, %c0_103], %251 {strides = array<i32>} : memref<16x32xf32, #tpu.memory_space<vmem>>, vector<16x32xf32>,
    } else {
    }
    return
  }
  func.func @transform_0(%arg0: i32) -> (i32, i32) {
    %c0_i32 = arith.constant 0 : i32
    %c0_i32_0 = arith.constant 0 : i32
    %c0_i32_1 = arith.constant 0 : i32
    return %c0_i32, %c0_i32_0 : i32, i32
  }
  func.func @transform_1(%arg0: i32) -> (i32, i32, i32) {
    %c0_i32 = arith.constant 0 : i32
    %c0_i32_0 = arith.constant 0 : i32
    %c0_i32_1 = arith.constant 0 : i32
    return %arg0, %c0_i32, %c0_i32_0 : i32, i32, i32
  }
  func.func @transform_2(%arg0: i32) -> (i32, i32, i32) {
    %c0_i32 = arith.constant 0 : i32
    %c0_i32_0 = arith.constant 0 : i32
    %c0_i32_1 = arith.constant 0 : i32
    return %arg0, %c0_i32, %c0_i32_0 : i32, i32, i32
  }
  func.func @transform_3(%arg0: i32) -> (i32, i32, i32) {
    %c0_i32 = arith.constant 0 : i32
    %c0_i32_0 = arith.constant 0 : i32
    %c0_i32_1 = arith.constant 0 : i32
    return %arg0, %c0_i32, %c0_i32_0 : i32, i32, i32
  }
  func.func @transform_4(%arg0: i32) -> (i32, i32, i32) {
    %c0_i32 = arith.constant 0 : i32
    %c0_i32_0 = arith.constant 0 : i32
    %c0_i32_1 = arith.constant 0 : i32
    return %arg0, %c0_i32, %c0_i32_0 : i32, i32, i32
  }
  func.func @transform_5(%arg0: i32) -> (i32, i32, i32) {
    %c0_i32 = arith.constant 0 : i32
    %c0_i32_0 = arith.constant 0 : i32
    %c0_i32_1 = arith.constant 0 : i32
    return %arg0, %c0_i32, %c0_i32_0 : i32, i32, i32
  }
  func.func @transform_6(%arg0: i32) -> (i32, i32, i32) {
    %c0_i32 = arith.constant 0 : i32
    %c0_i32_0 = arith.constant 0 : i32
    %c0_i32_1 = arith.constant 0 : i32
    return %arg0, %c0_i32, %c0_i32_0 : i32, i32, i32
  }
  func.func @transform_7(%arg0: i32) -> (i32, i32, i32) {
    %c0_i32 = arith.constant 0 : i32
    %c0_i32_0 = arith.constant 0 : i32
    %c0_i32_1 = arith.constant 0 : i32
    return %arg0, %c0_i32, %c0_i32_0 : i32, i32, i32
  }
  func.func @transform_8(%arg0: i32) -> (i32, i32, i32) {
    %c0_i32 = arith.constant 0 : i32
    %c0_i32_0 = arith.constant 0 : i32
    %c0_i32_1 = arith.constant 0 : i32
    return %arg0, %c0_i32, %c0_i32_0 : i32, i32, i32
  }
  func.func @transform_9(%arg0: i32) -> (i32, i32, i32) {
    %c0_i32 = arith.constant 0 : i32
    %c0_i32_0 = arith.constant 0 : i32
    %c0_i32_1 = arith.constant 0 : i32
    return %arg0, %c0_i32, %c0_i32_0 : i32, i32, i32
  }
  func.func @transform_10(%arg0: i32) -> (i32, i32, i32) {
    %c0_i32 = arith.constant 0 : i32
    %c0_i32_0 = arith.constant 0 : i32
    %c0_i32_1 = arith.constant 0 : i32
    return %arg0, %c0_i32, %c0_i32_0 : i32, i32, i32
  }
  func.func @transform_11(%arg0: i32) -> (i32, i32, i32) {
    %c0_i32 = arith.constant 0 : i32
    %c0_i32_0 = arith.constant 0 : i32
    %c0_i32_1 = arith.constant 0 : i32
    return %arg0, %c0_i32, %c0_i32_0 : i32, i32, i32
  }
  func.func @transform_12(%arg0: i32) -> (i32, i32, i32) {
    %c0_i32 = arith.constant 0 : i32
    %c0_i32_0 = arith.constant 0 : i32
    %c0_i32_1 = arith.constant 0 : i32
    return %arg0, %c0_i32, %c0_i32_0 : i32, i32, i32
  }
  func.func @transform_13(%arg0: i32) -> (i32, i32) {
    %c0_i32 = arith.constant 0 : i32
    %c0_i32_0 = arith.constant 0 : i32
    %c0_i32_1 = arith.constant 0 : i32
    return %c0_i32, %c0_i32_0 : i32, i32
  }
  func.func @transform_14(%arg0: i32) -> (i32, i32) {
    %c0_i32 = arith.constant 0 : i32
    %c0_i32_0 = arith.constant 0 : i32
    %c0_i32_1 = arith.constant 0 : i32
    return %c0_i32, %c0_i32_0 : i32, i32
  }
  func.func @transform_15(%arg0: i32) -> (i32, i32) {
    %c0_i32 = arith.constant 0 : i32
    %c0_i32_0 = arith.constant 0 : i32
    %c0_i32_1 = arith.constant 0 : i32
    return %c0_i32, %c0_i32_0 : i32, i32
  }
}

module attributes {stable_mosaic.version = 11 : i64} {
  func.func @kern(%arg0: i32, %arg1: memref<16x32xf32, #tpu.memory_space<vmem>>, %arg2: memref<16x32xf32, #tpu.memory_space<vmem>>, %arg3: memref<1x96x96xbf16, #tpu.memory_space<vmem>>, %arg4: memref<1x1x96xf32, #tpu.memory_space<vmem>>, %arg5: memref<1x32x32xbf16, #tpu.memory_space<vmem>>, %arg6: memref<1x1x32xf32, #tpu.memory_space<vmem>>, %arg7: memref<1x96x32xbf16, #tpu.memory_space<vmem>>, %arg8: memref<1x1x32xf32, #tpu.memory_space<vmem>>, %arg9: memref<1x96x64xbf16, #tpu.memory_space<vmem>>, %arg10: memref<1x1x64xf32, #tpu.memory_space<vmem>>, %arg11: memref<1x32x32xbf16, #tpu.memory_space<vmem>>, %arg12: memref<1x1x32xf32, #tpu.memory_space<vmem>>, %arg13: memref<1x32x64xbf16, #tpu.memory_space<vmem>>, %arg14: memref<1x1x64xf32, #tpu.memory_space<vmem>>, %arg15: memref<1x64x32xbf16, #tpu.memory_space<vmem>>, %arg16: memref<1x1x32xf32, #tpu.memory_space<vmem>>, %arg17: memref<1x1x32xf32, #tpu.memory_space<vmem>>, %arg18: memref<1x1x32xf32, #tpu.memory_space<vmem>>, %arg19: memref<1x1x32xf32, #tpu.memory_space<vmem>>, %arg20: memref<1x1x32xf32, #tpu.memory_space<vmem>>, %arg21: memref<1x1x32xf32, #tpu.memory_space<vmem>>, %arg22: memref<1x1x32xf32, #tpu.memory_space<vmem>>, %arg23: memref<1x32xf32, #tpu.memory_space<vmem>>, %arg24: memref<1x32xf32, #tpu.memory_space<vmem>>, %arg25: memref<16x32xf32, #tpu.memory_space<vmem>>, %arg26: memref<16x32xf32, #tpu.memory_space<vmem>>) attributes {dimension_semantics = [#tpu.dimension_semantics<arbitrary>], iteration_bounds = array<i64: 2>, scalar_prefetch = 0 : i64, scratch_operands = 1 : i64, tpu.core_type = #tpu.core_type<tc>, window_params = [{pipeline_mode = #tpu.pipeline_mode<synchronous>, transform_indices = @transform_0, window_bounds = array<i64: 16, 32>}, {pipeline_mode = #tpu.pipeline_mode<synchronous>, transform_indices = @transform_1, window_bounds = array<i64: 16, 32>}, {transform_indices = @transform_2, window_bounds = array<i64: 1, 96, 96>}, {transform_indices = @transform_3, window_bounds = array<i64: 1, 1, 96>}, {transform_indices = @transform_4, window_bounds = array<i64: 1, 32, 32>}, {transform_indices = @transform_5, window_bounds = array<i64: 1, 1, 32>}, {transform_indices = @transform_6, window_bounds = array<i64: 1, 96, 32>}, {transform_indices = @transform_7, window_bounds = array<i64: 1, 1, 32>}, {transform_indices = @transform_8, window_bounds = array<i64: 1, 96, 64>}, {transform_indices = @transform_9, window_bounds = array<i64: 1, 1, 64>}, {transform_indices = @transform_10, window_bounds = array<i64: 1, 32, 32>}, {transform_indices = @transform_11, window_bounds = array<i64: 1, 1, 32>}, {transform_indices = @transform_12, window_bounds = array<i64: 1, 32, 64>}, {transform_indices = @transform_13, window_bounds = array<i64: 1, 1, 64>}, {transform_indices = @transform_14, window_bounds = array<i64: 1, 64, 32>}, {transform_indices = @transform_15, window_bounds = array<i64: 1, 1, 32>}, {transform_indices = @transform_16, window_bounds = array<i64: 1, 1, 32>}, {transform_indices = @transform_17, window_bounds = array<i64: 1, 1, 32>}, {transform_indices = @transform_18, window_bounds = array<i64: 1, 1, 32>}, {transform_indices = @transform_19, window_bounds = array<i64: 1, 1, 32>}, {transform_indices = @transform_20, window_bounds = array<i64: 1, 1, 32>}, {transform_indices = @transform_21, window_bounds = array<i64: 1, 1, 32>}, {pipeline_mode = #tpu.pipeline_mode<synchronous>, transform_indices = @transform_22, window_bounds = array<i64: 1, 32>}, {pipeline_mode = #tpu.pipeline_mode<synchronous>, transform_indices = @transform_23, window_bounds = array<i64: 1, 32>}, {pipeline_mode = #tpu.pipeline_mode<synchronous>, transform_indices = @transform_24, window_bounds = array<i64: 16, 32>}]} {
    %c0_i32 = arith.constant 0 : i32
    %0 = arith.cmpi eq, %arg0, %c0_i32 : i32
    %1 = arith.extui %0 : i1 to i32
    %c0_i32_0 = arith.constant 0 : i32
    %2 = arith.cmpi ne, %1, %c0_i32_0 : i32
    scf.if %2 {
      %c0_187 = arith.constant 0 : index
      %c0_188 = arith.constant 0 : index
      %456 = vector.load %arg1[%c0_187, %c0_188] : memref<16x32xf32, #tpu.memory_space<vmem>>, vector<16x32xf32>
      %c0_189 = arith.constant 0 : index
      %c0_190 = arith.constant 0 : index
      %457 = vector.load %arg25[%c0_189, %c0_190] : memref<16x32xf32, #tpu.memory_space<vmem>>, vector<16x32xf32>
      tpu.vector_store %arg25[%c0_189, %c0_190], %456 {strides = array<i32>} : memref<16x32xf32, #tpu.memory_space<vmem>>, vector<16x32xf32>,
    } else {
    }
    %c0 = arith.constant 0 : index
    %c0_1 = arith.constant 0 : index
    %3 = vector.load %arg25[%c0, %c0_1] : memref<16x32xf32, #tpu.memory_space<vmem>>, vector<16x32xf32>
    %c0_2 = arith.constant 0 : index
    %c0_3 = arith.constant 0 : index
    %4 = vector.load %arg2[%c0_2, %c0_3] : memref<16x32xf32, #tpu.memory_space<vmem>>, vector<16x32xf32>
    %c0_4 = arith.constant 0 : index
    %c0_5 = arith.constant 0 : index
    %c0_6 = arith.constant 0 : index
    %5 = vector.load %arg3[%c0_4, %c0_5, %c0_6] : memref<1x96x96xbf16, #tpu.memory_space<vmem>>, vector<1x96x96xbf16>
    %6 = vector.shape_cast %5 : vector<1x96x96xbf16> to vector<96x96xbf16>
    %c0_7 = arith.constant 0 : index
    %c0_8 = arith.constant 0 : index
    %c0_9 = arith.constant 0 : index
    %7 = vector.load %arg4[%c0_7, %c0_8, %c0_9] : memref<1x1x96xf32, #tpu.memory_space<vmem>>, vector<1x1x96xf32>
    %8 = vector.shape_cast %7 : vector<1x1x96xf32> to vector<1x96xf32>
    %9 = tpu.iota {dimensions = array<i32: 0>} : vector<16x32xi32>
    %c8_i32 = arith.constant 8 : i32
    %c0_i32_10 = arith.constant 0 : i32
    %10 = arith.cmpi eq, %c8_i32, %c0_i32_10 : i32
    %c1_i32 = arith.constant 1 : i32
    %11 = arith.select %10, %c1_i32, %c8_i32 : i32
    %12 = vector.broadcast %11 : i32 to vector<16x32xi32>
    %13 = arith.remsi %9, %12 : vector<16x32xi32>
    %c0_i32_11 = arith.constant 0 : i32
    %14 = vector.broadcast %c0_i32_11 : i32 to vector<16x32xi32>
    %15 = arith.cmpi ne, %13, %14 : vector<16x32xi32>
    %c0_i32_12 = arith.constant 0 : i32
    %16 = vector.broadcast %c0_i32_12 : i32 to vector<16x32xi32>
    %17 = arith.cmpi slt, %13, %16 : vector<16x32xi32>
    %c0_i32_13 = arith.constant 0 : i32
    %18 = arith.cmpi slt, %11, %c0_i32_13 : i32
    %19 = vector.broadcast %18 : i1 to vector<16x32xi1>
    %20 = vector.broadcast %19 : vector<16x32xi1> to vector<16x32xi1>
    %21 = arith.xori %17, %20 : vector<16x32xi1>
    %22 = arith.andi %21, %15 : vector<16x32xi1>
    %23 = vector.broadcast %11 : i32 to vector<16x32xi32>
    %24 = arith.addi %13, %23 : vector<16x32xi32>
    %25 = arith.select %22, %24, %13 : vector<16x32xi1>, vector<16x32xi32>
    %c1_i32_14 = arith.constant 1 : i32
    %26 = tpu.dynamic_rotate %3 by %c1_i32_14 dim 0 : vector<16x32xf32>, i32 -> vector<16x32xf32>
    %c1_i32_15 = arith.constant 1 : i32
    %27 = vector.broadcast %c1_i32_15 : i32 to vector<16x32xi32>
    %28 = arith.cmpi sge, %25, %27 : vector<16x32xi32>
    %cst = arith.constant 0.000000e+00 : f32
    %29 = vector.broadcast %cst : f32 to vector<16x32xf32>
    %30 = arith.select %28, %26, %29 : vector<16x32xi1>, vector<16x32xf32>
    %31 = arith.truncf %30 : vector<16x32xf32> to vector<16x32xbf16>
    %32 = vector.extract_strided_slice %6 {offsets = [0, 0], sizes = [32, 96], strides = [1, 1]} : vector<96x96xbf16> to vector<32x96xbf16>
    %cst_16 = arith.constant dense<0.000000e+00> : vector<16x96xf32>
    %33 = tpu.matmul %31, %32, %cst_16 {dimension_numbers = #tpu.dot_dimension_numbers<[1], [0], [0], [1], [0, 0, 1, 1], [], []>} : vector<16x32xbf16>, vector<32x96xbf16>, vector<16x96xf32> -> vector<16x96xf32>
    %34 = arith.truncf %3 : vector<16x32xf32> to vector<16x32xbf16>
    %35 = vector.extract_strided_slice %6 {offsets = [32, 0], sizes = [32, 96], strides = [1, 1]} : vector<96x96xbf16> to vector<32x96xbf16>
    %cst_17 = arith.constant dense<0.000000e+00> : vector<16x96xf32>
    %36 = tpu.matmul %34, %35, %cst_17 {dimension_numbers = #tpu.dot_dimension_numbers<[1], [0], [0], [1], [0, 0, 1, 1], [], []>} : vector<16x32xbf16>, vector<32x96xbf16>, vector<16x96xf32> -> vector<16x96xf32>
    %37 = arith.addf %33, %36 : vector<16x96xf32>
    %c15_i32 = arith.constant 15 : i32
    %38 = tpu.dynamic_rotate %3 by %c15_i32 dim 0 : vector<16x32xf32>, i32 -> vector<16x32xf32>
    %c7_i32 = arith.constant 7 : i32
    %39 = vector.broadcast %c7_i32 : i32 to vector<16x32xi32>
    %40 = arith.cmpi slt, %25, %39 : vector<16x32xi32>
    %cst_18 = arith.constant 0.000000e+00 : f32
    %41 = vector.broadcast %cst_18 : f32 to vector<16x32xf32>
    %42 = arith.select %40, %38, %41 : vector<16x32xi1>, vector<16x32xf32>
    %43 = arith.truncf %42 : vector<16x32xf32> to vector<16x32xbf16>
    %44 = vector.extract_strided_slice %6 {offsets = [64, 0], sizes = [32, 96], strides = [1, 1]} : vector<96x96xbf16> to vector<32x96xbf16>
    %cst_19 = arith.constant dense<0.000000e+00> : vector<16x96xf32>
    %45 = tpu.matmul %43, %44, %cst_19 {dimension_numbers = #tpu.dot_dimension_numbers<[1], [0], [0], [1], [0, 0, 1, 1], [], []>} : vector<16x32xbf16>, vector<32x96xbf16>, vector<16x96xf32> -> vector<16x96xf32>
    %46 = arith.addf %37, %45 : vector<16x96xf32>
    %47 = vector.broadcast %8 : vector<1x96xf32> to vector<16x96xf32>
    %48 = arith.addf %46, %47 : vector<16x96xf32>
    %49 = vector.extract_strided_slice %48 {offsets = [0, 0], sizes = [16, 32], strides = [1, 1]} : vector<16x96xf32> to vector<16x32xf32>
    %50 = vector.extract_strided_slice %48 {offsets = [0, 32], sizes = [16, 32], strides = [1, 1]} : vector<16x96xf32> to vector<16x32xf32>
    %51 = vector.extract_strided_slice %48 {offsets = [0, 64], sizes = [16, 32], strides = [1, 1]} : vector<16x96xf32> to vector<16x32xf32>
    %c0_20 = arith.constant 0 : index
    %c0_21 = arith.constant 0 : index
    %c0_22 = arith.constant 0 : index
    %52 = vector.load %arg5[%c0_20, %c0_21, %c0_22] : memref<1x32x32xbf16, #tpu.memory_space<vmem>>, vector<1x32x32xbf16>
    %53 = vector.shape_cast %52 : vector<1x32x32xbf16> to vector<32x32xbf16>
    %c0_23 = arith.constant 0 : index
    %c0_24 = arith.constant 0 : index
    %c0_25 = arith.constant 0 : index
    %54 = vector.load %arg6[%c0_23, %c0_24, %c0_25] : memref<1x1x32xf32, #tpu.memory_space<vmem>>, vector<1x1x32xf32>
    %55 = vector.shape_cast %54 : vector<1x1x32xf32> to vector<1x32xf32>
    %56 = vector.shape_cast %49 : vector<16x32xf32> to vector<2x8x32xf32>
    %57 = arith.truncf %56 : vector<2x8x32xf32> to vector<2x8x32xbf16>
    %58 = vector.shape_cast %50 : vector<16x32xf32> to vector<2x8x32xf32>
    %59 = arith.truncf %58 : vector<2x8x32xf32> to vector<2x8x32xbf16>
    %60 = vector.shape_cast %51 : vector<16x32xf32> to vector<2x8x32xf32>
    %61 = arith.truncf %60 : vector<2x8x32xf32> to vector<2x8x32xbf16>
    %62 = tpu.iota {dimensions = array<i32: 0>} : vector<8x8xi32>
    %63 = tpu.iota {dimensions = array<i32: 1>} : vector<8x8xi32>
    %64 = arith.cmpi sle, %63, %62 : vector<8x8xi32>
    %cst_26 = arith.constant 0.000000e+00 : f32
    %cst_27 = arith.constant -1.000000e+30 : f32
    %65 = vector.broadcast %cst_26 : f32 to vector<8x8xf32>
    %66 = vector.broadcast %cst_27 : f32 to vector<8x8xf32>
    %67 = arith.select %64, %65, %66 : vector<8x8xi1>, vector<8x8xf32>
    %68 = vector.shape_cast %67 : vector<8x8xf32> to vector<1x8x8xf32>
    %69 = vector.extract_strided_slice %57 {offsets = [0, 0, 0], sizes = [2, 8, 8], strides = [1, 1, 1]} : vector<2x8x32xbf16> to vector<2x8x8xbf16>
    %70 = vector.extract_strided_slice %59 {offsets = [0, 0, 0], sizes = [2, 8, 8], strides = [1, 1, 1]} : vector<2x8x32xbf16> to vector<2x8x8xbf16>
    "tpu.trace_start"() <{level = 10 : i32, message = "bqd,bkd->bqk"}> : () -> ()
    %cst_28 = arith.constant dense<0.000000e+00> : vector<2x8x8xf32>
    %71 = tpu.matmul %69, %70, %cst_28 {dimension_numbers = #tpu.dot_dimension_numbers<[2], [2], [1], [1], [0, 0, 0, 1, 1, 1], [0], [0]>} : vector<2x8x8xbf16>, vector<2x8x8xbf16>, vector<2x8x8xf32> -> vector<2x8x8xf32>
    "tpu.trace_stop"() : () -> ()
    %cst_29 = arith.constant 0.353553385 : f32
    %72 = vector.broadcast %cst_29 : f32 to vector<2x8x8xf32>
    %73 = arith.mulf %71, %72 : vector<2x8x8xf32>
    %74 = vector.broadcast %68 : vector<1x8x8xf32> to vector<2x8x8xf32>
    %75 = arith.addf %73, %74 : vector<2x8x8xf32>
    %cst_30 = arith.constant dense<0xFF800000> : vector<2x8xf32>
    %76 = vector.multi_reduction <maximumf>, %75, %cst_30 [2] : vector<2x8x8xf32> to vector<2x8xf32>
    %77 = vector.shape_cast %76 : vector<2x8xf32> to vector<2x8x1xf32>
    %78 = vector.broadcast %77 : vector<2x8x1xf32> to vector<2x8x8xf32>
    %79 = arith.subf %75, %78 : vector<2x8x8xf32>
    %80 = math.exp %79 : vector<2x8x8xf32>
    %cst_31 = arith.constant dense<0.000000e+00> : vector<2x8xf32>
    %81 = vector.multi_reduction <add>, %80, %cst_31 [2] : vector<2x8x8xf32> to vector<2x8xf32>
    %82 = vector.shape_cast %81 : vector<2x8xf32> to vector<2x8x1xf32>
    %83 = tpu.reciprocal %82 {approx = true} : vector<2x8x1xf32> -> vector<2x8x1xf32>
    %84 = vector.broadcast %83 : vector<2x8x1xf32> to vector<2x8x8xf32>
    %85 = arith.mulf %80, %84 : vector<2x8x8xf32>
    %86 = arith.truncf %85 : vector<2x8x8xf32> to vector<2x8x8xbf16>
    %87 = vector.extract_strided_slice %61 {offsets = [0, 0, 0], sizes = [2, 8, 8], strides = [1, 1, 1]} : vector<2x8x32xbf16> to vector<2x8x8xbf16>
    "tpu.trace_start"() <{level = 10 : i32, message = "bqk,bkd->bqd"}> : () -> ()
    %cst_32 = arith.constant dense<0.000000e+00> : vector<2x8x8xf32>
    %88 = tpu.matmul %86, %87, %cst_32 {dimension_numbers = #tpu.dot_dimension_numbers<[2], [1], [1], [2], [0, 0, 0, 1, 1, 2], [0], [0]>} : vector<2x8x8xbf16>, vector<2x8x8xbf16>, vector<2x8x8xf32> -> vector<2x8x8xf32>
    "tpu.trace_stop"() : () -> ()
    %89 = vector.shape_cast %88 : vector<2x8x8xf32> to vector<16x8xf32>
    %c0_33 = arith.constant 0 : index
    %c0_34 = arith.constant 0 : index
    %90 = vector.load %arg26[%c0_33, %c0_34] : memref<16x32xf32, #tpu.memory_space<vmem>>, vector<16x8xf32>
    tpu.vector_store %arg26[%c0_33, %c0_34], %89 {strides = array<i32>} : memref<16x32xf32, #tpu.memory_space<vmem>>, vector<16x8xf32>,
    %91 = vector.extract_strided_slice %57 {offsets = [0, 0, 8], sizes = [2, 8, 8], strides = [1, 1, 1]} : vector<2x8x32xbf16> to vector<2x8x8xbf16>
    %92 = vector.extract_strided_slice %59 {offsets = [0, 0, 8], sizes = [2, 8, 8], strides = [1, 1, 1]} : vector<2x8x32xbf16> to vector<2x8x8xbf16>
    "tpu.trace_start"() <{level = 10 : i32, message = "bqd,bkd->bqk"}> : () -> ()
    %cst_35 = arith.constant dense<0.000000e+00> : vector<2x8x8xf32>
    %93 = tpu.matmul %91, %92, %cst_35 {dimension_numbers = #tpu.dot_dimension_numbers<[2], [2], [1], [1], [0, 0, 0, 1, 1, 1], [0], [0]>} : vector<2x8x8xbf16>, vector<2x8x8xbf16>, vector<2x8x8xf32> -> vector<2x8x8xf32>
    "tpu.trace_stop"() : () -> ()
    %cst_36 = arith.constant 0.353553385 : f32
    %94 = vector.broadcast %cst_36 : f32 to vector<2x8x8xf32>
    %95 = arith.mulf %93, %94 : vector<2x8x8xf32>
    %96 = vector.broadcast %68 : vector<1x8x8xf32> to vector<2x8x8xf32>
    %97 = arith.addf %95, %96 : vector<2x8x8xf32>
    %cst_37 = arith.constant dense<0xFF800000> : vector<2x8xf32>
    %98 = vector.multi_reduction <maximumf>, %97, %cst_37 [2] : vector<2x8x8xf32> to vector<2x8xf32>
    %99 = vector.shape_cast %98 : vector<2x8xf32> to vector<2x8x1xf32>
    %100 = vector.broadcast %99 : vector<2x8x1xf32> to vector<2x8x8xf32>
    %101 = arith.subf %97, %100 : vector<2x8x8xf32>
    %102 = math.exp %101 : vector<2x8x8xf32>
    %cst_38 = arith.constant dense<0.000000e+00> : vector<2x8xf32>
    %103 = vector.multi_reduction <add>, %102, %cst_38 [2] : vector<2x8x8xf32> to vector<2x8xf32>
    %104 = vector.shape_cast %103 : vector<2x8xf32> to vector<2x8x1xf32>
    %105 = tpu.reciprocal %104 {approx = true} : vector<2x8x1xf32> -> vector<2x8x1xf32>
    %106 = vector.broadcast %105 : vector<2x8x1xf32> to vector<2x8x8xf32>
    %107 = arith.mulf %102, %106 : vector<2x8x8xf32>
    %108 = arith.truncf %107 : vector<2x8x8xf32> to vector<2x8x8xbf16>
    %109 = vector.extract_strided_slice %61 {offsets = [0, 0, 8], sizes = [2, 8, 8], strides = [1, 1, 1]} : vector<2x8x32xbf16> to vector<2x8x8xbf16>
    "tpu.trace_start"() <{level = 10 : i32, message = "bqk,bkd->bqd"}> : () -> ()
    %cst_39 = arith.constant dense<0.000000e+00> : vector<2x8x8xf32>
    %110 = tpu.matmul %108, %109, %cst_39 {dimension_numbers = #tpu.dot_dimension_numbers<[2], [1], [1], [2], [0, 0, 0, 1, 1, 2], [0], [0]>} : vector<2x8x8xbf16>, vector<2x8x8xbf16>, vector<2x8x8xf32> -> vector<2x8x8xf32>
    "tpu.trace_stop"() : () -> ()
    %111 = vector.shape_cast %110 : vector<2x8x8xf32> to vector<16x8xf32>
    %c0_40 = arith.constant 0 : index
    %c8 = arith.constant 8 : index
    %112 = vector.load %arg26[%c0_40, %c8] : memref<16x32xf32, #tpu.memory_space<vmem>>, vector<16x8xf32>
    tpu.vector_store %arg26[%c0_40, %c8], %111 {strides = array<i32>} : memref<16x32xf32, #tpu.memory_space<vmem>>, vector<16x8xf32>,
    %113 = vector.extract_strided_slice %57 {offsets = [0, 0, 16], sizes = [2, 8, 8], strides = [1, 1, 1]} : vector<2x8x32xbf16> to vector<2x8x8xbf16>
    %114 = vector.extract_strided_slice %59 {offsets = [0, 0, 16], sizes = [2, 8, 8], strides = [1, 1, 1]} : vector<2x8x32xbf16> to vector<2x8x8xbf16>
    "tpu.trace_start"() <{level = 10 : i32, message = "bqd,bkd->bqk"}> : () -> ()
    %cst_41 = arith.constant dense<0.000000e+00> : vector<2x8x8xf32>
    %115 = tpu.matmul %113, %114, %cst_41 {dimension_numbers = #tpu.dot_dimension_numbers<[2], [2], [1], [1], [0, 0, 0, 1, 1, 1], [0], [0]>} : vector<2x8x8xbf16>, vector<2x8x8xbf16>, vector<2x8x8xf32> -> vector<2x8x8xf32>
    "tpu.trace_stop"() : () -> ()
    %cst_42 = arith.constant 0.353553385 : f32
    %116 = vector.broadcast %cst_42 : f32 to vector<2x8x8xf32>
    %117 = arith.mulf %115, %116 : vector<2x8x8xf32>
    %118 = vector.broadcast %68 : vector<1x8x8xf32> to vector<2x8x8xf32>
    %119 = arith.addf %117, %118 : vector<2x8x8xf32>
    %cst_43 = arith.constant dense<0xFF800000> : vector<2x8xf32>
    %120 = vector.multi_reduction <maximumf>, %119, %cst_43 [2] : vector<2x8x8xf32> to vector<2x8xf32>
    %121 = vector.shape_cast %120 : vector<2x8xf32> to vector<2x8x1xf32>
    %122 = vector.broadcast %121 : vector<2x8x1xf32> to vector<2x8x8xf32>
    %123 = arith.subf %119, %122 : vector<2x8x8xf32>
    %124 = math.exp %123 : vector<2x8x8xf32>
    %cst_44 = arith.constant dense<0.000000e+00> : vector<2x8xf32>
    %125 = vector.multi_reduction <add>, %124, %cst_44 [2] : vector<2x8x8xf32> to vector<2x8xf32>
    %126 = vector.shape_cast %125 : vector<2x8xf32> to vector<2x8x1xf32>
    %127 = tpu.reciprocal %126 {approx = true} : vector<2x8x1xf32> -> vector<2x8x1xf32>
    %128 = vector.broadcast %127 : vector<2x8x1xf32> to vector<2x8x8xf32>
    %129 = arith.mulf %124, %128 : vector<2x8x8xf32>
    %130 = arith.truncf %129 : vector<2x8x8xf32> to vector<2x8x8xbf16>
    %131 = vector.extract_strided_slice %61 {offsets = [0, 0, 16], sizes = [2, 8, 8], strides = [1, 1, 1]} : vector<2x8x32xbf16> to vector<2x8x8xbf16>
    "tpu.trace_start"() <{level = 10 : i32, message = "bqk,bkd->bqd"}> : () -> ()
    %cst_45 = arith.constant dense<0.000000e+00> : vector<2x8x8xf32>
    %132 = tpu.matmul %130, %131, %cst_45 {dimension_numbers = #tpu.dot_dimension_numbers<[2], [1], [1], [2], [0, 0, 0, 1, 1, 2], [0], [0]>} : vector<2x8x8xbf16>, vector<2x8x8xbf16>, vector<2x8x8xf32> -> vector<2x8x8xf32>
    "tpu.trace_stop"() : () -> ()
    %133 = vector.shape_cast %132 : vector<2x8x8xf32> to vector<16x8xf32>
    %c0_46 = arith.constant 0 : index
    %c16 = arith.constant 16 : index
    %134 = vector.load %arg26[%c0_46, %c16] : memref<16x32xf32, #tpu.memory_space<vmem>>, vector<16x8xf32>
    tpu.vector_store %arg26[%c0_46, %c16], %133 {strides = array<i32>} : memref<16x32xf32, #tpu.memory_space<vmem>>, vector<16x8xf32>,
    %135 = vector.extract_strided_slice %57 {offsets = [0, 0, 24], sizes = [2, 8, 8], strides = [1, 1, 1]} : vector<2x8x32xbf16> to vector<2x8x8xbf16>
    %136 = vector.extract_strided_slice %59 {offsets = [0, 0, 24], sizes = [2, 8, 8], strides = [1, 1, 1]} : vector<2x8x32xbf16> to vector<2x8x8xbf16>
    "tpu.trace_start"() <{level = 10 : i32, message = "bqd,bkd->bqk"}> : () -> ()
    %cst_47 = arith.constant dense<0.000000e+00> : vector<2x8x8xf32>
    %137 = tpu.matmul %135, %136, %cst_47 {dimension_numbers = #tpu.dot_dimension_numbers<[2], [2], [1], [1], [0, 0, 0, 1, 1, 1], [0], [0]>} : vector<2x8x8xbf16>, vector<2x8x8xbf16>, vector<2x8x8xf32> -> vector<2x8x8xf32>
    "tpu.trace_stop"() : () -> ()
    %cst_48 = arith.constant 0.353553385 : f32
    %138 = vector.broadcast %cst_48 : f32 to vector<2x8x8xf32>
    %139 = arith.mulf %137, %138 : vector<2x8x8xf32>
    %140 = vector.broadcast %68 : vector<1x8x8xf32> to vector<2x8x8xf32>
    %141 = arith.addf %139, %140 : vector<2x8x8xf32>
    %cst_49 = arith.constant dense<0xFF800000> : vector<2x8xf32>
    %142 = vector.multi_reduction <maximumf>, %141, %cst_49 [2] : vector<2x8x8xf32> to vector<2x8xf32>
    %143 = vector.shape_cast %142 : vector<2x8xf32> to vector<2x8x1xf32>
    %144 = vector.broadcast %143 : vector<2x8x1xf32> to vector<2x8x8xf32>
    %145 = arith.subf %141, %144 : vector<2x8x8xf32>
    %146 = math.exp %145 : vector<2x8x8xf32>
    %cst_50 = arith.constant dense<0.000000e+00> : vector<2x8xf32>
    %147 = vector.multi_reduction <add>, %146, %cst_50 [2] : vector<2x8x8xf32> to vector<2x8xf32>
    %148 = vector.shape_cast %147 : vector<2x8xf32> to vector<2x8x1xf32>
    %149 = tpu.reciprocal %148 {approx = true} : vector<2x8x1xf32> -> vector<2x8x1xf32>
    %150 = vector.broadcast %149 : vector<2x8x1xf32> to vector<2x8x8xf32>
    %151 = arith.mulf %146, %150 : vector<2x8x8xf32>
    %152 = arith.truncf %151 : vector<2x8x8xf32> to vector<2x8x8xbf16>
    %153 = vector.extract_strided_slice %61 {offsets = [0, 0, 24], sizes = [2, 8, 8], strides = [1, 1, 1]} : vector<2x8x32xbf16> to vector<2x8x8xbf16>
    "tpu.trace_start"() <{level = 10 : i32, message = "bqk,bkd->bqd"}> : () -> ()
    %cst_51 = arith.constant dense<0.000000e+00> : vector<2x8x8xf32>
    %154 = tpu.matmul %152, %153, %cst_51 {dimension_numbers = #tpu.dot_dimension_numbers<[2], [1], [1], [2], [0, 0, 0, 1, 1, 2], [0], [0]>} : vector<2x8x8xbf16>, vector<2x8x8xbf16>, vector<2x8x8xf32> -> vector<2x8x8xf32>
    "tpu.trace_stop"() : () -> ()
    %155 = vector.shape_cast %154 : vector<2x8x8xf32> to vector<16x8xf32>
    %c0_52 = arith.constant 0 : index
    %c24 = arith.constant 24 : index
    %156 = vector.load %arg26[%c0_52, %c24] : memref<16x32xf32, #tpu.memory_space<vmem>>, vector<16x8xf32>
    tpu.vector_store %arg26[%c0_52, %c24], %155 {strides = array<i32>} : memref<16x32xf32, #tpu.memory_space<vmem>>, vector<16x8xf32>,
    %c0_53 = arith.constant 0 : index
    %c0_54 = arith.constant 0 : index
    %157 = vector.load %arg26[%c0_53, %c0_54] : memref<16x32xf32, #tpu.memory_space<vmem>>, vector<16x32xf32>
    %158 = arith.truncf %157 : vector<16x32xf32> to vector<16x32xbf16>
    %cst_55 = arith.constant dense<0.000000e+00> : vector<16x32xf32>
    %159 = tpu.matmul %158, %53, %cst_55 {dimension_numbers = #tpu.dot_dimension_numbers<[1], [0], [0], [1], [0, 0, 1, 1], [], []>} : vector<16x32xbf16>, vector<32x32xbf16>, vector<16x32xf32> -> vector<16x32xf32>
    %160 = vector.broadcast %55 : vector<1x32xf32> to vector<16x32xf32>
    %161 = arith.addf %159, %160 : vector<16x32xf32>
    %162 = arith.addf %3, %161 : vector<16x32xf32>
    %c0_56 = arith.constant 0 : index
    %c0_57 = arith.constant 0 : index
    %c0_58 = arith.constant 0 : index
    %163 = vector.load %arg17[%c0_56, %c0_57, %c0_58] : memref<1x1x32xf32, #tpu.memory_space<vmem>>, vector<1x1x32xf32>
    %164 = vector.shape_cast %163 : vector<1x1x32xf32> to vector<1x32xf32>
    %c0_59 = arith.constant 0 : index
    %c0_60 = arith.constant 0 : index
    %c0_61 = arith.constant 0 : index
    %165 = vector.load %arg18[%c0_59, %c0_60, %c0_61] : memref<1x1x32xf32, #tpu.memory_space<vmem>>, vector<1x1x32xf32>
    %166 = vector.shape_cast %165 : vector<1x1x32xf32> to vector<1x32xf32>
    %cst_62 = arith.constant dense<0.000000e+00> : vector<16xf32>
    %167 = vector.multi_reduction <add>, %162, %cst_62 [1] : vector<16x32xf32> to vector<16xf32>
    %168 = vector.shape_cast %167 : vector<16xf32> to vector<16x1xf32>
    %cst_63 = arith.constant 3.200000e+01 : f32
    %169 = vector.broadcast %cst_63 : f32 to vector<16x1xf32>
    %170 = arith.divf %168, %169 : vector<16x1xf32>
    %171 = vector.broadcast %170 : vector<16x1xf32> to vector<16x32xf32>
    %172 = arith.subf %162, %171 : vector<16x32xf32>
    %173 = vector.broadcast %170 : vector<16x1xf32> to vector<16x32xf32>
    %174 = arith.subf %162, %173 : vector<16x32xf32>
    %175 = arith.mulf %172, %174 : vector<16x32xf32>
    %cst_64 = arith.constant dense<0.000000e+00> : vector<16xf32>
    %176 = vector.multi_reduction <add>, %175, %cst_64 [1] : vector<16x32xf32> to vector<16xf32>
    %177 = vector.shape_cast %176 : vector<16xf32> to vector<16x1xf32>
    %cst_65 = arith.constant 3.200000e+01 : f32
    %178 = vector.broadcast %cst_65 : f32 to vector<16x1xf32>
    %179 = arith.divf %177, %178 : vector<16x1xf32>
    %180 = vector.broadcast %170 : vector<16x1xf32> to vector<16x32xf32>
    %181 = arith.subf %162, %180 : vector<16x32xf32>
    %cst_66 = arith.constant 9.99999974E-6 : f32
    %182 = vector.broadcast %cst_66 : f32 to vector<16x1xf32>
    %183 = arith.addf %179, %182 : vector<16x1xf32>
    %184 = math.rsqrt %183 : vector<16x1xf32>
    %185 = vector.broadcast %184 : vector<16x1xf32> to vector<16x32xf32>
    %186 = arith.mulf %181, %185 : vector<16x32xf32>
    %187 = vector.broadcast %164 : vector<1x32xf32> to vector<16x32xf32>
    %188 = arith.mulf %186, %187 : vector<16x32xf32>
    %189 = vector.broadcast %166 : vector<1x32xf32> to vector<16x32xf32>
    %190 = arith.addf %188, %189 : vector<16x32xf32>
    %c0_67 = arith.constant 0 : index
    %c0_68 = arith.constant 0 : index
    %c0_69 = arith.constant 0 : index
    %191 = vector.load %arg7[%c0_67, %c0_68, %c0_69] : memref<1x96x32xbf16, #tpu.memory_space<vmem>>, vector<1x96x32xbf16>
    %192 = vector.shape_cast %191 : vector<1x96x32xbf16> to vector<96x32xbf16>
    %c0_70 = arith.constant 0 : index
    %c0_71 = arith.constant 0 : index
    %c0_72 = arith.constant 0 : index
    %193 = vector.load %arg8[%c0_70, %c0_71, %c0_72] : memref<1x1x32xf32, #tpu.memory_space<vmem>>, vector<1x1x32xf32>
    %194 = vector.shape_cast %193 : vector<1x1x32xf32> to vector<1x32xf32>
    %195 = tpu.iota {dimensions = array<i32: 0>} : vector<16x32xi32>
    %c8_i32_73 = arith.constant 8 : i32
    %c0_i32_74 = arith.constant 0 : i32
    %196 = arith.cmpi eq, %c8_i32_73, %c0_i32_74 : i32
    %c1_i32_75 = arith.constant 1 : i32
    %197 = arith.select %196, %c1_i32_75, %c8_i32_73 : i32
    %198 = vector.broadcast %197 : i32 to vector<16x32xi32>
    %199 = arith.remsi %195, %198 : vector<16x32xi32>
    %c0_i32_76 = arith.constant 0 : i32
    %200 = vector.broadcast %c0_i32_76 : i32 to vector<16x32xi32>
    %201 = arith.cmpi ne, %199, %200 : vector<16x32xi32>
    %c0_i32_77 = arith.constant 0 : i32
    %202 = vector.broadcast %c0_i32_77 : i32 to vector<16x32xi32>
    %203 = arith.cmpi slt, %199, %202 : vector<16x32xi32>
    %c0_i32_78 = arith.constant 0 : i32
    %204 = arith.cmpi slt, %197, %c0_i32_78 : i32
    %205 = vector.broadcast %204 : i1 to vector<16x32xi1>
    %206 = vector.broadcast %205 : vector<16x32xi1> to vector<16x32xi1>
    %207 = arith.xori %203, %206 : vector<16x32xi1>
    %208 = arith.andi %207, %201 : vector<16x32xi1>
    %209 = vector.broadcast %197 : i32 to vector<16x32xi32>
    %210 = arith.addi %199, %209 : vector<16x32xi32>
    %211 = arith.select %208, %210, %199 : vector<16x32xi1>, vector<16x32xi32>
    %c1_i32_79 = arith.constant 1 : i32
    %212 = tpu.dynamic_rotate %190 by %c1_i32_79 dim 0 : vector<16x32xf32>, i32 -> vector<16x32xf32>
    %c1_i32_80 = arith.constant 1 : i32
    %213 = vector.broadcast %c1_i32_80 : i32 to vector<16x32xi32>
    %214 = arith.cmpi sge, %211, %213 : vector<16x32xi32>
    %cst_81 = arith.constant 0.000000e+00 : f32
    %215 = vector.broadcast %cst_81 : f32 to vector<16x32xf32>
    %216 = arith.select %214, %212, %215 : vector<16x32xi1>, vector<16x32xf32>
    %217 = arith.truncf %216 : vector<16x32xf32> to vector<16x32xbf16>
    %218 = vector.extract_strided_slice %192 {offsets = [0, 0], sizes = [32, 32], strides = [1, 1]} : vector<96x32xbf16> to vector<32x32xbf16>
    %cst_82 = arith.constant dense<0.000000e+00> : vector<16x32xf32>
    %219 = tpu.matmul %217, %218, %cst_82 {dimension_numbers = #tpu.dot_dimension_numbers<[1], [0], [0], [1], [0, 0, 1, 1], [], []>} : vector<16x32xbf16>, vector<32x32xbf16>, vector<16x32xf32> -> vector<16x32xf32>
    %220 = arith.truncf %190 : vector<16x32xf32> to vector<16x32xbf16>
    %221 = vector.extract_strided_slice %192 {offsets = [32, 0], sizes = [32, 32], strides = [1, 1]} : vector<96x32xbf16> to vector<32x32xbf16>
    %cst_83 = arith.constant dense<0.000000e+00> : vector<16x32xf32>
    %222 = tpu.matmul %220, %221, %cst_83 {dimension_numbers = #tpu.dot_dimension_numbers<[1], [0], [0], [1], [0, 0, 1, 1], [], []>} : vector<16x32xbf16>, vector<32x32xbf16>, vector<16x32xf32> -> vector<16x32xf32>
    %223 = arith.addf %219, %222 : vector<16x32xf32>
    %c15_i32_84 = arith.constant 15 : i32
    %224 = tpu.dynamic_rotate %190 by %c15_i32_84 dim 0 : vector<16x32xf32>, i32 -> vector<16x32xf32>
    %c7_i32_85 = arith.constant 7 : i32
    %225 = vector.broadcast %c7_i32_85 : i32 to vector<16x32xi32>
    %226 = arith.cmpi slt, %211, %225 : vector<16x32xi32>
    %cst_86 = arith.constant 0.000000e+00 : f32
    %227 = vector.broadcast %cst_86 : f32 to vector<16x32xf32>
    %228 = arith.select %226, %224, %227 : vector<16x32xi1>, vector<16x32xf32>
    %229 = arith.truncf %228 : vector<16x32xf32> to vector<16x32xbf16>
    %230 = vector.extract_strided_slice %192 {offsets = [64, 0], sizes = [32, 32], strides = [1, 1]} : vector<96x32xbf16> to vector<32x32xbf16>
    %cst_87 = arith.constant dense<0.000000e+00> : vector<16x32xf32>
    %231 = tpu.matmul %229, %230, %cst_87 {dimension_numbers = #tpu.dot_dimension_numbers<[1], [0], [0], [1], [0, 0, 1, 1], [], []>} : vector<16x32xbf16>, vector<32x32xbf16>, vector<16x32xf32> -> vector<16x32xf32>
    %232 = arith.addf %223, %231 : vector<16x32xf32>
    %233 = vector.broadcast %194 : vector<1x32xf32> to vector<16x32xf32>
    %234 = arith.addf %232, %233 : vector<16x32xf32>
    %c0_88 = arith.constant 0 : index
    %c0_89 = arith.constant 0 : index
    %c0_90 = arith.constant 0 : index
    %235 = vector.load %arg9[%c0_88, %c0_89, %c0_90] : memref<1x96x64xbf16, #tpu.memory_space<vmem>>, vector<1x96x64xbf16>
    %236 = vector.shape_cast %235 : vector<1x96x64xbf16> to vector<96x64xbf16>
    %c0_91 = arith.constant 0 : index
    %c0_92 = arith.constant 0 : index
    %c0_93 = arith.constant 0 : index
    %237 = vector.load %arg10[%c0_91, %c0_92, %c0_93] : memref<1x1x64xf32, #tpu.memory_space<vmem>>, vector<1x1x64xf32>
    %238 = vector.shape_cast %237 : vector<1x1x64xf32> to vector<1x64xf32>
    %239 = tpu.iota {dimensions = array<i32: 0>} : vector<16x32xi32>
    %c8_i32_94 = arith.constant 8 : i32
    %c0_i32_95 = arith.constant 0 : i32
    %240 = arith.cmpi eq, %c8_i32_94, %c0_i32_95 : i32
    %c1_i32_96 = arith.constant 1 : i32
    %241 = arith.select %240, %c1_i32_96, %c8_i32_94 : i32
    %242 = vector.broadcast %241 : i32 to vector<16x32xi32>
    %243 = arith.remsi %239, %242 : vector<16x32xi32>
    %c0_i32_97 = arith.constant 0 : i32
    %244 = vector.broadcast %c0_i32_97 : i32 to vector<16x32xi32>
    %245 = arith.cmpi ne, %243, %244 : vector<16x32xi32>
    %c0_i32_98 = arith.constant 0 : i32
    %246 = vector.broadcast %c0_i32_98 : i32 to vector<16x32xi32>
    %247 = arith.cmpi slt, %243, %246 : vector<16x32xi32>
    %c0_i32_99 = arith.constant 0 : i32
    %248 = arith.cmpi slt, %241, %c0_i32_99 : i32
    %249 = vector.broadcast %248 : i1 to vector<16x32xi1>
    %250 = vector.broadcast %249 : vector<16x32xi1> to vector<16x32xi1>
    %251 = arith.xori %247, %250 : vector<16x32xi1>
    %252 = arith.andi %251, %245 : vector<16x32xi1>
    %253 = vector.broadcast %241 : i32 to vector<16x32xi32>
    %254 = arith.addi %243, %253 : vector<16x32xi32>
    %255 = arith.select %252, %254, %243 : vector<16x32xi1>, vector<16x32xi32>
    %c1_i32_100 = arith.constant 1 : i32
    %256 = tpu.dynamic_rotate %4 by %c1_i32_100 dim 0 : vector<16x32xf32>, i32 -> vector<16x32xf32>
    %c1_i32_101 = arith.constant 1 : i32
    %257 = vector.broadcast %c1_i32_101 : i32 to vector<16x32xi32>
    %258 = arith.cmpi sge, %255, %257 : vector<16x32xi32>
    %cst_102 = arith.constant 0.000000e+00 : f32
    %259 = vector.broadcast %cst_102 : f32 to vector<16x32xf32>
    %260 = arith.select %258, %256, %259 : vector<16x32xi1>, vector<16x32xf32>
    %261 = arith.truncf %260 : vector<16x32xf32> to vector<16x32xbf16>
    %262 = vector.extract_strided_slice %236 {offsets = [0, 0], sizes = [32, 64], strides = [1, 1]} : vector<96x64xbf16> to vector<32x64xbf16>
    %cst_103 = arith.constant dense<0.000000e+00> : vector<16x64xf32>
    %263 = tpu.matmul %261, %262, %cst_103 {dimension_numbers = #tpu.dot_dimension_numbers<[1], [0], [0], [1], [0, 0, 1, 1], [], []>} : vector<16x32xbf16>, vector<32x64xbf16>, vector<16x64xf32> -> vector<16x64xf32>
    %264 = arith.truncf %4 : vector<16x32xf32> to vector<16x32xbf16>
    %265 = vector.extract_strided_slice %236 {offsets = [32, 0], sizes = [32, 64], strides = [1, 1]} : vector<96x64xbf16> to vector<32x64xbf16>
    %cst_104 = arith.constant dense<0.000000e+00> : vector<16x64xf32>
    %266 = tpu.matmul %264, %265, %cst_104 {dimension_numbers = #tpu.dot_dimension_numbers<[1], [0], [0], [1], [0, 0, 1, 1], [], []>} : vector<16x32xbf16>, vector<32x64xbf16>, vector<16x64xf32> -> vector<16x64xf32>
    %267 = arith.addf %263, %266 : vector<16x64xf32>
    %c15_i32_105 = arith.constant 15 : i32
    %268 = tpu.dynamic_rotate %4 by %c15_i32_105 dim 0 : vector<16x32xf32>, i32 -> vector<16x32xf32>
    %c7_i32_106 = arith.constant 7 : i32
    %269 = vector.broadcast %c7_i32_106 : i32 to vector<16x32xi32>
    %270 = arith.cmpi slt, %255, %269 : vector<16x32xi32>
    %cst_107 = arith.constant 0.000000e+00 : f32
    %271 = vector.broadcast %cst_107 : f32 to vector<16x32xf32>
    %272 = arith.select %270, %268, %271 : vector<16x32xi1>, vector<16x32xf32>
    %273 = arith.truncf %272 : vector<16x32xf32> to vector<16x32xbf16>
    %274 = vector.extract_strided_slice %236 {offsets = [64, 0], sizes = [32, 64], strides = [1, 1]} : vector<96x64xbf16> to vector<32x64xbf16>
    %cst_108 = arith.constant dense<0.000000e+00> : vector<16x64xf32>
    %275 = tpu.matmul %273, %274, %cst_108 {dimension_numbers = #tpu.dot_dimension_numbers<[1], [0], [0], [1], [0, 0, 1, 1], [], []>} : vector<16x32xbf16>, vector<32x64xbf16>, vector<16x64xf32> -> vector<16x64xf32>
    %276 = arith.addf %267, %275 : vector<16x64xf32>
    %277 = vector.broadcast %238 : vector<1x64xf32> to vector<16x64xf32>
    %278 = arith.addf %276, %277 : vector<16x64xf32>
    %279 = vector.extract_strided_slice %278 {offsets = [0, 0], sizes = [16, 32], strides = [1, 1]} : vector<16x64xf32> to vector<16x32xf32>
    %280 = vector.extract_strided_slice %278 {offsets = [0, 32], sizes = [16, 32], strides = [1, 1]} : vector<16x64xf32> to vector<16x32xf32>
    %c0_109 = arith.constant 0 : index
    %c0_110 = arith.constant 0 : index
    %c0_111 = arith.constant 0 : index
    %281 = vector.load %arg11[%c0_109, %c0_110, %c0_111] : memref<1x32x32xbf16, #tpu.memory_space<vmem>>, vector<1x32x32xbf16>
    %282 = vector.shape_cast %281 : vector<1x32x32xbf16> to vector<32x32xbf16>
    %c0_112 = arith.constant 0 : index
    %c0_113 = arith.constant 0 : index
    %c0_114 = arith.constant 0 : index
    %283 = vector.load %arg12[%c0_112, %c0_113, %c0_114] : memref<1x1x32xf32, #tpu.memory_space<vmem>>, vector<1x1x32xf32>
    %284 = vector.shape_cast %283 : vector<1x1x32xf32> to vector<1x32xf32>
    %285 = vector.shape_cast %234 : vector<16x32xf32> to vector<2x8x32xf32>
    %286 = arith.truncf %285 : vector<2x8x32xf32> to vector<2x8x32xbf16>
    %287 = vector.shape_cast %279 : vector<16x32xf32> to vector<2x8x32xf32>
    %288 = arith.truncf %287 : vector<2x8x32xf32> to vector<2x8x32xbf16>
    %289 = vector.shape_cast %280 : vector<16x32xf32> to vector<2x8x32xf32>
    %290 = arith.truncf %289 : vector<2x8x32xf32> to vector<2x8x32xbf16>
    %291 = vector.extract_strided_slice %286 {offsets = [0, 0, 0], sizes = [2, 8, 8], strides = [1, 1, 1]} : vector<2x8x32xbf16> to vector<2x8x8xbf16>
    %292 = vector.extract_strided_slice %288 {offsets = [0, 0, 0], sizes = [2, 8, 8], strides = [1, 1, 1]} : vector<2x8x32xbf16> to vector<2x8x8xbf16>
    "tpu.trace_start"() <{level = 10 : i32, message = "bqd,bkd->bqk"}> : () -> ()
    %cst_115 = arith.constant dense<0.000000e+00> : vector<2x8x8xf32>
    %293 = tpu.matmul %291, %292, %cst_115 {dimension_numbers = #tpu.dot_dimension_numbers<[2], [2], [1], [1], [0, 0, 0, 1, 1, 1], [0], [0]>} : vector<2x8x8xbf16>, vector<2x8x8xbf16>, vector<2x8x8xf32> -> vector<2x8x8xf32>
    "tpu.trace_stop"() : () -> ()
    %cst_116 = arith.constant 0.353553385 : f32
    %294 = vector.broadcast %cst_116 : f32 to vector<2x8x8xf32>
    %295 = arith.mulf %293, %294 : vector<2x8x8xf32>
    %cst_117 = arith.constant dense<0xFF800000> : vector<2x8xf32>
    %296 = vector.multi_reduction <maximumf>, %295, %cst_117 [2] : vector<2x8x8xf32> to vector<2x8xf32>
    %297 = vector.shape_cast %296 : vector<2x8xf32> to vector<2x8x1xf32>
    %298 = vector.broadcast %297 : vector<2x8x1xf32> to vector<2x8x8xf32>
    %299 = arith.subf %295, %298 : vector<2x8x8xf32>
    %300 = math.exp %299 : vector<2x8x8xf32>
    %cst_118 = arith.constant dense<0.000000e+00> : vector<2x8xf32>
    %301 = vector.multi_reduction <add>, %300, %cst_118 [2] : vector<2x8x8xf32> to vector<2x8xf32>
    %302 = vector.shape_cast %301 : vector<2x8xf32> to vector<2x8x1xf32>
    %303 = tpu.reciprocal %302 {approx = true} : vector<2x8x1xf32> -> vector<2x8x1xf32>
    %304 = vector.broadcast %303 : vector<2x8x1xf32> to vector<2x8x8xf32>
    %305 = arith.mulf %300, %304 : vector<2x8x8xf32>
    %306 = arith.truncf %305 : vector<2x8x8xf32> to vector<2x8x8xbf16>
    %307 = vector.extract_strided_slice %290 {offsets = [0, 0, 0], sizes = [2, 8, 8], strides = [1, 1, 1]} : vector<2x8x32xbf16> to vector<2x8x8xbf16>
    "tpu.trace_start"() <{level = 10 : i32, message = "bqk,bkd->bqd"}> : () -> ()
    %cst_119 = arith.constant dense<0.000000e+00> : vector<2x8x8xf32>
    %308 = tpu.matmul %306, %307, %cst_119 {dimension_numbers = #tpu.dot_dimension_numbers<[2], [1], [1], [2], [0, 0, 0, 1, 1, 2], [0], [0]>} : vector<2x8x8xbf16>, vector<2x8x8xbf16>, vector<2x8x8xf32> -> vector<2x8x8xf32>
    "tpu.trace_stop"() : () -> ()
    %309 = vector.shape_cast %308 : vector<2x8x8xf32> to vector<16x8xf32>
    %c0_120 = arith.constant 0 : index
    %c0_121 = arith.constant 0 : index
    %310 = vector.load %arg26[%c0_120, %c0_121] : memref<16x32xf32, #tpu.memory_space<vmem>>, vector<16x8xf32>
    tpu.vector_store %arg26[%c0_120, %c0_121], %309 {strides = array<i32>} : memref<16x32xf32, #tpu.memory_space<vmem>>, vector<16x8xf32>,
    %311 = vector.extract_strided_slice %286 {offsets = [0, 0, 8], sizes = [2, 8, 8], strides = [1, 1, 1]} : vector<2x8x32xbf16> to vector<2x8x8xbf16>
    %312 = vector.extract_strided_slice %288 {offsets = [0, 0, 8], sizes = [2, 8, 8], strides = [1, 1, 1]} : vector<2x8x32xbf16> to vector<2x8x8xbf16>
    "tpu.trace_start"() <{level = 10 : i32, message = "bqd,bkd->bqk"}> : () -> ()
    %cst_122 = arith.constant dense<0.000000e+00> : vector<2x8x8xf32>
    %313 = tpu.matmul %311, %312, %cst_122 {dimension_numbers = #tpu.dot_dimension_numbers<[2], [2], [1], [1], [0, 0, 0, 1, 1, 1], [0], [0]>} : vector<2x8x8xbf16>, vector<2x8x8xbf16>, vector<2x8x8xf32> -> vector<2x8x8xf32>
    "tpu.trace_stop"() : () -> ()
    %cst_123 = arith.constant 0.353553385 : f32
    %314 = vector.broadcast %cst_123 : f32 to vector<2x8x8xf32>
    %315 = arith.mulf %313, %314 : vector<2x8x8xf32>
    %cst_124 = arith.constant dense<0xFF800000> : vector<2x8xf32>
    %316 = vector.multi_reduction <maximumf>, %315, %cst_124 [2] : vector<2x8x8xf32> to vector<2x8xf32>
    %317 = vector.shape_cast %316 : vector<2x8xf32> to vector<2x8x1xf32>
    %318 = vector.broadcast %317 : vector<2x8x1xf32> to vector<2x8x8xf32>
    %319 = arith.subf %315, %318 : vector<2x8x8xf32>
    %320 = math.exp %319 : vector<2x8x8xf32>
    %cst_125 = arith.constant dense<0.000000e+00> : vector<2x8xf32>
    %321 = vector.multi_reduction <add>, %320, %cst_125 [2] : vector<2x8x8xf32> to vector<2x8xf32>
    %322 = vector.shape_cast %321 : vector<2x8xf32> to vector<2x8x1xf32>
    %323 = tpu.reciprocal %322 {approx = true} : vector<2x8x1xf32> -> vector<2x8x1xf32>
    %324 = vector.broadcast %323 : vector<2x8x1xf32> to vector<2x8x8xf32>
    %325 = arith.mulf %320, %324 : vector<2x8x8xf32>
    %326 = arith.truncf %325 : vector<2x8x8xf32> to vector<2x8x8xbf16>
    %327 = vector.extract_strided_slice %290 {offsets = [0, 0, 8], sizes = [2, 8, 8], strides = [1, 1, 1]} : vector<2x8x32xbf16> to vector<2x8x8xbf16>
    "tpu.trace_start"() <{level = 10 : i32, message = "bqk,bkd->bqd"}> : () -> ()
    %cst_126 = arith.constant dense<0.000000e+00> : vector<2x8x8xf32>
    %328 = tpu.matmul %326, %327, %cst_126 {dimension_numbers = #tpu.dot_dimension_numbers<[2], [1], [1], [2], [0, 0, 0, 1, 1, 2], [0], [0]>} : vector<2x8x8xbf16>, vector<2x8x8xbf16>, vector<2x8x8xf32> -> vector<2x8x8xf32>
    "tpu.trace_stop"() : () -> ()
    %329 = vector.shape_cast %328 : vector<2x8x8xf32> to vector<16x8xf32>
    %c0_127 = arith.constant 0 : index
    %c8_128 = arith.constant 8 : index
    %330 = vector.load %arg26[%c0_127, %c8_128] : memref<16x32xf32, #tpu.memory_space<vmem>>, vector<16x8xf32>
    tpu.vector_store %arg26[%c0_127, %c8_128], %329 {strides = array<i32>} : memref<16x32xf32, #tpu.memory_space<vmem>>, vector<16x8xf32>,
    %331 = vector.extract_strided_slice %286 {offsets = [0, 0, 16], sizes = [2, 8, 8], strides = [1, 1, 1]} : vector<2x8x32xbf16> to vector<2x8x8xbf16>
    %332 = vector.extract_strided_slice %288 {offsets = [0, 0, 16], sizes = [2, 8, 8], strides = [1, 1, 1]} : vector<2x8x32xbf16> to vector<2x8x8xbf16>
    "tpu.trace_start"() <{level = 10 : i32, message = "bqd,bkd->bqk"}> : () -> ()
    %cst_129 = arith.constant dense<0.000000e+00> : vector<2x8x8xf32>
    %333 = tpu.matmul %331, %332, %cst_129 {dimension_numbers = #tpu.dot_dimension_numbers<[2], [2], [1], [1], [0, 0, 0, 1, 1, 1], [0], [0]>} : vector<2x8x8xbf16>, vector<2x8x8xbf16>, vector<2x8x8xf32> -> vector<2x8x8xf32>
    "tpu.trace_stop"() : () -> ()
    %cst_130 = arith.constant 0.353553385 : f32
    %334 = vector.broadcast %cst_130 : f32 to vector<2x8x8xf32>
    %335 = arith.mulf %333, %334 : vector<2x8x8xf32>
    %cst_131 = arith.constant dense<0xFF800000> : vector<2x8xf32>
    %336 = vector.multi_reduction <maximumf>, %335, %cst_131 [2] : vector<2x8x8xf32> to vector<2x8xf32>
    %337 = vector.shape_cast %336 : vector<2x8xf32> to vector<2x8x1xf32>
    %338 = vector.broadcast %337 : vector<2x8x1xf32> to vector<2x8x8xf32>
    %339 = arith.subf %335, %338 : vector<2x8x8xf32>
    %340 = math.exp %339 : vector<2x8x8xf32>
    %cst_132 = arith.constant dense<0.000000e+00> : vector<2x8xf32>
    %341 = vector.multi_reduction <add>, %340, %cst_132 [2] : vector<2x8x8xf32> to vector<2x8xf32>
    %342 = vector.shape_cast %341 : vector<2x8xf32> to vector<2x8x1xf32>
    %343 = tpu.reciprocal %342 {approx = true} : vector<2x8x1xf32> -> vector<2x8x1xf32>
    %344 = vector.broadcast %343 : vector<2x8x1xf32> to vector<2x8x8xf32>
    %345 = arith.mulf %340, %344 : vector<2x8x8xf32>
    %346 = arith.truncf %345 : vector<2x8x8xf32> to vector<2x8x8xbf16>
    %347 = vector.extract_strided_slice %290 {offsets = [0, 0, 16], sizes = [2, 8, 8], strides = [1, 1, 1]} : vector<2x8x32xbf16> to vector<2x8x8xbf16>
    "tpu.trace_start"() <{level = 10 : i32, message = "bqk,bkd->bqd"}> : () -> ()
    %cst_133 = arith.constant dense<0.000000e+00> : vector<2x8x8xf32>
    %348 = tpu.matmul %346, %347, %cst_133 {dimension_numbers = #tpu.dot_dimension_numbers<[2], [1], [1], [2], [0, 0, 0, 1, 1, 2], [0], [0]>} : vector<2x8x8xbf16>, vector<2x8x8xbf16>, vector<2x8x8xf32> -> vector<2x8x8xf32>
    "tpu.trace_stop"() : () -> ()
    %349 = vector.shape_cast %348 : vector<2x8x8xf32> to vector<16x8xf32>
    %c0_134 = arith.constant 0 : index
    %c16_135 = arith.constant 16 : index
    %350 = vector.load %arg26[%c0_134, %c16_135] : memref<16x32xf32, #tpu.memory_space<vmem>>, vector<16x8xf32>
    tpu.vector_store %arg26[%c0_134, %c16_135], %349 {strides = array<i32>} : memref<16x32xf32, #tpu.memory_space<vmem>>, vector<16x8xf32>,
    %351 = vector.extract_strided_slice %286 {offsets = [0, 0, 24], sizes = [2, 8, 8], strides = [1, 1, 1]} : vector<2x8x32xbf16> to vector<2x8x8xbf16>
    %352 = vector.extract_strided_slice %288 {offsets = [0, 0, 24], sizes = [2, 8, 8], strides = [1, 1, 1]} : vector<2x8x32xbf16> to vector<2x8x8xbf16>
    "tpu.trace_start"() <{level = 10 : i32, message = "bqd,bkd->bqk"}> : () -> ()
    %cst_136 = arith.constant dense<0.000000e+00> : vector<2x8x8xf32>
    %353 = tpu.matmul %351, %352, %cst_136 {dimension_numbers = #tpu.dot_dimension_numbers<[2], [2], [1], [1], [0, 0, 0, 1, 1, 1], [0], [0]>} : vector<2x8x8xbf16>, vector<2x8x8xbf16>, vector<2x8x8xf32> -> vector<2x8x8xf32>
    "tpu.trace_stop"() : () -> ()
    %cst_137 = arith.constant 0.353553385 : f32
    %354 = vector.broadcast %cst_137 : f32 to vector<2x8x8xf32>
    %355 = arith.mulf %353, %354 : vector<2x8x8xf32>
    %cst_138 = arith.constant dense<0xFF800000> : vector<2x8xf32>
    %356 = vector.multi_reduction <maximumf>, %355, %cst_138 [2] : vector<2x8x8xf32> to vector<2x8xf32>
    %357 = vector.shape_cast %356 : vector<2x8xf32> to vector<2x8x1xf32>
    %358 = vector.broadcast %357 : vector<2x8x1xf32> to vector<2x8x8xf32>
    %359 = arith.subf %355, %358 : vector<2x8x8xf32>
    %360 = math.exp %359 : vector<2x8x8xf32>
    %cst_139 = arith.constant dense<0.000000e+00> : vector<2x8xf32>
    %361 = vector.multi_reduction <add>, %360, %cst_139 [2] : vector<2x8x8xf32> to vector<2x8xf32>
    %362 = vector.shape_cast %361 : vector<2x8xf32> to vector<2x8x1xf32>
    %363 = tpu.reciprocal %362 {approx = true} : vector<2x8x1xf32> -> vector<2x8x1xf32>
    %364 = vector.broadcast %363 : vector<2x8x1xf32> to vector<2x8x8xf32>
    %365 = arith.mulf %360, %364 : vector<2x8x8xf32>
    %366 = arith.truncf %365 : vector<2x8x8xf32> to vector<2x8x8xbf16>
    %367 = vector.extract_strided_slice %290 {offsets = [0, 0, 24], sizes = [2, 8, 8], strides = [1, 1, 1]} : vector<2x8x32xbf16> to vector<2x8x8xbf16>
    "tpu.trace_start"() <{level = 10 : i32, message = "bqk,bkd->bqd"}> : () -> ()
    %cst_140 = arith.constant dense<0.000000e+00> : vector<2x8x8xf32>
    %368 = tpu.matmul %366, %367, %cst_140 {dimension_numbers = #tpu.dot_dimension_numbers<[2], [1], [1], [2], [0, 0, 0, 1, 1, 2], [0], [0]>} : vector<2x8x8xbf16>, vector<2x8x8xbf16>, vector<2x8x8xf32> -> vector<2x8x8xf32>
    "tpu.trace_stop"() : () -> ()
    %369 = vector.shape_cast %368 : vector<2x8x8xf32> to vector<16x8xf32>
    %c0_141 = arith.constant 0 : index
    %c24_142 = arith.constant 24 : index
    %370 = vector.load %arg26[%c0_141, %c24_142] : memref<16x32xf32, #tpu.memory_space<vmem>>, vector<16x8xf32>
    tpu.vector_store %arg26[%c0_141, %c24_142], %369 {strides = array<i32>} : memref<16x32xf32, #tpu.memory_space<vmem>>, vector<16x8xf32>,
    %c0_143 = arith.constant 0 : index
    %c0_144 = arith.constant 0 : index
    %371 = vector.load %arg26[%c0_143, %c0_144] : memref<16x32xf32, #tpu.memory_space<vmem>>, vector<16x32xf32>
    %372 = arith.truncf %371 : vector<16x32xf32> to vector<16x32xbf16>
    %cst_145 = arith.constant dense<0.000000e+00> : vector<16x32xf32>
    %373 = tpu.matmul %372, %282, %cst_145 {dimension_numbers = #tpu.dot_dimension_numbers<[1], [0], [0], [1], [0, 0, 1, 1], [], []>} : vector<16x32xbf16>, vector<32x32xbf16>, vector<16x32xf32> -> vector<16x32xf32>
    %374 = vector.broadcast %284 : vector<1x32xf32> to vector<16x32xf32>
    %375 = arith.addf %373, %374 : vector<16x32xf32>
    %376 = arith.addf %190, %375 : vector<16x32xf32>
    %c0_146 = arith.constant 0 : index
    %c0_147 = arith.constant 0 : index
    %c0_148 = arith.constant 0 : index
    %377 = vector.load %arg19[%c0_146, %c0_147, %c0_148] : memref<1x1x32xf32, #tpu.memory_space<vmem>>, vector<1x1x32xf32>
    %378 = vector.shape_cast %377 : vector<1x1x32xf32> to vector<1x32xf32>
    %c0_149 = arith.constant 0 : index
    %c0_150 = arith.constant 0 : index
    %c0_151 = arith.constant 0 : index
    %379 = vector.load %arg20[%c0_149, %c0_150, %c0_151] : memref<1x1x32xf32, #tpu.memory_space<vmem>>, vector<1x1x32xf32>
    %380 = vector.shape_cast %379 : vector<1x1x32xf32> to vector<1x32xf32>
    %cst_152 = arith.constant dense<0.000000e+00> : vector<16xf32>
    %381 = vector.multi_reduction <add>, %376, %cst_152 [1] : vector<16x32xf32> to vector<16xf32>
    %382 = vector.shape_cast %381 : vector<16xf32> to vector<16x1xf32>
    %cst_153 = arith.constant 3.200000e+01 : f32
    %383 = vector.broadcast %cst_153 : f32 to vector<16x1xf32>
    %384 = arith.divf %382, %383 : vector<16x1xf32>
    %385 = vector.broadcast %384 : vector<16x1xf32> to vector<16x32xf32>
    %386 = arith.subf %376, %385 : vector<16x32xf32>
    %387 = vector.broadcast %384 : vector<16x1xf32> to vector<16x32xf32>
    %388 = arith.subf %376, %387 : vector<16x32xf32>
    %389 = arith.mulf %386, %388 : vector<16x32xf32>
    %cst_154 = arith.constant dense<0.000000e+00> : vector<16xf32>
    %390 = vector.multi_reduction <add>, %389, %cst_154 [1] : vector<16x32xf32> to vector<16xf32>
    %391 = vector.shape_cast %390 : vector<16xf32> to vector<16x1xf32>
    %cst_155 = arith.constant 3.200000e+01 : f32
    %392 = vector.broadcast %cst_155 : f32 to vector<16x1xf32>
    %393 = arith.divf %391, %392 : vector<16x1xf32>
    %394 = vector.broadcast %384 : vector<16x1xf32> to vector<16x32xf32>
    %395 = arith.subf %376, %394 : vector<16x32xf32>
    %cst_156 = arith.constant 9.99999974E-6 : f32
    %396 = vector.broadcast %cst_156 : f32 to vector<16x1xf32>
    %397 = arith.addf %393, %396 : vector<16x1xf32>
    %398 = math.rsqrt %397 : vector<16x1xf32>
    %399 = vector.broadcast %398 : vector<16x1xf32> to vector<16x32xf32>
    %400 = arith.mulf %395, %399 : vector<16x32xf32>
    %401 = vector.broadcast %378 : vector<1x32xf32> to vector<16x32xf32>
    %402 = arith.mulf %400, %401 : vector<16x32xf32>
    %403 = vector.broadcast %380 : vector<1x32xf32> to vector<16x32xf32>
    %404 = arith.addf %402, %403 : vector<16x32xf32>
    %c0_157 = arith.constant 0 : index
    %c0_158 = arith.constant 0 : index
    %c0_159 = arith.constant 0 : index
    %405 = vector.load %arg13[%c0_157, %c0_158, %c0_159] : memref<1x32x64xbf16, #tpu.memory_space<vmem>>, vector<1x32x64xbf16>
    %406 = vector.shape_cast %405 : vector<1x32x64xbf16> to vector<32x64xbf16>
    %c0_160 = arith.constant 0 : index
    %c0_161 = arith.constant 0 : index
    %c0_162 = arith.constant 0 : index
    %407 = vector.load %arg14[%c0_160, %c0_161, %c0_162] : memref<1x1x64xf32, #tpu.memory_space<vmem>>, vector<1x1x64xf32>
    %408 = vector.shape_cast %407 : vector<1x1x64xf32> to vector<1x64xf32>
    %409 = arith.truncf %404 : vector<16x32xf32> to vector<16x32xbf16>
    %cst_163 = arith.constant dense<0.000000e+00> : vector<16x64xf32>
    %410 = tpu.matmul %409, %406, %cst_163 {dimension_numbers = #tpu.dot_dimension_numbers<[1], [0], [0], [1], [0, 0, 1, 1], [], []>} : vector<16x32xbf16>, vector<32x64xbf16>, vector<16x64xf32> -> vector<16x64xf32>
    %411 = vector.broadcast %408 : vector<1x64xf32> to vector<16x64xf32>
    %412 = arith.addf %410, %411 : vector<16x64xf32>
    %cst_164 = arith.constant 0.000000e+00 : f32
    %413 = vector.broadcast %cst_164 : f32 to vector<16x64xf32>
    %414 = arith.maximumf %412, %413 : vector<16x64xf32>
    %c0_165 = arith.constant 0 : index
    %c0_166 = arith.constant 0 : index
    %c0_167 = arith.constant 0 : index
    %415 = vector.load %arg15[%c0_165, %c0_166, %c0_167] : memref<1x64x32xbf16, #tpu.memory_space<vmem>>, vector<1x64x32xbf16>
    %416 = vector.shape_cast %415 : vector<1x64x32xbf16> to vector<64x32xbf16>
    %c0_168 = arith.constant 0 : index
    %c0_169 = arith.constant 0 : index
    %c0_170 = arith.constant 0 : index
    %417 = vector.load %arg16[%c0_168, %c0_169, %c0_170] : memref<1x1x32xf32, #tpu.memory_space<vmem>>, vector<1x1x32xf32>
    %418 = vector.shape_cast %417 : vector<1x1x32xf32> to vector<1x32xf32>
    %419 = arith.truncf %414 : vector<16x64xf32> to vector<16x64xbf16>
    %cst_171 = arith.constant dense<0.000000e+00> : vector<16x32xf32>
    %420 = tpu.matmul %419, %416, %cst_171 {dimension_numbers = #tpu.dot_dimension_numbers<[1], [0], [0], [1], [0, 0, 1, 1], [], []>} : vector<16x64xbf16>, vector<64x32xbf16>, vector<16x32xf32> -> vector<16x32xf32>
    %421 = vector.broadcast %418 : vector<1x32xf32> to vector<16x32xf32>
    %422 = arith.addf %420, %421 : vector<16x32xf32>
    %423 = arith.addf %404, %422 : vector<16x32xf32>
    %c0_172 = arith.constant 0 : index
    %c0_173 = arith.constant 0 : index
    %c0_174 = arith.constant 0 : index
    %424 = vector.load %arg21[%c0_172, %c0_173, %c0_174] : memref<1x1x32xf32, #tpu.memory_space<vmem>>, vector<1x1x32xf32>
    %425 = vector.shape_cast %424 : vector<1x1x32xf32> to vector<1x32xf32>
    %c0_175 = arith.constant 0 : index
    %c0_176 = arith.constant 0 : index
    %c0_177 = arith.constant 0 : index
    %426 = vector.load %arg22[%c0_175, %c0_176, %c0_177] : memref<1x1x32xf32, #tpu.memory_space<vmem>>, vector<1x1x32xf32>
    %427 = vector.shape_cast %426 : vector<1x1x32xf32> to vector<1x32xf32>
    %cst_178 = arith.constant dense<0.000000e+00> : vector<16xf32>
    %428 = vector.multi_reduction <add>, %423, %cst_178 [1] : vector<16x32xf32> to vector<16xf32>
    %429 = vector.shape_cast %428 : vector<16xf32> to vector<16x1xf32>
    %cst_179 = arith.constant 3.200000e+01 : f32
    %430 = vector.broadcast %cst_179 : f32 to vector<16x1xf32>
    %431 = arith.divf %429, %430 : vector<16x1xf32>
    %432 = vector.broadcast %431 : vector<16x1xf32> to vector<16x32xf32>
    %433 = arith.subf %423, %432 : vector<16x32xf32>
    %434 = vector.broadcast %431 : vector<16x1xf32> to vector<16x32xf32>
    %435 = arith.subf %423, %434 : vector<16x32xf32>
    %436 = arith.mulf %433, %435 : vector<16x32xf32>
    %cst_180 = arith.constant dense<0.000000e+00> : vector<16xf32>
    %437 = vector.multi_reduction <add>, %436, %cst_180 [1] : vector<16x32xf32> to vector<16xf32>
    %438 = vector.shape_cast %437 : vector<16xf32> to vector<16x1xf32>
    %cst_181 = arith.constant 3.200000e+01 : f32
    %439 = vector.broadcast %cst_181 : f32 to vector<16x1xf32>
    %440 = arith.divf %438, %439 : vector<16x1xf32>
    %441 = vector.broadcast %431 : vector<16x1xf32> to vector<16x32xf32>
    %442 = arith.subf %423, %441 : vector<16x32xf32>
    %cst_182 = arith.constant 9.99999974E-6 : f32
    %443 = vector.broadcast %cst_182 : f32 to vector<16x1xf32>
    %444 = arith.addf %440, %443 : vector<16x1xf32>
    %445 = math.rsqrt %444 : vector<16x1xf32>
    %446 = vector.broadcast %445 : vector<16x1xf32> to vector<16x32xf32>
    %447 = arith.mulf %442, %446 : vector<16x32xf32>
    %448 = vector.broadcast %425 : vector<1x32xf32> to vector<16x32xf32>
    %449 = arith.mulf %447, %448 : vector<16x32xf32>
    %450 = vector.broadcast %427 : vector<1x32xf32> to vector<16x32xf32>
    %451 = arith.addf %449, %450 : vector<16x32xf32>
    %c0_183 = arith.constant 0 : index
    %c0_184 = arith.constant 0 : index
    %452 = vector.load %arg25[%c0_183, %c0_184] : memref<16x32xf32, #tpu.memory_space<vmem>>, vector<16x32xf32>
    tpu.vector_store %arg25[%c0_183, %c0_184], %451 {strides = array<i32>} : memref<16x32xf32, #tpu.memory_space<vmem>>, vector<16x32xf32>,
    %c1_i32_185 = arith.constant 1 : i32
    %453 = arith.cmpi eq, %arg0, %c1_i32_185 : i32
    %454 = arith.extui %453 : i1 to i32
    %c0_i32_186 = arith.constant 0 : i32
    %455 = arith.cmpi ne, %454, %c0_i32_186 : i32
    scf.if %455 {
      %c0_187 = arith.constant 0 : index
      %c0_188 = arith.constant 0 : index
      %456 = vector.load %arg23[%c0_187, %c0_188] : memref<1x32xf32, #tpu.memory_space<vmem>>, vector<1x32xf32>
      %c0_189 = arith.constant 0 : index
      %c0_190 = arith.constant 0 : index
      %457 = vector.load %arg24[%c0_189, %c0_190] : memref<1x32xf32, #tpu.memory_space<vmem>>, vector<1x32xf32>
      %cst_191 = arith.constant dense<0.000000e+00> : vector<16xf32>
      %458 = vector.multi_reduction <add>, %451, %cst_191 [1] : vector<16x32xf32> to vector<16xf32>
      %459 = vector.shape_cast %458 : vector<16xf32> to vector<16x1xf32>
      %cst_192 = arith.constant 3.200000e+01 : f32
      %460 = vector.broadcast %cst_192 : f32 to vector<16x1xf32>
      %461 = arith.divf %459, %460 : vector<16x1xf32>
      %462 = vector.broadcast %461 : vector<16x1xf32> to vector<16x32xf32>
      %463 = arith.subf %451, %462 : vector<16x32xf32>
      %464 = vector.broadcast %461 : vector<16x1xf32> to vector<16x32xf32>
      %465 = arith.subf %451, %464 : vector<16x32xf32>
      %466 = arith.mulf %463, %465 : vector<16x32xf32>
      %cst_193 = arith.constant dense<0.000000e+00> : vector<16xf32>
      %467 = vector.multi_reduction <add>, %466, %cst_193 [1] : vector<16x32xf32> to vector<16xf32>
      %468 = vector.shape_cast %467 : vector<16xf32> to vector<16x1xf32>
      %cst_194 = arith.constant 3.200000e+01 : f32
      %469 = vector.broadcast %cst_194 : f32 to vector<16x1xf32>
      %470 = arith.divf %468, %469 : vector<16x1xf32>
      %471 = vector.broadcast %461 : vector<16x1xf32> to vector<16x32xf32>
      %472 = arith.subf %451, %471 : vector<16x32xf32>
      %cst_195 = arith.constant 9.99999974E-6 : f32
      %473 = vector.broadcast %cst_195 : f32 to vector<16x1xf32>
      %474 = arith.addf %470, %473 : vector<16x1xf32>
      %475 = math.rsqrt %474 : vector<16x1xf32>
      %476 = vector.broadcast %475 : vector<16x1xf32> to vector<16x32xf32>
      %477 = arith.mulf %472, %476 : vector<16x32xf32>
      %478 = vector.broadcast %456 : vector<1x32xf32> to vector<16x32xf32>
      %479 = arith.mulf %477, %478 : vector<16x32xf32>
      %480 = vector.broadcast %457 : vector<1x32xf32> to vector<16x32xf32>
      %481 = arith.addf %479, %480 : vector<16x32xf32>
      %c0_196 = arith.constant 0 : index
      %c0_197 = arith.constant 0 : index
      %482 = vector.load %arg25[%c0_196, %c0_197] : memref<16x32xf32, #tpu.memory_space<vmem>>, vector<16x32xf32>
      tpu.vector_store %arg25[%c0_196, %c0_197], %481 {strides = array<i32>} : memref<16x32xf32, #tpu.memory_space<vmem>>, vector<16x32xf32>,
    } else {
    }
    return
  }
  func.func @transform_0(%arg0: i32) -> (i32, i32) {
    %c0_i32 = arith.constant 0 : i32
    %c0_i32_0 = arith.constant 0 : i32
    %c0_i32_1 = arith.constant 0 : i32
    return %c0_i32, %c0_i32_0 : i32, i32
  }
  func.func @transform_1(%arg0: i32) -> (i32, i32) {
    %c0_i32 = arith.constant 0 : i32
    %c0_i32_0 = arith.constant 0 : i32
    %c0_i32_1 = arith.constant 0 : i32
    return %c0_i32, %c0_i32_0 : i32, i32
  }
  func.func @transform_2(%arg0: i32) -> (i32, i32, i32) {
    %c0_i32 = arith.constant 0 : i32
    %c0_i32_0 = arith.constant 0 : i32
    %c0_i32_1 = arith.constant 0 : i32
    return %arg0, %c0_i32, %c0_i32_0 : i32, i32, i32
  }
  func.func @transform_3(%arg0: i32) -> (i32, i32, i32) {
    %c0_i32 = arith.constant 0 : i32
    %c0_i32_0 = arith.constant 0 : i32
    %c0_i32_1 = arith.constant 0 : i32
    return %arg0, %c0_i32, %c0_i32_0 : i32, i32, i32
  }
  func.func @transform_4(%arg0: i32) -> (i32, i32, i32) {
    %c0_i32 = arith.constant 0 : i32
    %c0_i32_0 = arith.constant 0 : i32
    %c0_i32_1 = arith.constant 0 : i32
    return %arg0, %c0_i32, %c0_i32_0 : i32, i32, i32
  }
  func.func @transform_5(%arg0: i32) -> (i32, i32, i32) {
    %c0_i32 = arith.constant 0 : i32
    %c0_i32_0 = arith.constant 0 : i32
    %c0_i32_1 = arith.constant 0 : i32
    return %arg0, %c0_i32, %c0_i32_0 : i32, i32, i32
  }
  func.func @transform_6(%arg0: i32) -> (i32, i32, i32) {
    %c0_i32 = arith.constant 0 : i32
    %c0_i32_0 = arith.constant 0 : i32
    %c0_i32_1 = arith.constant 0 : i32
    return %arg0, %c0_i32, %c0_i32_0 : i32, i32, i32
  }
  func.func @transform_7(%arg0: i32) -> (i32, i32, i32) {
    %c0_i32 = arith.constant 0 : i32
    %c0_i32_0 = arith.constant 0 : i32
    %c0_i32_1 = arith.constant 0 : i32
    return %arg0, %c0_i32, %c0_i32_0 : i32, i32, i32
  }
  func.func @transform_8(%arg0: i32) -> (i32, i32, i32) {
    %c0_i32 = arith.constant 0 : i32
    %c0_i32_0 = arith.constant 0 : i32
    %c0_i32_1 = arith.constant 0 : i32
    return %arg0, %c0_i32, %c0_i32_0 : i32, i32, i32
  }
  func.func @transform_9(%arg0: i32) -> (i32, i32, i32) {
    %c0_i32 = arith.constant 0 : i32
    %c0_i32_0 = arith.constant 0 : i32
    %c0_i32_1 = arith.constant 0 : i32
    return %arg0, %c0_i32, %c0_i32_0 : i32, i32, i32
  }
  func.func @transform_10(%arg0: i32) -> (i32, i32, i32) {
    %c0_i32 = arith.constant 0 : i32
    %c0_i32_0 = arith.constant 0 : i32
    %c0_i32_1 = arith.constant 0 : i32
    return %arg0, %c0_i32, %c0_i32_0 : i32, i32, i32
  }
  func.func @transform_11(%arg0: i32) -> (i32, i32, i32) {
    %c0_i32 = arith.constant 0 : i32
    %c0_i32_0 = arith.constant 0 : i32
    %c0_i32_1 = arith.constant 0 : i32
    return %arg0, %c0_i32, %c0_i32_0 : i32, i32, i32
  }
  func.func @transform_12(%arg0: i32) -> (i32, i32, i32) {
    %c0_i32 = arith.constant 0 : i32
    %c0_i32_0 = arith.constant 0 : i32
    %c0_i32_1 = arith.constant 0 : i32
    return %arg0, %c0_i32, %c0_i32_0 : i32, i32, i32
  }
  func.func @transform_13(%arg0: i32) -> (i32, i32, i32) {
    %c0_i32 = arith.constant 0 : i32
    %c0_i32_0 = arith.constant 0 : i32
    %c0_i32_1 = arith.constant 0 : i32
    return %arg0, %c0_i32, %c0_i32_0 : i32, i32, i32
  }
  func.func @transform_14(%arg0: i32) -> (i32, i32, i32) {
    %c0_i32 = arith.constant 0 : i32
    %c0_i32_0 = arith.constant 0 : i32
    %c0_i32_1 = arith.constant 0 : i32
    return %arg0, %c0_i32, %c0_i32_0 : i32, i32, i32
  }
  func.func @transform_15(%arg0: i32) -> (i32, i32, i32) {
    %c0_i32 = arith.constant 0 : i32
    %c0_i32_0 = arith.constant 0 : i32
    %c0_i32_1 = arith.constant 0 : i32
    return %arg0, %c0_i32, %c0_i32_0 : i32, i32, i32
  }
  func.func @transform_16(%arg0: i32) -> (i32, i32, i32) {
    %c0_i32 = arith.constant 0 : i32
    %c0_i32_0 = arith.constant 0 : i32
    %c0_i32_1 = arith.constant 0 : i32
    return %arg0, %c0_i32, %c0_i32_0 : i32, i32, i32
  }
  func.func @transform_17(%arg0: i32) -> (i32, i32, i32) {
    %c0_i32 = arith.constant 0 : i32
    %c0_i32_0 = arith.constant 0 : i32
    %c0_i32_1 = arith.constant 0 : i32
    return %arg0, %c0_i32, %c0_i32_0 : i32, i32, i32
  }
  func.func @transform_18(%arg0: i32) -> (i32, i32, i32) {
    %c0_i32 = arith.constant 0 : i32
    %c0_i32_0 = arith.constant 0 : i32
    %c0_i32_1 = arith.constant 0 : i32
    return %arg0, %c0_i32, %c0_i32_0 : i32, i32, i32
  }
  func.func @transform_19(%arg0: i32) -> (i32, i32, i32) {
    %c0_i32 = arith.constant 0 : i32
    %c0_i32_0 = arith.constant 0 : i32
    %c0_i32_1 = arith.constant 0 : i32
    return %arg0, %c0_i32, %c0_i32_0 : i32, i32, i32
  }
  func.func @transform_20(%arg0: i32) -> (i32, i32, i32) {
    %c0_i32 = arith.constant 0 : i32
    %c0_i32_0 = arith.constant 0 : i32
    %c0_i32_1 = arith.constant 0 : i32
    return %arg0, %c0_i32, %c0_i32_0 : i32, i32, i32
  }
  func.func @transform_21(%arg0: i32) -> (i32, i32, i32) {
    %c0_i32 = arith.constant 0 : i32
    %c0_i32_0 = arith.constant 0 : i32
    %c0_i32_1 = arith.constant 0 : i32
    return %arg0, %c0_i32, %c0_i32_0 : i32, i32, i32
  }
  func.func @transform_22(%arg0: i32) -> (i32, i32) {
    %c0_i32 = arith.constant 0 : i32
    %c0_i32_0 = arith.constant 0 : i32
    %c0_i32_1 = arith.constant 0 : i32
    return %c0_i32, %c0_i32_0 : i32, i32
  }
  func.func @transform_23(%arg0: i32) -> (i32, i32) {
    %c0_i32 = arith.constant 0 : i32
    %c0_i32_0 = arith.constant 0 : i32
    %c0_i32_1 = arith.constant 0 : i32
    return %c0_i32, %c0_i32_0 : i32, i32
  }
  func.func @transform_24(%arg0: i32) -> (i32, i32) {
    %c0_i32 = arith.constant 0 : i32
    %c0_i32_0 = arith.constant 0 : i32
    %c0_i32_1 = arith.constant 0 : i32
    return %c0_i32, %c0_i32_0 : i32, i32
  }
}

</mosaic_0001>

<bundles_post_ra>
// kernel: conv_transformer_forward.2
= control target key start
LH: loop header
LB: loop body
LE: loop exit
PB: predicated region body
PF: predicated region fallthrough
CT: control target
= control target key end

     0   :  { %s2068_s18 = smov 0   ;;  %s2383_s0 = inlined_call_operand.vmem [shape: f32[16,32], index: 0, kind: input, shape index: {}]   ;;  %s2384_s1 = inlined_call_operand.vmem [shape: bf16[2,96,96], index: 1, kind: input, shape index: {}]   ;;  %s2385_s2 = inlined_call_operand.vmem [shape: f32[2,1,96], index: 2, kind: input, shape index: {}]   ;;  %s2386_s3 = inlined_call_operand.vmem [shape: bf16[2,32,32], index: 3, kind: input, shape index: {}]   ;;  %s2387_s4 = inlined_call_operand.vmem [shape: f32[2,1,32], index: 4, kind: input, shape index: {}]   ;;  %s2388_s5 = inlined_call_operand.vmem [shape: bf16[2,32,64], index: 5, kind: input, shape index: {}]   ;;  %s2389_s6 = inlined_call_operand.vmem [shape: f32[2,1,64], index: 6, kind: input, shape index: {}]   ;;  %s2390_s7 = inlined_call_operand.vmem [shape: bf16[2,64,32], index: 7, kind: input, shape index: {}]   ;;  %s2391_s8 = inlined_call_operand.vmem [shape: f32[2,1,32], index: 8, kind: input, shape index: {}]   ;;  %s2392_s9 = inlined_call_operand.vmem [shape: f32[2,1,32], index: 9, kind: input, shape index: {}]   ;;  %s2393_s10 = inlined_call_operand.vmem [shape: f32[2,1,32], index: 10, kind: input, shape index: {}]   ;;  %s2394_s11 = inlined_call_operand.vmem [shape: f32[2,1,32], index: 11, kind: input, shape index: {}]   ;;  %s2395_s12 = inlined_call_operand.vmem [shape: f32[2,1,32], index: 12, kind: input, shape index: {}]   ;;  %s2396_s13 = inlined_call_operand.vmem [shape: f32[1,32], index: 13, kind: input, shape index: {}]   ;;  %s2397_s14 = inlined_call_operand.vmem [shape: f32[1,32], index: 14, kind: input, shape index: {}]   ;;  %s2398_s15 = inlined_call_operand.vmem [shape: f32[16,32], index: 15, kind: output, shape index: {}]  }
   0x1   :  { %2403 = sst [smem:[#allocation4_spill]] %s2384_s1 }
   0x2   :  { %2404 = sst [smem:[#allocation5_spill]] %s2386_s3 }
   0x3   :  { %2405 = sst [smem:[#allocation6_spill]] %s2387_s4 }
   0x4   :  { %2406 = sst [smem:[#allocation7_spill]] %s2388_s5 }
   0x5   :  { %2407 = sst [smem:[#allocation8_spill]] %s2396_s13 }
   0x6   :  { %2408 = sst [smem:[#allocation9_spill]] %s2397_s14 }
   0x7   :  { %2409 = sst [smem:[#allocation10_spill]] %s2398_s15 }
   0x8 LB: > { %2410 = sst [smem:[#allocation3_spill]] %s1971_s18  ;;  %s2074_s19 = sadd.s32 4294967295, %s1971_s18   ;;  %s1971_s18 = sphi %s2068_s18, %s25_s18  }
   0x9   : > { %p1778_p0 = scmp.ge.s32.totalorder %s1971_s18, 1  ;;  %p526_p1 = scmp.lt.s32.totalorder %s1971_s18, 3 }
   0xb   : > { %p527_p2 = pnand %p1778_p0, %p526_p1 }
   0xc   : > { %p608_p3 = scmp.lt.s32.totalorder (!%p527_p2), %s2074_s19, 1  ;;  %s2412_s1 = sld [smem:[#allocation4_spill]] (!%p527_p2) }
   0xd   : > { %530 = sbr.rel (%p527_p2) target bundleno = 2348 (0x92c), region = 80  ;;  %s2413_s3 = sld [smem:[#allocation5_spill]] (!%p527_p2) }
   0xe   : > { %s2414_s5 = sld [smem:[#allocation7_spill]] (!%p527_p2)  ;;  %p1786_p4 = scmp.ne.s32.totalorder (!%p527_p2), %s2074_s19, 0 }
  0x12   : > { %s2080_s20 = scalar_select %p608_p3, %s2074_s19, 1 }
  0x14   : > { %s1885_s21 = smul.u32 48, %s2080_s20  ;;  %s1868_s25 = sshll.u32 %s2080_s20, 4 }
  0x15   : > { %s2100_s14 = scalar_lea.vmem %s2413_s3, %s1868_s25  ;;  %s2105_s22 = scalar_lea.vmem %s2414_s5, %s1868_s25 }
  0x16   : > { %s2095_s16 = scalar_lea.vmem %s2412_s1, %s1885_s21  ;;  %s1870_s27 = sshll.u32 %s2080_s20, 5 }
  0x17   : > { %s639_s21 = scalar_lea.vmem %s2391_s8, %s2080_s20  ;;  %s2119_s18 = scalar_lea.vmem %s2390_s7, %s1870_s27 }
  0x18   : > { %s642_s13 = scalar_lea.vmem %s2392_s9, %s2080_s20  ;;  %s645_s3 = scalar_lea.vmem %s2393_s10, %s2080_s20 }
  0x19   : > { %s648_s26 = scalar_lea.vmem %s2394_s11, %s2080_s20  ;;  %s651_s28 = scalar_lea.vmem %s2395_s12, %s2080_s20 }
  0x1a   : > { %656 = sbr.rel (%p1786_p4) target bundleno = 34 (0x22), region = 84  ;;  %s2415_s25 = sld [smem:[#allocation10_spill]] (!%p1786_p4) }
  0x1f   : > { %v657_v0 = vld [vmem:[%s2383_s0] sm:$0xff]  ;;  %vm659_vm0 = vcmask 261120   ;;  %v658_v1 = vld [vmem:[%s2383_s0 + $0x8] sm:$0xff] }
  0x20   : > { %660 = vst.msk [vmem:[%s2415_s25] sm:$0xff] %vm659_vm0, %v657_v0 }
  0x21   : > { %661 = vst.msk [vmem:[%s2415_s25 + $0x8] sm:$0xff] %vm659_vm0, %v658_v1 }
  0x22 PF: > { %v1874_v2 = vld [vmem:[%s2095_s16 + $0x18] sm:$0xff]  ;;  %v1872_v3 = vld [vmem:[%s2095_s16 + $0x8] sm:$0xff]  ;;  %v677_v5 = vlaneseq  ;;  %v1873_v6 = vld [vmem:[%s2095_s16 + $0x10] sm:$0xff]  ;;  %s2416_s27 = sld [smem:[#allocation10_spill]]  ;;  %vm727_vm1 = vcmask 261120   ;;  %s2417_s17 = scalar_lea.vmem %s2385_s2, %s2080_s20  ;;  %vm832_vm8 = vcmask 64512  }
  0x23   : > { %v1876_v4 = vld [vmem:[%s2095_s16 + $0x28] sm:$0xff]  ;;  %v1871_v7 = vld [vmem:[%s2095_s16] sm:$0xff]  ;;  %737 = vmatpush.bf16.msra.mxu0 %v1874_v2  ;;  %766 = vmatpush.bf16.msra.mxu1 %v1872_v3  ;;  %s1973_s15 = smov 120   ;;  %s1974_s25 = smov 88   ;;  %vm907_vm9 = vcmask 1043456   ;;  %vm1069_vm10 = vcmask 130112  }
  0x24   : > { %v678_v10 = vshrl.u32 %v677_v5, 7  ;;  %805 = vmatpush.bf16.msra.mxu2 %v1876_v4  ;;  %v1875_v11 = vld [vmem:[%s2095_s16 + $0x20] sm:$0xff]  ;;  %s1975_s24 = smov 96   ;;  %s1976_s23 = smov 112   ;;  %vm1194_vm11 = vcmask 195712   ;;  %vm1319_vm12 = vcmask 261312  }
  0x25   : > { %v1909_v33 = vld [vmem:[%s2417_s17] ss:$0 sm:$0xff]  ;;  %s1977_s5 = smov 80   ;;  %s1978_s4 = smov 72  }
  0x26   : > { %v679_v15 = vadd.s32 8, %v678_v10  ;;  %v684_v16 = vand.u32 7, %v678_v10  ;;  %vm706_vm2 = vcmp.lt.s32.totalorder %v678_v10, 1  ;;  %vm776_vm3 = vcmp.lt.s32.totalorder %v678_v10, 7  ;;  %s1979_s29 = smov 104   ;;  %s1980_s1 = smov 64  }
  0x27   : > { %738 = vmatpush.bf16.msra.mxu0 %v1873_v6  ;;  %767 = vmatpush.bf16.msra.mxu1 %v1871_v7  ;;  %s1981_s16 = smov 56   ;;  %s1982_s30 = smov 48  }
  0x28   : > { %v2158_v8 = vld [vmem:[%s2416_s27] sm:$0xff]  ;;  %v2163_v9 = vld [vmem:[%s2416_s27 + $0x8] sm:$0xff]  ;;  %v691_v21 = vand.u32 7, %v679_v15  ;;  %vm709_vm4 = vcmp.ge.s32.totalorder %v684_v16, 1  ;;  %806 = vmatpush.bf16.msra.mxu2 %v1875_v11  ;;  %vm779_vm5 = vcmp.lt.s32.totalorder %v684_v16, 7  ;;  %s1983_s17 = smov 40  }
  0x29   : > { %v704_v12 = vrot.slane %v2158_v8, 7  ;;  %v705_v13 = vrot.slane %v2163_v9, 7  ;;  %v774_v14 = vrot.slane %v2158_v8, 1  ;;  %v775_v17 = vrot.slane %v2163_v9, 1  ;;  %p1865_p5 = scmp.ne.s32.totalorder %s2074_s19, 1 }
  0x2a   : > { %v714_v18 = vpack.c.bf16 %v2163_v9, %v2158_v8  ;;  %vm710_vm6 = vcmp.ge.s32.totalorder %v691_v21, 1  ;;  %vm780_vm7 = vcmp.lt.s32.totalorder %v691_v21, 7 }
  0x2b   : > { %v707_v19 = vsel %vm706_vm2, %v704_v12, %v705_v13  ;;  %v708_v20 = vsel %vm706_vm2, %v705_v13, %v704_v12  ;;  %v777_v22 = vsel %vm776_vm3, %v774_v14, %v775_v17  ;;  %v778_v23 = vsel %vm776_vm3, %v775_v17, %v774_v14 }
  0x2c   : > { %v711_v24 = vsel %vm709_vm4, %v708_v20, 0.0  ;;  %v781_v25 = vsel %vm779_vm5, %v777_v22, 0.0  ;;  %1795 = vmatmul.msk.bf16.vlgmr.msra.gmra.mxu0 %vm727_vm1, %v714_v18  ;;  %v712_v26 = vsel %vm710_vm6, %v707_v19, 0.0  ;;  %v782_v27 = vsel %vm780_vm7, %v778_v23, 0.0 }
  0x2d   : > { %v713_v28 = vpack.c.bf16 %v712_v26, %v711_v24  ;;  %v783_v29 = vpack.c.bf16 %v782_v27, %v781_v25  ;;  %vm1499_vm5 = vcmask 523264  }
  0x2f   : > { %1804 = vmatmul.msk.bf16.vlgmr.msra.gmra.mxu1 %vm727_vm1, %v713_v28  ;;  %1813 = vmatmul.msk.bf16.vlgmr.msra.gmra.mxu2 %vm727_vm1, %v783_v29 }
  0xa9   : > { %v740_v31 = vpop.f32.mrf.mxu0 }
  0xac   : > { %v769_v30 = vpop.f32.mrf.mxu1 }
  0xad   : > { %v770_v32 = vadd.f32 %v769_v30, %v740_v31 }
  0xb1   : > { %v742_v39 = vpop.f32.mrf.mxu0 }
  0xb2   : > { %v808_v34 = vpop.f32.mrf.mxu2 }
  0xb3   : > { %v813_v35 = vadd.f32 %v808_v34, %v770_v32 }
  0xb4   : > { %v771_v37 = vpop.f32.mrf.mxu1 }
  0xb5   : > { %v818_v36 = vadd.f32 %v1909_v33, %v813_v35  ;;  %v772_v41 = vadd.f32 %v771_v37, %v742_v39 }
  0xb7   : > { %v825_v38 = vpack.c.bf16 %v818_v36, %v818_v36 }
  0xb9   : > { %v828_v40 = vunpack.c.l.b16 %v825_v38 }
  0xba   : > { %v810_v42 = vpop.f32.mrf.mxu2 }
  0xbb   : > { %v2180_v43 = vpack.c.b16 %v828_v40, %v828_v40  ;;  %v814_v44 = vadd.f32 %v810_v42, %v772_v41 }
  0xbd   : > { %v819_v45 = vadd.f32 %v1909_v33, %v814_v44  ;;  %947 = vrot.lane.b32.xlu2 %v2180_v43, %s1973_s15  ;;  %949 = vrot.lane.b32.xlu1 %v2180_v43, %s1974_s25 }
  0xbe   : > { %830 = vrot.lane.b32.xlu0 %v2180_v43, %s1975_s24 }
  0xbf   : > { %v826_v46 = vpack.c.bf16 %v819_v45, %v819_v45 }
  0xc1   : > { %v853_v47 = vunpack.c.l.b16 %v826_v46 }
  0xc3   : > { %v2185_v48 = vpack.c.b16 %v853_v47, %v853_v47 }
  0xc5   : > { %970 = vrot.lane.b32.xlu2 %v2185_v48, %s1973_s15  ;;  %972 = vrot.lane.b32.xlu1 %v2185_v48, %s1974_s25  ;;  %s1984_s15 = smov 8   ;;  %s1985_s25 = smov 16  }
  0xc6   : > { %855 = vrot.lane.b32.xlu0 %v2185_v48, %s1975_s24  ;;  %s1986_s24 = smov 24  }
  0xcd   : > { %1072 = vrot.lane.b32.xlu2 %v2180_v43, %s1976_s23  ;;  %1097 = vrot.lane.b32.xlu1 %v2185_v48, %s1977_s5 }
  0xce   : > { %1074 = vrot.lane.b32.xlu0 %v2180_v43, %s1977_s5 }
  0xd5   : > { %1222 = vrot.lane.b32.xlu2 %v2185_v48, %s1978_s4  ;;  %1199 = vrot.lane.b32.xlu1 %v2180_v43, %s1978_s4  ;;  %s2418_s4 = sld [smem:[#allocation6_spill]] }
  0xd6   : > { %1095 = vrot.lane.b32.xlu0 %v2185_v48, %s1976_s23 }
  0xdd   : > { %1220 = vrot.lane.b32.xlu1 %v2185_v48, %s1979_s29 }
  0xde   : > { %1197 = vrot.lane.b32.xlu0 %v2180_v43, %s1979_s29  ;;  %s2419_s29 = scalar_lea.vmem %s2418_s4, %s2080_s20 }
 0x117   : > { %v948_v50 = vpop.permute.xlu2 %947 }
 0x11f   : > { %v971_v58 = vpop.permute.xlu2 %970 }
 0x127   : > { %v1073_v63 = vpop.permute.xlu2 %1072 }
 0x12f   : > { %v950_v49 = vpop.permute.xlu1 %949  ;;  %v1223_v2 = vpop.permute.xlu2 %1222 }
 0x130   : > { %v831_v51 = vpop.permute.xlu0 %830  ;;  %v955_v52 = vsel %vm832_vm8, %v950_v49, 0  ;;  %v1228_v3 = vsel %vm832_vm8, %v1223_v2, 0 }
 0x131   : > { %v837_v53 = vsel %vm832_vm8, %v831_v51, 0 }
 0x132   : > { %846 = vmatpush.bf16.xpose.msra.mxu3 %v837_v53 }
 0x137   : > { %v973_v54 = vpop.permute.xlu1 %972 }
 0x138   : > { %v978_v55 = vsel %vm832_vm8, %v973_v54, 0  ;;  %v856_v56 = vpop.permute.xlu0 %855 }
 0x139   : > { %1814 = vmatmul.msk.bf16.vlgmr.msra.gmra.mxu3 %vm832_vm8, %v825_v38  ;;  %v861_v57 = vsel %vm832_vm8, %v856_v56, 0 }
 0x13a   : > { %964 = vmatpush.bf16.xpose.msrb.mxu3 %v955_v52  ;;  %870 = vmatpush.bf16.xpose.msrb.mxu0 %v861_v57 }
 0x13f   : > { %v1098_v59 = vpop.permute.xlu1 %1097 }
 0x140   : > { %v1103_v60 = vsel %vm832_vm8, %v1098_v59, 0  ;;  %v1075_v61 = vpop.permute.xlu0 %1074 }
 0x141   : > { %v1080_v62 = vsel %vm832_vm8, %v1075_v61, 0  ;;  %1815 = vmatmul.msk.bf16.vlgmr.msrb.gmra.mxu0 %vm832_vm8, %v826_v46 }
 0x142   : > { %987 = vmatpush.bf16.xpose.msra.mxu0 %v978_v55  ;;  %1089 = vmatpush.bf16.xpose.msra.mxu3 %v1080_v62 }
 0x147   : > { %v1200_v0 = vpop.permute.xlu1 %1199 }
 0x148   : > { %v1205_v1 = vsel %vm832_vm8, %v1200_v0, 0  ;;  %v1096_v4 = vpop.permute.xlu0 %1095 }
 0x149   : > { %1818 = vmatmul.msk.bf16.vlgmr.msrb.gmra.mxu3 %vm832_vm8, %v948_v50 }
 0x14a   : > { %1112 = vmatpush.bf16.xpose.msrb.mxu0 %v1103_v60  ;;  %1214 = vmatpush.bf16.xpose.msrb.mxu3 %v1205_v1 }
 0x14f   : > { %v1221_v6 = vpop.permute.xlu1 %1220 }
 0x150   : > { %v1198_v5 = vpop.permute.xlu0 %1197 }
 0x151   : > { %1819 = vmatmul.msk.bf16.vlgmr.msra.gmra.mxu0 %vm832_vm8, %v971_v58 }
 0x152   : > { %1237 = vmatpush.bf16.xpose.msra.mxu0 %v1228_v3 }
 0x159   : > { %1822 = vmatmul.msk.bf16.vlgmr.msra.gmra.mxu3 %vm832_vm8, %v1073_v63 }
 0x161   : > { %1823 = vmatmul.msk.bf16.vlgmr.msrb.gmra.mxu0 %vm832_vm8, %v1096_v4 }
 0x169   : > { %1826 = vmatmul.msk.bf16.vlgmr.msrb.gmra.mxu3 %vm832_vm8, %v1198_v5 }
 0x171   : > { %1827 = vmatmul.msk.bf16.vlgmr.msra.gmra.mxu0 %vm832_vm8, %v1221_v6 }
 0x1bc   : > { %v848_v7 = vpop.f32.mrf.mxu3 }
 0x1bd   : > { %v876_v10 = vmul.f32 0.35355338, %v848_v7 }
 0x1be   : > { %v872_v11 = vpop.f32.mrf.mxu0 }
 0x1bf   : > { %v877_v12 = vmul.f32 0.35355338, %v872_v11  ;;  %v878_v13 = vsel %vm832_vm8, %v876_v10, -inf }
 0x1c0   : > { %879 = vmax.xlane.f32.xlu0 %v878_v13 }
 0x1c1   : > { %v881_v14 = vsel %vm832_vm8, %v877_v12, -inf }
 0x1c2   : > { %882 = vmax.xlane.f32.xlu2 %v881_v14 }
 0x1c4   : > { %v850_v15 = vpop.f32.mrf.mxu3 }
 0x1c6   : > { %v874_v16 = vpop.f32.mrf.mxu0 }
 0x1cc   : > { %v966_v17 = vpop.f32.mrf.mxu3 }
 0x1cd   : > { %v2216_v18 = vmul.f32 0.35355338, %v966_v17 }
 0x1ce   : > { %v989_v19 = vpop.f32.mrf.mxu0 }
 0x1cf   : > { %v2218_v20 = vmul.f32 0.35355338, %v989_v19  ;;  %v995_v21 = vsel %vm832_vm8, %v2216_v18, -inf }
 0x1d0   : > { %996 = vmax.xlane.f32.xlu2 %v995_v21 }
 0x1d1   : > { %v998_v22 = vsel %vm832_vm8, %v2218_v20, -inf }
 0x1d2   : > { %999 = vmax.xlane.f32.xlu1 %v998_v22 }
 0x1d4   : > { %v968_v23 = vpop.f32.mrf.mxu3 }
 0x1d6   : > { %v991_v24 = vpop.f32.mrf.mxu0 }
 0x1dc   : > { %v1091_v25 = vpop.f32.mrf.mxu3 }
 0x1dd   : > { %v1118_v26 = vmul.f32 0.35355338, %v1091_v25 }
 0x1de   : > { %v1114_v27 = vpop.f32.mrf.mxu0 }
 0x1df   : > { %v1119_v28 = vmul.f32 0.35355338, %v1114_v27  ;;  %v1120_v29 = vsel %vm832_vm8, %v1118_v26, -inf }
 0x1e0   : > { %1121 = vmax.xlane.f32.xlu0 %v1120_v29 }
 0x1e1   : > { %v1123_v30 = vsel %vm832_vm8, %v1119_v28, -inf }
 0x1e2   : > { %1124 = vmax.xlane.f32.xlu2 %v1123_v30 }
 0x1e4   : > { %v1093_v31 = vpop.f32.mrf.mxu3 }
 0x1e6   : > { %v1116_v32 = vpop.f32.mrf.mxu0 }
 0x1ec   : > { %v1216_v33 = vpop.f32.mrf.mxu3 }
 0x1ed   : > { %v1243_v34 = vmul.f32 0.35355338, %v1216_v33 }
 0x1ee   : > { %v1239_v35 = vpop.f32.mrf.mxu0 }
 0x1ef   : > { %v2226_v36 = vmul.f32 0.35355338, %v1239_v35  ;;  %v1245_v37 = vsel %vm832_vm8, %v1243_v34, -inf }
 0x1f0   : > { %1246 = vmax.xlane.f32.xlu0 %v1245_v37 }
 0x1f1   : > { %v1248_v38 = vsel %vm832_vm8, %v2226_v36, -inf }
 0x1f2   : > { %1249 = vmax.xlane.f32.xlu1 %v1248_v38 }
 0x1f4   : > { %v1218_v39 = vpop.f32.mrf.mxu3 }
 0x1f6   : > { %v1241_v40 = vpop.f32.mrf.mxu0 }
 0x204   : > { %902 = vrot.lane.b32.xlu0 %v2180_v43, %s1980_s1 }
 0x20c   : > { %1019 = vrot.lane.b32.xlu0 %v2180_v43, %s1981_s16 }
 0x233   : > { %v880_v41 = vpop.xlane.xlu0 %879 }
 0x234   : > { %v884_v42 = vsub.f32 %v876_v10, %v880_v41 }
 0x235   : > { %v883_v44 = vpop.xlane.xlu2 %882 }
 0x236   : > { %v886_v45 = vmul.f32 1.442695, %v884_v42  ;;  %v885_v46 = vsub.f32 %v877_v12, %v883_v44 }
 0x238   : > { %1917 = vpow2.f32 %v886_v45  ;;  %v888_v47 = vmul.f32 1.442695, %v885_v46 }
 0x23a   : > { %1919 = vpow2.f32 %v888_v47 }
 0x23e   : > { %v1918_v49 = vpop.eup %1917 }
 0x23f   : > { %v890_v50 = vsel %vm832_vm8, %v1918_v49, 0.0 }
 0x240   : > { %v1920_v51 = vpop.eup %1919  ;;  %891 = vadd.xlane.f32.xlu1 %v890_v50 }
 0x241   : > { %v893_v52 = vsel %vm832_vm8, %v1920_v51, 0.0 }
 0x242   : > { %894 = vadd.xlane.f32.xlu2 %v893_v52 }
 0x243   : > { %v997_v58 = vpop.xlane.xlu2 %996 }
 0x244   : > { %v1001_v1 = vsub.f32 %v2216_v18, %v997_v58 }
 0x245   : > { %v1000_v5 = vpop.xlane.xlu1 %999 }
 0x246   : > { %v1003_v3 = vmul.f32 1.442695, %v1001_v1 }
 0x253   : > { %v1122_v53 = vpop.xlane.xlu0 %1121 }
 0x254   : > { %v1126_v54 = vsub.f32 %v1118_v26, %v1122_v53 }
 0x255   : > { %v1125_v59 = vpop.xlane.xlu2 %1124 }
 0x256   : > { %v1128_v55 = vmul.f32 1.442695, %v1126_v54  ;;  %v1127_v61 = vsub.f32 %v1119_v28, %v1125_v59 }
 0x258   : > { %1921 = vpow2.f32 %v1128_v55  ;;  %v1130_v62 = vmul.f32 1.442695, %v1127_v61 }
 0x259   : > { %1040 = vrot.lane.b32.xlu1 %v2185_v48, %s1981_s16  ;;  %s2423_s16 = sld [smem:[#allocation10_spill]] (!%p1865_p5) }
 0x25a   : > { %924 = vrot.lane.b32.xlu2 %v2185_v48, %s1980_s1  ;;  %1923 = vpow2.f32 %v1130_v62 }
 0x25b   : > { %1925 = vpow2.f32 %v1003_v3 }
 0x25e   : > { %v2237_v56 = vpop.eup %1921 }
 0x25f   : > { %v1132_v57 = vsel %vm832_vm8, %v2237_v56, 0.0 }
 0x260   : > { %1133 = vadd.xlane.f32.xlu0 %v1132_v57  ;;  %v2247_v7 = vpop.eup %1923 }
 0x261   : > { %1165 = vrot.lane.b32.xlu1 %v2185_v48, %s1982_s30  ;;  %v1135_v11 = vsel %vm832_vm8, %v2247_v7, 0.0  ;;  %v1926_v13 = vpop.eup %1925 }
 0x262   : > { %v1007_v15 = vsel %vm832_vm8, %v1926_v13, 0.0 }
 0x263   : > { %v1247_v60 = vpop.xlane.xlu0 %1246 }
 0x264   : > { %v1251_v2 = vsub.f32 %v1243_v34, %v1247_v60 }
 0x265   : > { %v1250_v19 = vpop.xlane.xlu1 %1249 }
 0x266   : > { %v1253_v4 = vmul.f32 1.442695, %v1251_v2 }
 0x268   : > { %1927 = vpow2.f32 %v1253_v4 }
 0x26e   : > { %v2253_v14 = vpop.eup %1927 }
 0x26f   : > { %v1257_v16 = vsel %vm832_vm8, %v2253_v14, 0.0 }
 0x274   : > { %1290 = vrot.lane.b32.xlu0 %v2185_v48, %s1983_s17  ;;  %v1002_v48 = vsub.f32 %v2218_v20, %v1000_v5 }
 0x276   : > { %v903_v63 = vpop.permute.xlu0 %902  ;;  %v1005_v12 = vmul.f32 1.442695, %v1002_v48 }
 0x277   : > { %v909_v0 = vsel %vm907_vm9, %v903_v63, 0 }
 0x278   : > { %918 = vmatpush.bf16.msrb.mxu1 %v909_v0  ;;  %1929 = vpow2.f32 %v1005_v12 }
 0x27e   : > { %v1020_v6 = vpop.permute.xlu0 %1019  ;;  %v1930_v17 = vpop.eup %1929 }
 0x27f   : > { %v1025_v10 = vsel %vm907_vm9, %v1020_v6, 0  ;;  %v1010_v18 = vsel %vm832_vm8, %v1930_v17, 0.0 }
 0x280   : > { %1034 = vmatpush.bf16.msra.mxu1 %v1025_v10 }
 0x283   : > { %1136 = vadd.xlane.f32.xlu2 %v1135_v11 }
 0x28b   : > { %1008 = vadd.xlane.f32.xlu1 %v1007_v15  ;;  %1258 = vadd.xlane.f32.xlu2 %v1257_v16 }
 0x293   : > { %1011 = vadd.xlane.f32.xlu1 %v1010_v18 }
 0x2a3   : > { %1269 = vrot.lane.b32.xlu2 %v2180_v43, %s1983_s17 }
 0x2ac   : > { %1144 = vrot.lane.b32.xlu1 %v2180_v43, %s1982_s30  ;;  %v1252_v43 = vsub.f32 %v2226_v36, %v1250_v19 }
 0x2ae   : > { %v1255_v30 = vmul.f32 1.442695, %v1252_v43 }
 0x2b3   : > { %v892_v20 = vpop.xlane.xlu1 %891 }
 0x2b4   : > { %1931 = vrcp.f32 %v892_v20 }
 0x2b5   : > { %v895_v21 = vpop.xlane.xlu2 %894 }
 0x2b6   : > { %1933 = vrcp.f32 %v895_v21 }
 0x2b7   : > { %1935 = vpow2.f32 %v1255_v30 }
 0x2ba   : > { %v1932_v22 = vpop.eup %1931 }
 0x2bb   : > { %v898_v23 = vmul.f32 %v1932_v22, %v1918_v49 }
 0x2bc   : > { %v1934_v24 = vpop.eup %1933 }
 0x2bd   : > { %v899_v25 = vmul.f32 %v1934_v24, %v1920_v51  ;;  %v925_v26 = vpop.permute.xlu2 %924  ;;  %v900_v27 = vpack.c.bf16 %v898_v23, %v898_v23  ;;  %v1936_v33 = vpop.eup %1935  ;;  %v1878_v23 = vld [vmem:[%s2100_s14 + $0x8] sm:$0xff] }
 0x2be   : > { %v930_v28 = vsel %vm907_vm9, %v925_v26, 0  ;;  %v1260_v37 = vsel %vm832_vm8, %v1936_v33, 0.0  ;;  %1349 = vmatpush.bf16.msra.mxu3 %v1878_v23 }
 0x2bf   : > { %1816 = vmatmul.msk.bf16.vlgmr.msrb.gmra.mxu1 %vm832_vm8, %v900_v27  ;;  %939 = vmatpush.bf16.msrb.mxu2 %v930_v28  ;;  %v901_v29 = vpack.c.bf16 %v899_v25, %v899_v25  ;;  %v1877_v28 = vld [vmem:[%s2100_s14] sm:$0xff]  ;;  %s2422_s14 = sld [smem:[#allocation9_spill]] (!%p1865_p5) }
 0x2c2   : > { %1817 = vmatmul.msk.bf16.vlgmr.msrb.gmra.mxu2 %vm832_vm8, %v901_v29  ;;  %1350 = vmatpush.bf16.msra.mxu3 %v1877_v28  ;;  %v1882_v28 = vld [vmem:[%s2119_s18 + $0x8] sm:$0xff] }
 0x2cb   : > { %v1041_v31 = vpop.permute.xlu1 %1040 }
 0x2cc   : > { %v1046_v32 = vsel %vm907_vm9, %v1041_v31, 0 }
 0x2cd   : > { %1055 = vmatpush.bf16.msra.mxu2 %v1046_v32  ;;  %v1910_v32 = vld [vmem:[%s2419_s29] ss:$0 sm:$0xff] }
 0x2d3   : > { %v1166_v34 = vpop.permute.xlu1 %1165  ;;  %v1134_v36 = vpop.xlane.xlu0 %1133 }
 0x2d4   : > { %v1171_v35 = vsel %vm907_vm9, %v1166_v34, 0 }
 0x2d5   : > { %1180 = vmatpush.bf16.msrb.mxu2 %v1171_v35 }
 0x2d6   : > { %1261 = vadd.xlane.f32.xlu1 %v1260_v37 }
 0x2e6   : > { %v1291_v47 = vpop.permute.xlu0 %1290 }
 0x2e7   : > { %v1296_v50 = vsel %vm907_vm9, %v1291_v47, 0 }
 0x2f6   : > { %v1137_v44 = vpop.xlane.xlu2 %1136 }
 0x2fe   : > { %v1009_v38 = vpop.xlane.xlu1 %1008  ;;  %v1259_v51 = vpop.xlane.xlu2 %1258 }
 0x2ff   : > { %1937 = vrcp.f32 %v1009_v38 }
 0x305   : > { %v1938_v39 = vpop.eup %1937 }
 0x306   : > { %v1015_v40 = vmul.f32 %v1938_v39, %v1926_v13  ;;  %v1012_v41 = vpop.xlane.xlu1 %1011  ;;  %v1270_v57 = vpop.permute.xlu2 %1269 }
 0x307   : > { %1939 = vrcp.f32 %v1012_v41  ;;  %v1275_v61 = vsel %vm907_vm9, %v1270_v57, 0 }
 0x308   : > { %v1017_v42 = vpack.c.bf16 %v1015_v40, %v1015_v40  ;;  %1941 = vrcp.f32 %v1137_v44 }
 0x309   : > { %1943 = vrcp.f32 %v1134_v36  ;;  %v1987_v36 = vmov 32.0  }
 0x30a   : > { %1820 = vmatmul.msk.bf16.vlgmr.msra.gmra.mxu1 %vm832_vm8, %v1017_v42  ;;  %1945 = vrcp.f32 %v1259_v51 }
 0x30d   : > { %v1940_v45 = vpop.eup %1939 }
 0x30e   : > { %v1016_v46 = vmul.f32 %v1940_v45, %v1930_v17  ;;  %v1942_v52 = vpop.eup %1941 }
 0x30f   : > { %v1944_v53 = vpop.eup %1943  ;;  %v1141_v54 = vmul.f32 %v1942_v52, %v2247_v7 }
 0x310   : > { %v1018_v49 = vpack.c.bf16 %v1016_v46, %v1016_v46  ;;  %v1140_v55 = vmul.f32 %v1944_v53, %v2237_v56  ;;  %v1946_v63 = vpop.eup %1945 }
 0x311   : > { %v1143_v60 = vpack.c.bf16 %v1141_v54, %v1141_v54  ;;  %v1265_v0 = vmul.f32 %v1946_v63, %v2253_v14  ;;  %v1879_v63 = vld [vmem:[%s2105_s22] sm:$0xff] }
 0x312   : > { %1821 = vmatmul.msk.bf16.vlgmr.msra.gmra.mxu2 %vm832_vm8, %v1018_v49  ;;  %v1142_v62 = vpack.c.bf16 %v1140_v55, %v1140_v55 }
 0x313   : > { %1305 = vmatpush.bf16.msra.mxu2 %v1296_v50  ;;  %v1267_v1 = vpack.c.bf16 %v1265_v0, %v1265_v0  ;;  %v1884_v0 = vld [vmem:[%s2119_s18 + $0x18] sm:$0xff] }
 0x31e   : > { %v1145_v58 = vpop.permute.xlu1 %1144 }
 0x31f   : > { %v1150_v59 = vsel %vm907_vm9, %v1145_v58, 0 }
 0x320   : > { %1159 = vmatpush.bf16.msrb.mxu1 %v1150_v59  ;;  %v1880_v59 = vld [vmem:[%s2105_s22 + $0x8] sm:$0xff] }
 0x321   : > { %1452 = vmatpush.bf16.msrb.mxu0 %v1880_v59 }
 0x322   : > { %1825 = vmatmul.msk.bf16.vlgmr.msrb.gmra.mxu2 %vm832_vm8, %v1143_v60 }
 0x323   : > { %1824 = vmatmul.msk.bf16.vlgmr.msrb.gmra.mxu1 %vm832_vm8, %v1142_v62 }
 0x324   : > { %1284 = vmatpush.bf16.msra.mxu1 %v1275_v61 }
 0x325   : > { %1453 = vmatpush.bf16.msrb.mxu0 %v1879_v63 }
 0x328   : > { %1507 = vmatpush.bf16.msrb.mxu1 %v1884_v0 }
 0x333   : > { %1828 = vmatmul.msk.bf16.vlgmr.msra.gmra.mxu1 %vm832_vm8, %v1267_v1 }
 0x33c   : > { %v920_v56 = vpop.f32.mrf.mxu1 }
 0x33d   : > { %945 = vst.msk [vmem:[#allocation2] sm:$0xff] %vm832_vm8, %v920_v56 }
 0x344   : > { %v922_v2 = vpop.f32.mrf.mxu1 }
 0x345   : > { %v941_v3 = vpop.f32.mrf.mxu2 }
 0x346   : > { %946 = vst.msk [vmem:[#allocation2 + $0x8] sm:$0xff] %vm832_vm8, %v941_v3 }
 0x349   : > { %v1262_v4 = vpop.xlane.xlu1 %1261 }
 0x34a   : > { %1947 = vrcp.f32 %v1262_v4 }
 0x34b   : > { %1949 = vrcp.f32 %v1987_v36 }
 0x34d   : > { %v943_v5 = vpop.f32.mrf.mxu2 }
 0x350   : > { %v1948_v6 = vpop.eup %1947 }
 0x351   : > { %v1266_v7 = vmul.f32 %v1948_v6, %v1936_v33  ;;  %v1950_v42 = vpop.eup %1949 }
 0x352   : > { %v1368_v44 = vmul.f32 32.0, %v1950_v42  ;;  %vm1372_vm13 = vweird.f32 %v1950_v42 }
 0x353   : > { %v1268_v10 = vpack.c.bf16 %v1266_v7, %v1266_v7 }
 0x354   : > { %v1369_v45 = vsub.f32 1.0, %v1368_v44 }
 0x355   : > { %1829 = vmatmul.msk.bf16.vlgmr.msra.gmra.mxu2 %vm832_vm8, %v1268_v10 }
 0x356   : > { %v1370_v46 = vmul.f32 %v1950_v42, %v1369_v45 }
 0x358   : > { %v1371_v47 = vadd.f32 %v1950_v42, %v1370_v46 }
 0x387   : > { %v1036_v48 = vpop.f32.mrf.mxu1 }
 0x388   : > { %1063 = vrot.lane.b32.xlu0 %v1036_v48, %s1984_s15 }
 0x38f   : > { %v1038_v11 = vpop.f32.mrf.mxu1 }
 0x395   : > { %v1057_v12 = vpop.f32.mrf.mxu2 }
 0x396   : > { %1065 = vrot.lane.b32.xlu2 %v1057_v12, %s1984_s15 }
 0x39d   : > { %v1059_v13 = vpop.f32.mrf.mxu2 }
 0x3a0   : > { %v1161_v14 = vpop.f32.mrf.mxu1 }
 0x3a1   : > { %1188 = vrot.lane.b32.xlu0 %v1161_v14, %s1985_s25 }
 0x3a5   : > { %v1182_v15 = vpop.f32.mrf.mxu2 }
 0x3a6   : > { %1190 = vrot.lane.b32.xlu1 %v1182_v15, %s1985_s25 }
 0x3a8   : > { %v1163_v16 = vpop.f32.mrf.mxu1 }
 0x3a9   : > { %v1911_v16 = vld [vmem:[%s642_s13] ss:$0 sm:$0xff] }
 0x3ad   : > { %v1184_v17 = vpop.f32.mrf.mxu2 }
 0x3b0   : > { %v1286_v18 = vpop.f32.mrf.mxu1 }
 0x3b1   : > { %1313 = vrot.lane.b32.xlu2 %v1286_v18, %s1986_s24 }
 0x3b8   : > { %v1288_v19 = vpop.f32.mrf.mxu1 }
 0x3d8   : > { %v1307_v20 = vpop.f32.mrf.mxu2 }
 0x3d9   : > { %1315 = vrot.lane.b32.xlu0 %v1307_v20, %s1986_s24  ;;  %v1912_v20 = vld [vmem:[%s645_s3] ss:$0 sm:$0xff]  ;;  %s2420_s3 = scalar_lea.vmem %s2389_s6, %s2080_s20 }
 0x3e0   : > { %v1309_v21 = vpop.f32.mrf.mxu2 }
 0x3f0   : > { %v1066_v22 = vpop.permute.xlu2 %1065 }
 0x3f1   : > { %1071 = vst.msk [vmem:[#allocation2 + $0x8] sm:$0xff] %vm1069_vm10, %v1066_v22 }
 0x3fa   : > { %v1064_v24 = vpop.permute.xlu0 %1063 }
 0x3fb   : > { %1070 = vst.msk [vmem:[#allocation2] sm:$0xff] %vm1069_vm10, %v1064_v24 }
 0x40b   : > { %v1314_v26 = vpop.permute.xlu2 %1313 }
 0x413   : > { %v1189_v25 = vpop.permute.xlu0 %1188 }
 0x414   : > { %1195 = vst.msk [vmem:[#allocation2] sm:$0xff] %vm1194_vm11, %v1189_v25 }
 0x415   : > { %1320 = vst.msk [vmem:[#allocation2] sm:$0xff] %vm1319_vm12, %v1314_v26 }
 0x418   : > { %v1191_v27 = vpop.permute.xlu1 %1190 }
 0x419   : > { %1196 = vst.msk [vmem:[#allocation2 + $0x8] sm:$0xff] %vm1194_vm11, %v1191_v27  ;;  %v1883_v27 = vld [vmem:[%s2119_s18 + $0x10] sm:$0xff] }
 0x41a   : > { %1508 = vmatpush.bf16.msrb.mxu1 %v1883_v27 }
 0x41c   : > { %v1322_v43 = vld [vmem:[#allocation2] sm:$0xff] }
 0x41e   : > { %1509 = vmatpush.bf16.msrb.mxu1 %v1882_v28 }
 0x44b   : > { %v1316_v29 = vpop.permute.xlu0 %1315 }
 0x44c   : > { %1321 = vst.msk [vmem:[#allocation2 + $0x8] sm:$0xff] %vm1319_vm12, %v1316_v29  ;;  %v1881_v29 = vld [vmem:[%s2119_s18] sm:$0xff] }
 0x44d   : > { %1510 = vmatpush.bf16.msrb.mxu1 %v1881_v29 }
 0x453   : > { %v1323_v30 = vld [vmem:[#allocation2 + $0x8] sm:$0xff] }
 0x454   : > { %v1324_v31 = vpack.c.bf16 %v1323_v30, %v1322_v43  ;;  %v1913_v30 = vld [vmem:[%s2420_s3] ss:$0 sm:$0xff] }
 0x456   : > { %1838 = vmatmul.msk.bf16.vlgmr.msra.gmra.mxu3 %vm727_vm1, %v1324_v31 }
 0x4d9   : > { %v1352_v33 = vpop.f32.mrf.mxu3 }
 0x4da   : > { %v1353_v34 = vadd.f32 %v1910_v32, %v1352_v33 }
 0x4dc   : > { %v1357_v35 = vadd.f32 %v1353_v34, %v2158_v8  ;;  %v2296_v8 = vsel %vm1372_vm13, %v1950_v42, %v1371_v47 }
 0x4de   : > { %v1361_v37 = vsel %vm727_vm1, %v1357_v35, 0.0 }
 0x4df   : > { %1362 = vadd.xlane.f32.xlu2 %v1361_v37 }
 0x4e1   : > { %v1354_v38 = vpop.f32.mrf.mxu3 }
 0x4e2   : > { %v1355_v39 = vadd.f32 %v1910_v32, %v1354_v38  ;;  %v1914_v38 = vld [vmem:[%s639_s21] ss:$0 sm:$0xff] }
 0x4e4   : > { %v1358_v40 = vadd.f32 %v1355_v39, %v2163_v9 }
 0x4e6   : > { %v1364_v41 = vsel %vm727_vm1, %v1358_v40, 0.0 }
 0x4e7   : > { %1365 = vadd.xlane.f32.xlu0 %v1364_v41 }
 0x552   : > { %v1363_v49 = vpop.xlane.xlu2 %1362 }
 0x553   : > { %v1374_v50 = vmul.f32 %v2296_v8, %v1363_v49 }
 0x555   : > { %v1376_v51 = vsub.f32 %v1357_v35, %v1374_v50 }
 0x557   : > { %v1378_v9 = vmul.f32 %v1376_v51, %v1376_v51 }
 0x559   : > { %v1380_v52 = vsel %vm727_vm1, %v1378_v9, 0.0 }
 0x55a   : > { %v1366_v53 = vpop.xlane.xlu0 %1365  ;;  %1381 = vadd.xlane.f32.xlu1 %v1380_v52 }
 0x55b   : > { %v1375_v54 = vmul.f32 %v2296_v8, %v1366_v53 }
 0x55d   : > { %v1377_v55 = vsub.f32 %v1358_v40, %v1375_v54 }
 0x55f   : > { %v1379_v57 = vmul.f32 %v1377_v55, %v1377_v55 }
 0x561   : > { %v1383_v58 = vsel %vm727_vm1, %v1379_v57, 0.0 }
 0x562   : > { %1384 = vadd.xlane.f32.xlu2 %v1383_v58 }
 0x5cd   : > { %v1382_v60 = vpop.xlane.xlu1 %1381 }
 0x5ce   : > { %v1386_v61 = vmul.f32 %v1382_v60, %v2296_v8 }
 0x5d0   : > { %v1388_v62 = vadd.f32 1e-05, %v1386_v61 }
 0x5d2   : > { %1951 = vrsqrt.f32 %v1388_v62  ;;  %vm1396_vm15 = vweird.f32 %v1388_v62 }
 0x5d5   : > { %v1385_v1 = vpop.xlane.xlu2 %1384 }
 0x5d6   : > { %v1387_v56 = vmul.f32 %v1385_v1, %v2296_v8 }
 0x5d8   : > { %v1952_v2 = vpop.eup %1951  ;;  %v1389_v3 = vadd.f32 1e-05, %v1387_v56 }
 0x5d9   : > { %v1391_v4 = vmul.f32 %v1952_v2, %v1388_v62  ;;  %vm1397_vm14 = vweird.f32 %v1952_v2 }
 0x5da   : > { %1953 = vrsqrt.f32 %v1389_v3  ;;  %vm1398_vm0 = vmor %vm1396_vm15, %vm1397_vm14  ;;  %vm1406_vm3 = vweird.f32 %v1389_v3 }
 0x5db   : > { %v1392_v5 = vmul.f32 %v1952_v2, %v1391_v4 }
 0x5dd   : > { %v1393_v6 = vmul.f32 0.5, %v1392_v5 }
 0x5df   : > { %v1394_v7 = vsub.f32 1.5, %v1393_v6 }
 0x5e0   : > { %v1954_v10 = vpop.eup %1953 }
 0x5e1   : > { %v1395_v48 = vmul.f32 %v1952_v2, %v1394_v7  ;;  %v1401_v11 = vmul.f32 %v1954_v10, %v1389_v3  ;;  %vm1407_vm2 = vweird.f32 %v1954_v10  ;;  %v1915_v7 = vld [vmem:[%s648_s26] ss:$0 sm:$0xff] }
 0x5e2   : > { %vm1408_vm4 = vmor %vm1406_vm3, %vm1407_vm2 }
 0x5e3   : > { %v1402_v12 = vmul.f32 %v1954_v10, %v1401_v11  ;;  %v1399_v13 = vsel %vm1398_vm0, %v1952_v2, %v1395_v48  ;;  %v1916_v11 = vld [vmem:[%s651_s28] ss:$0 sm:$0xff] }
 0x5e4   : > { %v1410_v17 = vmul.f32 %v1399_v13, %v1376_v51 }
 0x5e5   : > { %v1403_v14 = vmul.f32 0.5, %v1402_v12 }
 0x5e6   : > { %v1415_v21 = vmul.f32 %v1911_v16, %v1410_v17 }
 0x5e7   : > { %v1404_v15 = vsub.f32 1.5, %v1403_v14 }
 0x5e8   : > { %v1420_v24 = vadd.f32 %v1912_v20, %v1415_v21 }
 0x5e9   : > { %v1405_v18 = vmul.f32 %v1954_v10, %v1404_v15 }
 0x5eb   : > { %v1409_v19 = vsel %vm1408_vm4, %v1954_v10, %v1405_v18 }
 0x5ec   : > { %v1411_v22 = vmul.f32 %v1409_v19, %v1377_v55 }
 0x5ee   : > { %v1416_v23 = vmul.f32 %v1911_v16, %v1411_v22 }
 0x5f0   : > { %v1421_v25 = vadd.f32 %v1912_v20, %v1416_v23 }
 0x5f2   : > { %v1427_v26 = vpack.c.bf16 %v1421_v25, %v1420_v24 }
 0x5f4   : > { %1847 = vmatmul.msk.bf16.vlgmr.msrb.gmra.mxu0 %vm727_vm1, %v1427_v26 }
 0x671   : > { %v1455_v43 = vpop.f32.mrf.mxu0 }
 0x672   : > { %v1456_v31 = vadd.f32 %v1913_v30, %v1455_v43 }
 0x674   : > { %v1460_v34 = vmax.f32 %v1456_v31, 0.0 }
 0x679   : > { %v1457_v32 = vpop.f32.mrf.mxu0 }
 0x67a   : > { %v1458_v33 = vadd.f32 %v1913_v30, %v1457_v32 }
 0x67c   : > { %v1461_v35 = vmax.f32 %v1458_v33, 0.0 }
 0x67e   : > { %v1471_v37 = vpack.c.bf16 %v1461_v35, %v1460_v34 }
 0x680   : > { %1864 = vmatmul.msk.bf16.vlgmr.msrb.gmra.mxu1 %vm1499_vm5, %v1471_v37 }
 0x6fd   : > { %v1512_v39 = vpop.f32.mrf.mxu1 }
 0x6fe   : > { %v1513_v40 = vadd.f32 %v1914_v38, %v1512_v39 }
 0x700   : > { %v1517_v41 = vadd.f32 %v1513_v40, %v1420_v24 }
 0x702   : > { %v1521_v36 = vsel %vm727_vm1, %v1517_v41, 0.0 }
 0x703   : > { %1522 = vadd.xlane.f32.xlu0 %v1521_v36 }
 0x705   : > { %v1514_v42 = vpop.f32.mrf.mxu1 }
 0x706   : > { %v1515_v44 = vadd.f32 %v1914_v38, %v1514_v42 }
 0x708   : > { %v1518_v45 = vadd.f32 %v1515_v44, %v1421_v25 }
 0x70a   : > { %v1524_v46 = vsel %vm727_vm1, %v1518_v45, 0.0 }
 0x70b   : > { %1525 = vadd.xlane.f32.xlu2 %v1524_v46 }
 0x776   : > { %v1523_v47 = vpop.xlane.xlu0 %1522 }
 0x777   : > { %v1527_v49 = vmul.f32 %v1523_v47, %v2296_v8 }
 0x779   : > { %v1529_v50 = vsub.f32 %v1517_v41, %v1527_v49 }
 0x77b   : > { %v1531_v51 = vmul.f32 %v1529_v50, %v1529_v50 }
 0x77d   : > { %v1533_v9 = vsel %vm727_vm1, %v1531_v51, 0.0 }
 0x77e   : > { %v1526_v52 = vpop.xlane.xlu2 %1525  ;;  %1534 = vadd.xlane.f32.xlu0 %v1533_v9 }
 0x77f   : > { %v1528_v53 = vmul.f32 %v1526_v52, %v2296_v8 }
 0x781   : > { %v1530_v54 = vsub.f32 %v1518_v45, %v1528_v53 }
 0x783   : > { %v1532_v55 = vmul.f32 %v1530_v54, %v1530_v54 }
 0x785   : > { %v1536_v57 = vsel %vm727_vm1, %v1532_v55, 0.0 }
 0x786   : > { %1537 = vadd.xlane.f32.xlu1 %v1536_v57 }
 0x7f1   : > { %v1535_v58 = vpop.xlane.xlu0 %1534 }
 0x7f2   : > { %v1539_v59 = vmul.f32 %v1535_v58, %v2296_v8 }
 0x7f4   : > { %v1541_v60 = vadd.f32 1e-05, %v1539_v59 }
 0x7f6   : > { %1955 = vrsqrt.f32 %v1541_v60  ;;  %vm1549_vm7 = vweird.f32 %v1541_v60 }
 0x7f9   : > { %v1538_v61 = vpop.xlane.xlu1 %1537 }
 0x7fa   : > { %v1540_v62 = vmul.f32 %v1538_v61, %v2296_v8 }
 0x7fc   : > { %v1956_v63 = vpop.eup %1955  ;;  %v1542_v0 = vadd.f32 1e-05, %v1540_v62 }
 0x7fd   : > { %v1544_v1 = vmul.f32 %v1956_v63, %v1541_v60  ;;  %vm1550_vm6 = vweird.f32 %v1956_v63 }
 0x7fe   : > { %1957 = vrsqrt.f32 %v1542_v0  ;;  %vm1551_vm8 = vmor %vm1549_vm7, %vm1550_vm6  ;;  %vm1559_vm10 = vweird.f32 %v1542_v0 }
 0x7ff   : > { %v1545_v56 = vmul.f32 %v1956_v63, %v1544_v1 }
 0x801   : > { %v1546_v2 = vmul.f32 0.5, %v1545_v56 }
 0x803   : > { %v1547_v3 = vsub.f32 1.5, %v1546_v2 }
 0x804   : > { %v1958_v4 = vpop.eup %1957 }
 0x805   : > { %v1548_v5 = vmul.f32 %v1956_v63, %v1547_v3  ;;  %v1554_v6 = vmul.f32 %v1958_v4, %v1542_v0  ;;  %vm1560_vm9 = vweird.f32 %v1958_v4 }
 0x806   : > { %vm1561_vm11 = vmor %vm1559_vm10, %vm1560_vm9 }
 0x807   : > { %v1552_v10 = vsel %vm1551_vm8, %v1956_v63, %v1548_v5  ;;  %v1555_v48 = vmul.f32 %v1958_v4, %v1554_v6 }
 0x808   : > { %v1563_v12 = vmul.f32 %v1552_v10, %v1529_v50 }
 0x809   : > { %v1556_v13 = vmul.f32 0.5, %v1555_v48 }
 0x80a   : > { %v1568_v14 = vmul.f32 %v1915_v7, %v1563_v12 }
 0x80b   : > { %v1557_v15 = vsub.f32 1.5, %v1556_v13 }
 0x80c   : > { %v1573_v16 = vadd.f32 %v1916_v11, %v1568_v14 }
 0x80d   : > { %v1558_v17 = vmul.f32 %v1958_v4, %v1557_v15 }
 0x80e   : > { %1575 = vst.msk [vmem:[%s2416_s27] sm:$0xff] %vm727_vm1, %v1573_v16 }
 0x80f   : > { %v1562_v18 = vsel %vm1561_vm11, %v1958_v4, %v1558_v17 }
 0x810   : > { %v1564_v19 = vmul.f32 %v1562_v18, %v1530_v54 }
 0x812   : > { %v1569_v20 = vmul.f32 %v1915_v7, %v1564_v19  ;;  %1580 = sbr.rel (%p1865_p5) target bundleno = 2348 (0x92c), region = 88 }
 0x814   : > { %v1574_v21 = vadd.f32 %v1916_v11, %v1569_v20 }
 0x816   : > { %1576 = vst.msk [vmem:[%s2416_s27 + $0x8] sm:$0xff] %vm727_vm1, %v1574_v21  ;;  %s2421_s27 = sld [smem:[#allocation8_spill]] (!%p1865_p5) }
 0x817   : > { %v1583_v22 = vsel %vm727_vm1, %v1573_v16, 0.0  ;;  %v1586_v23 = vsel %vm727_vm1, %v1574_v21, 0.0  ;;  %v1960_v9 = vld [vmem:[%s2422_s14] ss:$0 sm:$0xff] }
 0x818   : > { %1584 = vadd.xlane.f32.xlu0 %v1583_v22 }
 0x81c   : > { %v1959_v49 = vld [vmem:[%s2421_s27] ss:$0 sm:$0xff] }
 0x820   : > { %1587 = vadd.xlane.f32.xlu0 %v1586_v23 }
 0x88b   : > { %v1585_v24 = vpop.xlane.xlu0 %1584 }
 0x88c   : > { %v1589_v25 = vmul.f32 %v1585_v24, %v2296_v8 }
 0x88e   : > { %v1591_v26 = vsub.f32 %v1573_v16, %v1589_v25 }
 0x890   : > { %v1593_v27 = vmul.f32 %v1591_v26, %v1591_v26 }
 0x892   : > { %v1595_v28 = vsel %vm727_vm1, %v1593_v27, 0.0 }
 0x893   : > { %1596 = vadd.xlane.f32.xlu1 %v1595_v28  ;;  %v1588_v29 = vpop.xlane.xlu0 %1587 }
 0x894   : > { %v1590_v43 = vmul.f32 %v1588_v29, %v2296_v8 }
 0x896   : > { %v1592_v30 = vsub.f32 %v1574_v21, %v1590_v43 }
 0x898   : > { %v1594_v31 = vmul.f32 %v1592_v30, %v1592_v30 }
 0x89a   : > { %v1598_v32 = vsel %vm727_vm1, %v1594_v31, 0.0 }
 0x89b   : > { %1599 = vadd.xlane.f32.xlu1 %v1598_v32 }
 0x906   : > { %v1597_v33 = vpop.xlane.xlu1 %1596 }
 0x907   : > { %v1601_v34 = vmul.f32 %v1597_v33, %v2296_v8 }
 0x909   : > { %v1603_v35 = vadd.f32 1e-05, %v1601_v34 }
 0x90b   : > { %1961 = vrsqrt.f32 %v1603_v35  ;;  %vm1611_vm13 = vweird.f32 %v1603_v35 }
 0x90e   : > { %v1600_v37 = vpop.xlane.xlu1 %1599 }
 0x90f   : > { %v1602_v38 = vmul.f32 %v1600_v37, %v2296_v8 }
 0x911   : > { %v1962_v39 = vpop.eup %1961  ;;  %v1604_v40 = vadd.f32 1e-05, %v1602_v38 }
 0x912   : > { %v1606_v41 = vmul.f32 %v1962_v39, %v1603_v35  ;;  %vm1612_vm12 = vweird.f32 %v1962_v39 }
 0x913   : > { %1963 = vrsqrt.f32 %v1604_v40  ;;  %vm1613_vm14 = vmor %vm1611_vm13, %vm1612_vm12  ;;  %vm1621_vm0 = vweird.f32 %v1604_v40 }
 0x914   : > { %v1607_v36 = vmul.f32 %v1962_v39, %v1606_v41 }
 0x916   : > { %v1608_v42 = vmul.f32 0.5, %v1607_v36 }
 0x918   : > { %v1609_v44 = vsub.f32 1.5, %v1608_v42 }
 0x919   : > { %v1964_v45 = vpop.eup %1963 }
 0x91a   : > { %v1610_v46 = vmul.f32 %v1962_v39, %v1609_v44  ;;  %v1616_v47 = vmul.f32 %v1964_v45, %v1604_v40  ;;  %vm1622_vm15 = vweird.f32 %v1964_v45 }
 0x91b   : > { %vm1623_vm2 = vmor %vm1621_vm0, %vm1622_vm15 }
 0x91c   : > { %v1614_v50 = vsel %vm1613_vm14, %v1962_v39, %v1610_v46  ;;  %v1617_v51 = vmul.f32 %v1964_v45, %v1616_v47 }
 0x91d   : > { %v1625_v8 = vmul.f32 %v1614_v50, %v1591_v26 }
 0x91e   : > { %v1618_v52 = vmul.f32 0.5, %v1617_v51 }
 0x91f   : > { %v1630_v53 = vmul.f32 %v1959_v49, %v1625_v8 }
 0x920   : > { %v1619_v54 = vsub.f32 1.5, %v1618_v52 }
 0x921   : > { %v1635_v55 = vadd.f32 %v1960_v9, %v1630_v53 }
 0x922   : > { %v1620_v57 = vmul.f32 %v1964_v45, %v1619_v54 }
 0x923   : > { %1637 = vst.msk [vmem:[%s2423_s16] sm:$0xff] %vm727_vm1, %v1635_v55 }
 0x924   : > { %v1624_v58 = vsel %vm1623_vm2, %v1964_v45, %v1620_v57 }
 0x925   : > { %v1626_v59 = vmul.f32 %v1624_v58, %v1592_v30 }
 0x927   : > { %v1631_v60 = vmul.f32 %v1959_v49, %v1626_v59 }
 0x929   : > { %v1636_v61 = vadd.f32 %v1960_v9, %v1631_v60 }
 0x92b   : > { %1638 = vst.msk [vmem:[%s2423_s16 + $0x8] sm:$0xff] %vm727_vm1, %v1636_v61 }
 0x92c PF: > { %s2424_s3 = sld [smem:[#allocation3_spill]] }
 0x932   : > { %s25_s18 = sadd.s32 1, %s2424_s3  }
 0x933   : > { %p22_p6 = scmp.ge.s32.totalorder %s25_s18, 4  }
 0x935   :  { %24 = sbr.rel (!%p22_p6) target bundleno = 8 (0x8), region = 147 }

// kernel: conv_transformer_forward.3
= control target key start
LH: loop header
LB: loop body
LE: loop exit
PB: predicated region body
PF: predicated region fallthrough
CT: control target
= control target key end

     0   :  { %s4256_s0 = inlined_call_operand.vmem [shape: f32[16,32], index: 0, kind: input, shape index: {}]   ;;  %s4257_s1 = inlined_call_operand.vmem [shape: f32[16,32], index: 1, kind: input, shape index: {}]   ;;  %s4258_s2 = inlined_call_operand.vmem [shape: bf16[2,96,96], index: 2, kind: input, shape index: {}]   ;;  %s4259_s3 = inlined_call_operand.vmem [shape: f32[2,1,96], index: 3, kind: input, shape index: {}]   ;;  %s4260_s4 = inlined_call_operand.vmem [shape: bf16[2,32,32], index: 4, kind: input, shape index: {}]   ;;  %s4261_s5 = inlined_call_operand.vmem [shape: f32[2,1,32], index: 5, kind: input, shape index: {}]   ;;  %s4262_s6 = inlined_call_operand.vmem [shape: bf16[2,96,32], index: 6, kind: input, shape index: {}]   ;;  %s4263_s7 = inlined_call_operand.vmem [shape: f32[2,1,32], index: 7, kind: input, shape index: {}]   ;;  %s4264_s8 = inlined_call_operand.vmem [shape: bf16[2,96,64], index: 8, kind: input, shape index: {}]   ;;  %s4265_s9 = inlined_call_operand.vmem [shape: f32[2,1,64], index: 9, kind: input, shape index: {}]   ;;  %s4266_s10 = inlined_call_operand.vmem [shape: bf16[2,32,32], index: 10, kind: input, shape index: {}]   ;;  %s4267_s11 = inlined_call_operand.vmem [shape: f32[2,1,32], index: 11, kind: input, shape index: {}]   ;;  %s4268_s12 = inlined_call_operand.vmem [shape: bf16[2,32,64], index: 12, kind: input, shape index: {}]   ;;  %s4269_s13 = inlined_call_operand.vmem [shape: f32[2,1,64], index: 13, kind: input, shape index: {}]   ;;  %s4270_s14 = inlined_call_operand.vmem [shape: bf16[2,64,32], index: 14, kind: input, shape index: {}]   ;;  %s4271_s15 = inlined_call_operand.vmem [shape: f32[2,1,32], index: 15, kind: input, shape index: {}]   ;;  %s4272_s16 = inlined_call_operand.vmem [shape: f32[2,1,32], index: 16, kind: input, shape index: {}]   ;;  %s4273_s17 = inlined_call_operand.vmem [shape: f32[2,1,32], index: 17, kind: input, shape index: {}]   ;;  %s4274_s18 = inlined_call_operand.vmem [shape: f32[2,1,32], index: 18, kind: input, shape index: {}]   ;;  %s4275_s19 = inlined_call_operand.vmem [shape: f32[2,1,32], index: 19, kind: input, shape index: {}]   ;;  %s4276_s20 = inlined_call_operand.vmem [shape: f32[2,1,32], index: 20, kind: input, shape index: {}]   ;;  %s4277_s21 = inlined_call_operand.vmem [shape: f32[2,1,32], index: 21, kind: input, shape index: {}]   ;;  %s4278_s22 = inlined_call_operand.vmem [shape: f32[1,32], index: 22, kind: input, shape index: {}]   ;;  %s4279_s23 = inlined_call_operand.vmem [shape: f32[1,32], index: 23, kind: input, shape index: {}]   ;;  %s4280_s24 = inlined_call_operand.hbm [shape: f32[16,32], index: 24, kind: output, shape index: {}]  }
   0x1   :  { %4287 = sst [smem:[#allocation10_spill]] %s4256_s0 }
   0x2   :  { %4288 = sst [smem:[#allocation11_spill]] %s4257_s1 }
   0x3   :  { %4289 = sst [smem:[#allocation12_spill]] %s4258_s2 }
   0x4   :  { %4290 = sst [smem:[#allocation13_spill]] %s4259_s3 }
   0x5   :  { %4291 = sst [smem:[#allocation14_spill]] %s4260_s4 }
   0x6   :  { %4292 = sst [smem:[#allocation15_spill]] %s4261_s5 }
   0x7   :  { %4293 = sst [smem:[#allocation16_spill]] %s4262_s6 }
   0x8   :  { %4294 = sst [smem:[#allocation17_spill]] %s4263_s7 }
   0x9   :  { %4295 = sst [smem:[#allocation18_spill]] %s4264_s8 }
   0xa   :  { %4296 = sst [smem:[#allocation19_spill]] %s4266_s10 }
   0xb   :  { %4297 = sst [smem:[#allocation20_spill]] %s4268_s12 }
   0xc   :  { %4298 = sst [smem:[#allocation21_spill]] %s4270_s14 }
   0xd   :  { %4299 = sst [smem:[#allocation22_spill]] %s4271_s15 }
   0xe   :  { %4300 = sst [smem:[#allocation23_spill]] %s4276_s20 }
   0xf   :  { %4301 = sst [smem:[#allocation24_spill]] %s4277_s21 }
  0x10   :  { %4302 = sst [smem:[#allocation25_spill]] %s4278_s22 }
  0x11   :  { %4303 = sst [smem:[#allocation26_spill]] %s4279_s23 }
  0x12   :  { %4304 = sst [smem:[#allocation27_spill]] %s4280_s24 }
  0x13   :  { %29 = vsyncpa [#allocation4], 0  ;;  %s3627_s5 = smov 0  }
  0x14 LB: > { %4305 = sst [smem:[#allocation6_spill]] %s3482_s5  ;;  %s3633_s26 = sadd.s32 4294967295, %s3482_s5   ;;  %s3482_s5 = sphi %s3627_s5, %s35_s5  }
  0x15   : > { %4306 = sst [smem:[#allocation7_spill]] %s3633_s26  ;;  %p3107_p0 = scmp.ge.s32.totalorder %s3482_s5, 1 }
  0x16   : > { %p822_p1 = scmp.lt.s32.totalorder %s3482_s5, 3 }
  0x18   : > { %p823_p2 = pnand %p3107_p0, %p822_p1 }
  0x1a   : > { %826 = sbr.rel (%p823_p2) target bundleno = 3802 (0xeda), region = 116 }
  0x1f   : > { %p952_p3 = scmp.lt.s32.totalorder %s3633_s26, 1  ;;  %s4309_s5 = sld [smem:[#allocation12_spill]] }
  0x20   : > { %s4313_s29 = sld [smem:[#allocation16_spill]] }
  0x21   : > { %s3639_s27 = scalar_select %p952_p3, %s3633_s26, 1 }
  0x22   : > { %s4311_s26 = sld [smem:[#allocation14_spill]] }
  0x23   : > { %s3314_s28 = smul.u32 48, %s3639_s27  ;;  %s3282_s7 = sshll.u32 %s3639_s27, 4 }
  0x24   : > { %s4315_s8 = sld [smem:[#allocation18_spill]]  ;;  %s1016_s1 = scalar_lea.vmem %s4274_s18, %s3639_s27 }
  0x25   : > { %s3654_s24 = scalar_lea.vmem %s4309_s5, %s3314_s28  ;;  %s4316_s10 = sld [smem:[#allocation19_spill]] }
  0x26   : > { %4310 = sst [smem:[#allocation8_spill]] %s3654_s24  ;;  %s3664_s0 = scalar_lea.vmem %s4313_s29, %s3314_s28 }
  0x27   : > { %s4317_s12 = sld [smem:[#allocation20_spill]]  ;;  %s3285_s5 = sshll.u32 %s3639_s27, 5 }
  0x28   : > { %s3659_s21 = scalar_lea.vmem %s4311_s26, %s3282_s7  ;;  %s4319_s14 = sld [smem:[#allocation21_spill]] }
  0x29   : > { %4312 = sst [smem:[#allocation9_spill]] %s3659_s21 }
  0x2a   : > { %s3673_s24 = scalar_lea.vmem %s4315_s8, %s3314_s28  ;;  %s4322_s3 = sld [smem:[#allocation7_spill]] }
  0x2b   : > { %s3682_s6 = scalar_lea.vmem %s4316_s10, %s3282_s7 }
  0x2d   : > { %s3691_s4 = scalar_lea.vmem %s4317_s12, %s3282_s7 }
  0x2e   : > { %s3705_s10 = scalar_lea.vmem %s4319_s14, %s3285_s5 }
  0x30   : > { %p3119_p4 = scmp.ne.s32.totalorder %s4322_s3, 0 }
  0x31   : > { %s4323_s30 = sld [smem:[#allocation10_spill]] (!%p3119_p4) }
  0x32   : > { %1030 = sbr.rel (%p3119_p4) target bundleno = 58 (0x3a), region = 120 }
  0x37   : > { %v1031_v0 = vld [vmem:[%s4323_s30] sm:$0xff]  ;;  %vm1033_vm0 = vcmask 261120   ;;  %v1032_v1 = vld [vmem:[%s4323_s30 + $0x8] sm:$0xff] }
  0x38   : > { %1034 = vst.msk [vmem:[#allocation3] sm:$0xff] %vm1033_vm0, %v1031_v0 }
  0x39   : > { %1035 = vst.msk [vmem:[#allocation3 + $0x8] sm:$0xff] %vm1033_vm0, %v1032_v1 }
  0x3a PF: > { %s4324_s12 = sld [smem:[#allocation8_spill]]  ;;  %v1053_v5 = vlaneseq  ;;  %vm1103_vm1 = vcmask 261120   ;;  %s3484_s22 = smov 120   ;;  %vm1212_vm8 = vcmask 64512   ;;  %vm1289_vm10 = vcmask 1043456  }
  0x3b   : > { %s4333_s20 = sld [smem:[#allocation13_spill]]  ;;  %s3485_s26 = smov 88   ;;  %vm1453_vm11 = vcmask 130112   ;;  %vm1580_vm12 = vcmask 195712   ;;  %vm1707_vm13 = vcmask 261312  }
  0x3c   : > { %v3748_v10 = vshrl.u32 %v1053_v5, 7  ;;  %s3486_s5 = smov 96   ;;  %s3487_s2 = smov 112  }
  0x3d   : > { %s3488_s7 = smov 80   ;;  %s3489_s25 = smov 72  }
  0x3e   : > { %v1055_v14 = vadd.s32 8, %v3748_v10  ;;  %v1060_v15 = vand.u32 7, %v3748_v10  ;;  %vm1082_vm2 = vcmp.lt.s32.totalorder %v3748_v10, 1  ;;  %vm1152_vm4 = vcmp.lt.s32.totalorder %v3748_v10, 7  ;;  %s3490_s28 = smov 104   ;;  %s3492_s8 = smov 64  }
  0x3f   : > { %v3743_v8 = vld [vmem:[#allocation3] sm:$0xff]  ;;  %s3494_s14 = smov 48   ;;  %s3495_s15 = smov 40  }
  0x40   : > { %v3289_v2 = vld [vmem:[%s4324_s12 + $0x18] sm:$0xff]  ;;  %v3287_v3 = vld [vmem:[%s4324_s12 + $0x8] sm:$0xff]  ;;  %v3288_v6 = vld [vmem:[%s4324_s12 + $0x10] sm:$0xff]  ;;  %v1080_v12 = vrot.slane %v3743_v8, 7  ;;  %v1150_v18 = vrot.slane %v3743_v8, 1  ;;  %v1067_v20 = vand.u32 7, %v1055_v14  ;;  %s4340_s23 = scalar_lea.vmem %s4273_s17, %s3639_s27 }
  0x41   : > { %v3291_v4 = vld [vmem:[%s4324_s12 + $0x28] sm:$0xff]  ;;  %1113 = vmatpush.bf16.msra.mxu0 %v3289_v2  ;;  %1142 = vmatpush.bf16.msra.mxu1 %v3287_v3  ;;  %v3286_v7 = vld [vmem:[%s4324_s12] sm:$0xff]  ;;  %v3745_v9 = vld [vmem:[#allocation3 + $0x8] sm:$0xff]  ;;  %vm3764_vm3 = vcmp.ge.s32.totalorder %v1060_v15, 1  ;;  %vm3771_vm5 = vcmp.lt.s32.totalorder %v1060_v15, 7  ;;  %s4334_s3 = scalar_lea.vmem %s4333_s20, %s3639_s27  ;;  %v1204_v15 = vand.u32 127, %v1053_v5 }
  0x42   : > { %1181 = vmatpush.bf16.msra.mxu2 %v3291_v4  ;;  %v3290_v11 = vld [vmem:[%s4324_s12 + $0x20] sm:$0xff]  ;;  %v1081_v13 = vrot.slane %v3745_v9, 7  ;;  %v1090_v16 = vpack.c.bf16 %v3745_v9, %v3743_v8  ;;  %v1151_v19 = vrot.slane %v3745_v9, 1  ;;  %vm3775_vm6 = vcmp.ge.s32.totalorder %v1067_v20, 1  ;;  %s3493_s12 = smov 56   ;;  %s3496_s20 = smov 8  }
  0x43   : > { %vm3783_vm7 = vcmp.lt.s32.totalorder %v1067_v20, 7  ;;  %v3347_v37 = vld [vmem:[%s4334_s3] ss:$0 sm:$0xff]  ;;  %vm1205_vm9 = vcmp.le.s32.totalorder %v1204_v15, %v3748_v10  ;;  %s3497_s3 = smov 16   ;;  %s4336_s29 = sld [smem:[#allocation15_spill]] }
  0x44   : > { %v1084_v17 = vsel %vm1082_vm2, %v1081_v13, %v1080_v12  ;;  %v1083_v21 = vsel %vm1082_vm2, %v1080_v12, %v1081_v13  ;;  %v1153_v26 = vsel %vm1152_vm4, %v1150_v18, %v1151_v19  ;;  %v1154_v27 = vsel %vm1152_vm4, %v1151_v19, %v1150_v18 }
  0x45   : > { %1114 = vmatpush.bf16.msra.mxu0 %v3288_v6  ;;  %1143 = vmatpush.bf16.msra.mxu1 %v3286_v7  ;;  %v1087_v23 = vsel %vm3764_vm3, %v1084_v17, 0.0  ;;  %v1088_v29 = vsel %vm3775_vm6, %v1083_v21, 0.0  ;;  %v1157_v30 = vsel %vm3771_vm5, %v1153_v26, 0.0  ;;  %v1158_v31 = vsel %vm3783_vm7, %v1154_v27, 0.0 }
  0x46   : > { %1182 = vmatpush.bf16.msra.mxu2 %v3290_v11  ;;  %v1089_v32 = vpack.c.bf16 %v1088_v29, %v1087_v23  ;;  %v1159_v33 = vpack.c.bf16 %v1158_v31, %v1157_v30  ;;  %v3491_v17 = vmov -1e+30  }
  0x47   : > { %v1206_v18 = vsel %vm1205_vm9, 0.0, %v3491_v17 }
  0x48   : > { %3128 = vmatmul.msk.bf16.vlgmr.msra.gmra.mxu0 %vm1103_vm1, %v1090_v16  ;;  %3137 = vmatmul.msk.bf16.vlgmr.msra.gmra.mxu1 %vm1103_vm1, %v1089_v32 }
  0x49   : > { %3146 = vmatmul.msk.bf16.vlgmr.msra.gmra.mxu2 %vm1103_vm1, %v1159_v33  ;;  %s4337_s21 = scalar_lea.vmem %s4336_s29, %s3639_s27  ;;  %s4339_s29 = scalar_lea.vmem %s4272_s16, %s3639_s27 }
  0xc5   : > { %v1145_v34 = vpop.f32.mrf.mxu1  ;;  %v1116_v35 = vpop.f32.mrf.mxu0 }
  0xc6   : > { %v1146_v36 = vadd.f32 %v1145_v34, %v1116_v35 }
  0xcc   : > { %v1184_v38 = vpop.f32.mrf.mxu2 }
  0xcd   : > { %v1189_v39 = vadd.f32 %v1184_v38, %v1146_v36  ;;  %v1147_v41 = vpop.f32.mrf.mxu1  ;;  %v1118_v43 = vpop.f32.mrf.mxu0 }
  0xce   : > { %v1148_v45 = vadd.f32 %v1147_v41, %v1118_v43 }
  0xcf   : > { %v1194_v40 = vadd.f32 %v3347_v37, %v1189_v39 }
  0xd1   : > { %v1201_v42 = vpack.c.bf16 %v1194_v40, %v1194_v40 }
  0xd3   : > { %v1208_v44 = vunpack.c.l.b16 %v1201_v42 }
  0xd4   : > { %v1186_v46 = vpop.f32.mrf.mxu2 }
  0xd5   : > { %v3801_v47 = vpack.c.b16 %v1208_v44, %v1208_v44  ;;  %v1190_v48 = vadd.f32 %v1186_v46, %v1148_v45 }
  0xd7   : > { %v1195_v49 = vadd.f32 %v3347_v37, %v1190_v48  ;;  %1329 = vrot.lane.b32.xlu2 %v3801_v47, %s3484_s22  ;;  %1331 = vrot.lane.b32.xlu1 %v3801_v47, %s3485_s26 }
  0xd8   : > { %1210 = vrot.lane.b32.xlu0 %v3801_v47, %s3486_s5 }
  0xd9   : > { %v1202_v50 = vpack.c.bf16 %v1195_v49, %v1195_v49 }
  0xdb   : > { %v1233_v51 = vunpack.c.l.b16 %v1202_v50 }
  0xdd   : > { %v3809_v52 = vpack.c.b16 %v1233_v51, %v1233_v51 }
  0xdf   : > { %1352 = vrot.lane.b32.xlu2 %v3809_v52, %s3484_s22  ;;  %1354 = vrot.lane.b32.xlu1 %v3809_v52, %s3485_s26 }
  0xe0   : > { %1235 = vrot.lane.b32.xlu0 %v3809_v52, %s3486_s5 }
  0xe7   : > { %1456 = vrot.lane.b32.xlu2 %v3801_v47, %s3487_s2  ;;  %1481 = vrot.lane.b32.xlu1 %v3809_v52, %s3488_s7 }
  0xe8   : > { %1458 = vrot.lane.b32.xlu0 %v3801_v47, %s3488_s7 }
  0xef   : > { %1608 = vrot.lane.b32.xlu2 %v3809_v52, %s3489_s25  ;;  %1585 = vrot.lane.b32.xlu1 %v3801_v47, %s3489_s25 }
  0xf0   : > { %1479 = vrot.lane.b32.xlu0 %v3809_v52, %s3487_s2 }
  0xf7   : > { %1606 = vrot.lane.b32.xlu1 %v3809_v52, %s3490_s28 }
  0xf8   : > { %1583 = vrot.lane.b32.xlu0 %v3801_v47, %s3490_s28 }
 0x131   : > { %v1330_v54 = vpop.permute.xlu2 %1329 }
 0x139   : > { %v1353_v62 = vpop.permute.xlu2 %1352 }
 0x141   : > { %v1457_v3 = vpop.permute.xlu2 %1456 }
 0x149   : > { %v1332_v53 = vpop.permute.xlu1 %1331  ;;  %v1609_v7 = vpop.permute.xlu2 %1608 }
 0x14a   : > { %v1211_v55 = vpop.permute.xlu0 %1210  ;;  %v1337_v56 = vsel %vm1212_vm8, %v1332_v53, 0  ;;  %v1614_v11 = vsel %vm1212_vm8, %v1609_v7, 0 }
 0x14b   : > { %v1217_v57 = vsel %vm1212_vm8, %v1211_v55, 0 }
 0x14c   : > { %1226 = vmatpush.bf16.xpose.msra.mxu3 %v1217_v57 }
 0x151   : > { %v1355_v58 = vpop.permute.xlu1 %1354 }
 0x152   : > { %v1360_v59 = vsel %vm1212_vm8, %v1355_v58, 0  ;;  %v1236_v60 = vpop.permute.xlu0 %1235 }
 0x153   : > { %3147 = vmatmul.msk.bf16.vlgmr.msra.gmra.mxu3 %vm1212_vm8, %v1201_v42  ;;  %v1241_v61 = vsel %vm1212_vm8, %v1236_v60, 0 }
 0x154   : > { %1346 = vmatpush.bf16.xpose.msrb.mxu3 %v1337_v56  ;;  %1250 = vmatpush.bf16.xpose.msrb.mxu0 %v1241_v61 }
 0x159   : > { %v1482_v63 = vpop.permute.xlu1 %1481 }
 0x15a   : > { %v1487_v0 = vsel %vm1212_vm8, %v1482_v63, 0  ;;  %v1459_v1 = vpop.permute.xlu0 %1458 }
 0x15b   : > { %v1464_v2 = vsel %vm1212_vm8, %v1459_v1, 0  ;;  %3148 = vmatmul.msk.bf16.vlgmr.msrb.gmra.mxu0 %vm1212_vm8, %v1202_v50 }
 0x15c   : > { %1369 = vmatpush.bf16.xpose.msra.mxu0 %v1360_v59  ;;  %1473 = vmatpush.bf16.xpose.msra.mxu3 %v1464_v2 }
 0x161   : > { %v1586_v4 = vpop.permute.xlu1 %1585 }
 0x162   : > { %v1591_v6 = vsel %vm1212_vm8, %v1586_v4, 0  ;;  %v1480_v12 = vpop.permute.xlu0 %1479 }
 0x163   : > { %3151 = vmatmul.msk.bf16.vlgmr.msrb.gmra.mxu3 %vm1212_vm8, %v1330_v54 }
 0x164   : > { %1496 = vmatpush.bf16.xpose.msrb.mxu0 %v1487_v0  ;;  %1600 = vmatpush.bf16.xpose.msrb.mxu3 %v1591_v6 }
 0x169   : > { %v1607_v14 = vpop.permute.xlu1 %1606 }
 0x16a   : > { %v1584_v13 = vpop.permute.xlu0 %1583 }
 0x16b   : > { %3152 = vmatmul.msk.bf16.vlgmr.msra.gmra.mxu0 %vm1212_vm8, %v1353_v62 }
 0x16c   : > { %1623 = vmatpush.bf16.xpose.msra.mxu0 %v1614_v11 }
 0x173   : > { %3155 = vmatmul.msk.bf16.vlgmr.msra.gmra.mxu3 %vm1212_vm8, %v1457_v3 }
 0x17b   : > { %3156 = vmatmul.msk.bf16.vlgmr.msrb.gmra.mxu0 %vm1212_vm8, %v1480_v12 }
 0x183   : > { %3159 = vmatmul.msk.bf16.vlgmr.msrb.gmra.mxu3 %vm1212_vm8, %v1584_v13 }
 0x18b   : > { %3160 = vmatmul.msk.bf16.vlgmr.msra.gmra.mxu0 %vm1212_vm8, %v1607_v14 }
 0x1d6   : > { %v1228_v16 = vpop.f32.mrf.mxu3 }
 0x1d7   : > { %v1256_v19 = vmul.f32 0.35355338, %v1228_v16 }
 0x1d8   : > { %v1252_v20 = vpop.f32.mrf.mxu0 }
 0x1d9   : > { %v1257_v21 = vmul.f32 0.35355338, %v1252_v20  ;;  %v1258_v23 = vadd.f32 %v1256_v19, %v1206_v18 }
 0x1db   : > { %v1260_v26 = vsel %vm1212_vm8, %v1258_v23, -inf  ;;  %v1259_v27 = vadd.f32 %v1257_v21, %v1206_v18 }
 0x1dc   : > { %1261 = vmax.xlane.f32.xlu0 %v1260_v26 }
 0x1dd   : > { %v1263_v29 = vsel %vm1212_vm8, %v1259_v27, -inf }
 0x1de   : > { %v1230_v30 = vpop.f32.mrf.mxu3  ;;  %1264 = vmax.xlane.f32.xlu2 %v1263_v29 }
 0x1e0   : > { %v1254_v31 = vpop.f32.mrf.mxu0 }
 0x1e6   : > { %v1348_v32 = vpop.f32.mrf.mxu3 }
 0x1e7   : > { %v1375_v5 = vmul.f32 0.35355338, %v1348_v32 }
 0x1e8   : > { %v1371_v33 = vpop.f32.mrf.mxu0 }
 0x1e9   : > { %v1376_v34 = vmul.f32 0.35355338, %v1371_v33  ;;  %v3853_v35 = vadd.f32 %v1375_v5, %v1206_v18 }
 0x1eb   : > { %v1379_v36 = vsel %vm1212_vm8, %v3853_v35, -inf  ;;  %v3857_v37 = vadd.f32 %v1376_v34, %v1206_v18 }
 0x1ec   : > { %1380 = vmax.xlane.f32.xlu2 %v1379_v36 }
 0x1ed   : > { %v1382_v38 = vsel %vm1212_vm8, %v3857_v37, -inf }
 0x1ee   : > { %v1350_v39 = vpop.f32.mrf.mxu3  ;;  %1383 = vmax.xlane.f32.xlu1 %v1382_v38 }
 0x1f0   : > { %v1373_v40 = vpop.f32.mrf.mxu0 }
 0x1f6   : > { %v1475_v41 = vpop.f32.mrf.mxu3 }
 0x1f7   : > { %v1502_v42 = vmul.f32 0.35355338, %v1475_v41 }
 0x1f8   : > { %v1498_v43 = vpop.f32.mrf.mxu0 }
 0x1f9   : > { %v1503_v44 = vmul.f32 0.35355338, %v1498_v43  ;;  %v1504_v45 = vadd.f32 %v1502_v42, %v1206_v18 }
 0x1fb   : > { %v1506_v46 = vsel %vm1212_vm8, %v1504_v45, -inf  ;;  %v1505_v48 = vadd.f32 %v1503_v44, %v1206_v18 }
 0x1fc   : > { %1507 = vmax.xlane.f32.xlu0 %v1506_v46 }
 0x1fd   : > { %v1509_v49 = vsel %vm1212_vm8, %v1505_v48, -inf }
 0x1fe   : > { %v1477_v50 = vpop.f32.mrf.mxu3  ;;  %1510 = vmax.xlane.f32.xlu2 %v1509_v49 }
 0x200   : > { %v1500_v51 = vpop.f32.mrf.mxu0 }
 0x206   : > { %v1602_v53 = vpop.f32.mrf.mxu3 }
 0x207   : > { %v1629_v54 = vmul.f32 0.35355338, %v1602_v53 }
 0x208   : > { %v1625_v55 = vpop.f32.mrf.mxu0 }
 0x209   : > { %v1630_v56 = vmul.f32 0.35355338, %v1625_v55  ;;  %v1631_v57 = vadd.f32 %v1629_v54, %v1206_v18 }
 0x20b   : > { %v1633_v58 = vsel %vm1212_vm8, %v1631_v57, -inf  ;;  %v3864_v59 = vadd.f32 %v1630_v56, %v1206_v18 }
 0x20c   : > { %1634 = vmax.xlane.f32.xlu0 %v1633_v58 }
 0x20d   : > { %v1636_v60 = vsel %vm1212_vm8, %v3864_v59, -inf }
 0x20e   : > { %1637 = vmax.xlane.f32.xlu1 %v1636_v60  ;;  %v1604_v61 = vpop.f32.mrf.mxu3 }
 0x210   : > { %v1627_v62 = vpop.f32.mrf.mxu0 }
 0x220   : > { %1284 = vrot.lane.b32.xlu0 %v3801_v47, %s3492_s8 }
 0x228   : > { %1403 = vrot.lane.b32.xlu0 %v3801_v47, %s3493_s12 }
 0x24f   : > { %v1262_v63 = vpop.xlane.xlu0 %1261 }
 0x250   : > { %v1266_v0 = vsub.f32 %v1258_v23, %v1262_v63 }
 0x251   : > { %v1265_v1 = vpop.xlane.xlu2 %1264 }
 0x252   : > { %v1268_v2 = vmul.f32 1.442695, %v1266_v0  ;;  %v1267_v3 = vsub.f32 %v1259_v27, %v1265_v1 }
 0x254   : > { %3360 = vpow2.f32 %v1268_v2  ;;  %v1270_v4 = vmul.f32 1.442695, %v1267_v3 }
 0x256   : > { %3362 = vpow2.f32 %v1270_v4 }
 0x25a   : > { %v3361_v6 = vpop.eup %3360 }
 0x25b   : > { %v1272_v7 = vsel %vm1212_vm8, %v3361_v6, 0.0 }
 0x25c   : > { %v3363_v11 = vpop.eup %3362  ;;  %1273 = vadd.xlane.f32.xlu1 %v1272_v7 }
 0x25d   : > { %v1275_v12 = vsel %vm1212_vm8, %v3363_v11, 0.0 }
 0x25e   : > { %1276 = vadd.xlane.f32.xlu2 %v1275_v12 }
 0x25f   : > { %v1381_v18 = vpop.xlane.xlu2 %1380 }
 0x260   : > { %v1385_v29 = vsub.f32 %v3853_v35, %v1381_v18 }
 0x261   : > { %v1384_v5 = vpop.xlane.xlu1 %1383 }
 0x262   : > { %v1387_v31 = vmul.f32 1.442695, %v1385_v29 }
 0x26f   : > { %v1508_v13 = vpop.xlane.xlu0 %1507 }
 0x270   : > { %v1512_v14 = vsub.f32 %v1504_v45, %v1508_v13 }
 0x271   : > { %v1511_v19 = vpop.xlane.xlu2 %1510 }
 0x272   : > { %v1514_v15 = vmul.f32 1.442695, %v1512_v14  ;;  %v1513_v21 = vsub.f32 %v1505_v48, %v1511_v19 }
 0x274   : > { %3364 = vpow2.f32 %v1514_v15  ;;  %v1516_v23 = vmul.f32 1.442695, %v1513_v21 }
 0x275   : > { %1424 = vrot.lane.b32.xlu1 %v3809_v52, %s3493_s12  ;;  %s4335_s12 = sld [smem:[#allocation9_spill]] }
 0x276   : > { %1306 = vrot.lane.b32.xlu2 %v3809_v52, %s3492_s8  ;;  %3366 = vpow2.f32 %v1516_v23  ;;  %s3498_s8 = smov 24  }
 0x277   : > { %3368 = vpow2.f32 %v1387_v31 }
 0x27a   : > { %v3874_v16 = vpop.eup %3364 }
 0x27b   : > { %v1518_v17 = vsel %vm1212_vm8, %v3874_v16, 0.0 }
 0x27c   : > { %1519 = vadd.xlane.f32.xlu0 %v1518_v17  ;;  %v3884_v34 = vpop.eup %3366 }
 0x27d   : > { %1551 = vrot.lane.b32.xlu1 %v3809_v52, %s3494_s14  ;;  %v1521_v38 = vsel %vm1212_vm8, %v3884_v34, 0.0  ;;  %v3369_v39 = vpop.eup %3368 }
 0x27e   : > { %v1391_v41 = vsel %vm1212_vm8, %v3369_v39, 0.0 }
 0x27f   : > { %v1635_v20 = vpop.xlane.xlu0 %1634 }
 0x280   : > { %v1639_v30 = vsub.f32 %v1631_v57, %v1635_v20 }
 0x281   : > { %v1638_v44 = vpop.xlane.xlu1 %1637 }
 0x282   : > { %v1641_v32 = vmul.f32 1.442695, %v1639_v30 }
 0x284   : > { %3370 = vpow2.f32 %v1641_v32 }
 0x28a   : > { %v3890_v40 = vpop.eup %3370 }
 0x28b   : > { %v1645_v42 = vsel %vm1212_vm8, %v3890_v40, 0.0 }
 0x290   : > { %1678 = vrot.lane.b32.xlu0 %v3809_v52, %s3495_s15  ;;  %v1386_v52 = vsub.f32 %v3857_v37, %v1384_v5 }
 0x292   : > { %v1285_v26 = vpop.permute.xlu0 %1284  ;;  %v1389_v35 = vmul.f32 1.442695, %v1386_v52 }
 0x293   : > { %v1291_v27 = vsel %vm1289_vm10, %v1285_v26, 0 }
 0x294   : > { %1300 = vmatpush.bf16.msrb.mxu1 %v1291_v27  ;;  %3372 = vpow2.f32 %v1389_v35 }
 0x29a   : > { %v1404_v33 = vpop.permute.xlu0 %1403  ;;  %v3373_v43 = vpop.eup %3372 }
 0x29b   : > { %v1409_v36 = vsel %vm1289_vm10, %v1404_v33, 0  ;;  %v1394_v37 = vsel %vm1212_vm8, %v3373_v43, 0.0 }
 0x29c   : > { %1418 = vmatpush.bf16.msra.mxu1 %v1409_v36 }
 0x29f   : > { %1522 = vadd.xlane.f32.xlu2 %v1521_v38 }
 0x2a7   : > { %1392 = vadd.xlane.f32.xlu1 %v1391_v41  ;;  %1646 = vadd.xlane.f32.xlu2 %v1645_v42 }
 0x2af   : > { %1395 = vadd.xlane.f32.xlu1 %v1394_v37 }
 0x2bf   : > { %1657 = vrot.lane.b32.xlu2 %v3801_v47, %s3495_s15  ;;  %s4343_s15 = scalar_lea.vmem %s4265_s9, %s3639_s27 }
 0x2c8   : > { %1530 = vrot.lane.b32.xlu1 %v3801_v47, %s3494_s14  ;;  %v1640_v47 = vsub.f32 %v3864_v59, %v1638_v44 }
 0x2ca   : > { %v1643_v57 = vmul.f32 1.442695, %v1640_v47 }
 0x2cf   : > { %v1274_v45 = vpop.xlane.xlu1 %1273 }
 0x2d0   : > { %3374 = vrcp.f32 %v1274_v45 }
 0x2d1   : > { %v1277_v46 = vpop.xlane.xlu2 %1276 }
 0x2d2   : > { %3376 = vrcp.f32 %v1277_v46 }
 0x2d3   : > { %3378 = vpow2.f32 %v1643_v57 }
 0x2d6   : > { %v3375_v48 = vpop.eup %3374 }
 0x2d7   : > { %v1280_v49 = vmul.f32 %v3375_v48, %v3361_v6 }
 0x2d8   : > { %v3377_v50 = vpop.eup %3376 }
 0x2d9   : > { %v1281_v51 = vmul.f32 %v3377_v50, %v3363_v11  ;;  %v1307_v53 = vpop.permute.xlu2 %1306  ;;  %v1282_v54 = vpack.c.bf16 %v1280_v49, %v1280_v49  ;;  %v3379_v61 = vpop.eup %3378 }
 0x2da   : > { %v1312_v55 = vsel %vm1289_vm10, %v1307_v53, 0  ;;  %v1648_v0 = vsel %vm1212_vm8, %v3379_v61, 0.0 }
 0x2db   : > { %3149 = vmatmul.msk.bf16.vlgmr.msrb.gmra.mxu1 %vm1212_vm8, %v1282_v54  ;;  %1321 = vmatpush.bf16.msrb.mxu2 %v1312_v55  ;;  %v1283_v56 = vpack.c.bf16 %v1281_v51, %v1281_v51 }
 0x2de   : > { %3150 = vmatmul.msk.bf16.vlgmr.msrb.gmra.mxu2 %vm1212_vm8, %v1283_v56 }
 0x2e7   : > { %v1425_v58 = vpop.permute.xlu1 %1424 }
 0x2e8   : > { %v1430_v60 = vsel %vm1289_vm10, %v1425_v58, 0  ;;  %v3293_v58 = vld [vmem:[%s4335_s12 + $0x8] sm:$0xff] }
 0x2e9   : > { %1439 = vmatpush.bf16.msra.mxu2 %v1430_v60  ;;  %1737 = vmatpush.bf16.msra.mxu3 %v3293_v58  ;;  %v3292_v60 = vld [vmem:[%s4335_s12] sm:$0xff]  ;;  %s4338_s12 = sld [smem:[#allocation11_spill]] }
 0x2ed   : > { %1738 = vmatpush.bf16.msra.mxu3 %v3292_v60 }
 0x2ef   : > { %v1552_v62 = vpop.permute.xlu1 %1551  ;;  %v1520_v59 = vpop.xlane.xlu0 %1519 }
 0x2f0   : > { %v1557_v63 = vsel %vm1289_vm10, %v1552_v62, 0 }
 0x2f1   : > { %1566 = vmatpush.bf16.msrb.mxu2 %v1557_v63 }
 0x2f2   : > { %1649 = vadd.xlane.f32.xlu1 %v1648_v0 }
 0x302   : > { %v1679_v13 = vpop.permute.xlu0 %1678 }
 0x303   : > { %v1684_v15 = vsel %vm1289_vm10, %v1679_v13, 0  ;;  %v3499_v13 = vmov 32.0  }
 0x312   : > { %v1523_v7 = vpop.xlane.xlu2 %1522 }
 0x31a   : > { %v1393_v1 = vpop.xlane.xlu1 %1392  ;;  %v1647_v17 = vpop.xlane.xlu2 %1646 }
 0x31b   : > { %3380 = vrcp.f32 %v1393_v1  ;;  %v3348_v1 = vld [vmem:[%s4337_s21] ss:$0 sm:$0xff] }
 0x321   : > { %v3381_v2 = vpop.eup %3380 }
 0x322   : > { %v1399_v3 = vmul.f32 %v3381_v2, %v3369_v39  ;;  %v1396_v4 = vpop.xlane.xlu1 %1395  ;;  %v1658_v23 = vpop.permute.xlu2 %1657 }
 0x323   : > { %3382 = vrcp.f32 %v1396_v4  ;;  %v1663_v30 = vsel %vm1289_vm10, %v1658_v23, 0 }
 0x324   : > { %v1401_v6 = vpack.c.bf16 %v1399_v3, %v1399_v3  ;;  %3384 = vrcp.f32 %v1523_v7 }
 0x325   : > { %3386 = vrcp.f32 %v1520_v59 }
 0x326   : > { %3153 = vmatmul.msk.bf16.vlgmr.msra.gmra.mxu1 %vm1212_vm8, %v1401_v6  ;;  %3388 = vrcp.f32 %v1647_v17 }
 0x329   : > { %v3383_v11 = vpop.eup %3382 }
 0x32a   : > { %v1400_v12 = vmul.f32 %v3383_v11, %v3373_v43  ;;  %v3385_v18 = vpop.eup %3384 }
 0x32b   : > { %v3387_v19 = vpop.eup %3386  ;;  %v1527_v20 = vmul.f32 %v3385_v18, %v3884_v34 }
 0x32c   : > { %v1402_v14 = vpack.c.bf16 %v1400_v12, %v1400_v12  ;;  %v1526_v21 = vmul.f32 %v3387_v19, %v3874_v16  ;;  %v3389_v32 = vpop.eup %3388 }
 0x32d   : > { %v1529_v29 = vpack.c.bf16 %v1527_v20, %v1527_v20  ;;  %v1653_v5 = vmul.f32 %v3389_v32, %v3890_v40 }
 0x32e   : > { %3154 = vmatmul.msk.bf16.vlgmr.msra.gmra.mxu2 %vm1212_vm8, %v1402_v14  ;;  %v1528_v31 = vpack.c.bf16 %v1526_v21, %v1526_v21 }
 0x32f   : > { %1693 = vmatpush.bf16.msra.mxu2 %v1684_v15  ;;  %v1655_v33 = vpack.c.bf16 %v1653_v5, %v1653_v5  ;;  %v3297_v5 = vld [vmem:[%s3664_s0 + $0x18] sm:$0xff] }
 0x330   : > { %1852 = vmatpush.bf16.msrb.mxu0 %v3297_v5 }
 0x33a   : > { %v1531_v26 = vpop.permute.xlu1 %1530 }
 0x33b   : > { %v1536_v27 = vsel %vm1289_vm10, %v1531_v26, 0 }
 0x33c   : > { %1545 = vmatpush.bf16.msrb.mxu1 %v1536_v27 }
 0x33e   : > { %3158 = vmatmul.msk.bf16.vlgmr.msrb.gmra.mxu2 %vm1212_vm8, %v1529_v29 }
 0x33f   : > { %3157 = vmatmul.msk.bf16.vlgmr.msrb.gmra.mxu1 %vm1212_vm8, %v1528_v31 }
 0x340   : > { %1672 = vmatpush.bf16.msra.mxu1 %v1663_v30 }
 0x34f   : > { %3161 = vmatmul.msk.bf16.vlgmr.msra.gmra.mxu1 %vm1212_vm8, %v1655_v33 }
 0x358   : > { %v1302_v16 = vpop.f32.mrf.mxu1 }
 0x359   : > { %1327 = vst.msk [vmem:[#allocation2] sm:$0xff] %vm1212_vm8, %v1302_v16 }
 0x360   : > { %v1304_v34 = vpop.f32.mrf.mxu1 }
 0x361   : > { %v1323_v36 = vpop.f32.mrf.mxu2 }
 0x362   : > { %1328 = vst.msk [vmem:[#allocation2 + $0x8] sm:$0xff] %vm1212_vm8, %v1323_v36  ;;  %v3296_v36 = vld [vmem:[%s3664_s0 + $0x10] sm:$0xff] }
 0x363   : > { %1853 = vmatpush.bf16.msrb.mxu0 %v3296_v36 }
 0x365   : > { %v1650_v52 = vpop.xlane.xlu1 %1649 }
 0x366   : > { %3390 = vrcp.f32 %v1650_v52  ;;  %v3295_v52 = vld [vmem:[%s3664_s0 + $0x8] sm:$0xff] }
 0x367   : > { %3392 = vrcp.f32 %v3499_v13  ;;  %1881 = vmatpush.bf16.msrb.mxu1 %v3295_v52 }
 0x369   : > { %v1325_v38 = vpop.f32.mrf.mxu2 }
 0x36a   : > { %v3299_v38 = vld [vmem:[%s3664_s0 + $0x28] sm:$0xff] }
 0x36b   : > { %1917 = vmatpush.bf16.msrb.mxu2 %v3299_v38 }
 0x36c   : > { %v3391_v35 = vpop.eup %3390 }
 0x36d   : > { %v1654_v39 = vmul.f32 %v3391_v35, %v3379_v61  ;;  %v3393_v14 = vpop.eup %3392  ;;  %v3303_v35 = vld [vmem:[%s3673_s24 + $0x18] sm:$0xff] }
 0x36e   : > { %v1756_v15 = vmul.f32 32.0, %v3393_v14  ;;  %vm1760_vm14 = vweird.f32 %v3393_v14  ;;  %1974 = vmatpush.bf16.msrb.mxu3 %v3303_v35 }
 0x36f   : > { %v1656_v41 = vpack.c.bf16 %v1654_v39, %v1654_v39  ;;  %v3964_v39 = vld [vmem:[%s4338_s12] sm:$0xff] }
 0x370   : > { %v1757_v17 = vsub.f32 1.0, %v1756_v15  ;;  %v2011_v36 = vrot.slane %v3964_v39, 1 }
 0x371   : > { %3162 = vmatmul.msk.bf16.vlgmr.msra.gmra.mxu2 %vm1212_vm8, %v1656_v41  ;;  %v3969_v41 = vld [vmem:[%s4338_s12 + $0x8] sm:$0xff] }
 0x372   : > { %v1758_v18 = vmul.f32 %v3393_v14, %v1757_v17  ;;  %v2012_v52 = vrot.slane %v3969_v41, 1 }
 0x374   : > { %v1759_v19 = vadd.f32 %v3393_v14, %v1758_v18 }
 0x3a3   : > { %v1420_v42 = vpop.f32.mrf.mxu1 }
 0x3a4   : > { %1447 = vrot.lane.b32.xlu0 %v1420_v42, %s3496_s20  ;;  %v3294_v42 = vld [vmem:[%s3664_s0] sm:$0xff] }
 0x3a5   : > { %1882 = vmatpush.bf16.msrb.mxu1 %v3294_v42  ;;  %v2013_v42 = vsel %vm1152_vm4, %v2011_v36, %v2012_v52 }
 0x3ab   : > { %v1422_v40 = vpop.f32.mrf.mxu1 }
 0x3ac   : > { %v3298_v40 = vld [vmem:[%s3664_s0 + $0x20] sm:$0xff]  ;;  %s4341_s0 = sld [smem:[#allocation17_spill]] }
 0x3ad   : > { %1918 = vmatpush.bf16.msrb.mxu2 %v3298_v40  ;;  %v2014_v40 = vsel %vm1152_vm4, %v2012_v52, %v2011_v36 }
 0x3b1   : > { %v1441_v43 = vpop.f32.mrf.mxu2 }
 0x3b2   : > { %1449 = vrot.lane.b32.xlu2 %v1441_v43, %s3496_s20  ;;  %v3302_v43 = vld [vmem:[%s3673_s24 + $0x10] sm:$0xff]  ;;  %s4342_s21 = scalar_lea.vmem %s4341_s0, %s3639_s27 }
 0x3b3   : > { %1975 = vmatpush.bf16.msrb.mxu3 %v3302_v43  ;;  %v3351_v10 = vld [vmem:[%s4342_s21] ss:$0 sm:$0xff] }
 0x3b9   : > { %v1443_v37 = vpop.f32.mrf.mxu2 }
 0x3bc   : > { %v1547_v44 = vpop.f32.mrf.mxu1 }
 0x3bd   : > { %1574 = vrot.lane.b32.xlu0 %v1547_v44, %s3497_s3 }
 0x3c1   : > { %v1568_v45 = vpop.f32.mrf.mxu2 }
 0x3c2   : > { %1576 = vrot.lane.b32.xlu1 %v1568_v45, %s3497_s3  ;;  %v1952_v45 = vpack.c.bf16 %v3969_v41, %v3964_v39 }
 0x3c4   : > { %v1549_v46 = vpop.f32.mrf.mxu1 }
 0x3c9   : > { %v1570_v48 = vpop.f32.mrf.mxu2 }
 0x3cc   : > { %v1674_v49 = vpop.f32.mrf.mxu1 }
 0x3cd   : > { %1701 = vrot.lane.b32.xlu2 %v1674_v49, %s3498_s8  ;;  %v3301_v49 = vld [vmem:[%s3673_s24 + $0x8] sm:$0xff] }
 0x3ce   : > { %2003 = vmatpush.bf16.msra.mxu0 %v3301_v49 }
 0x3d4   : > { %v1676_v50 = vpop.f32.mrf.mxu1 }
 0x3d5   : > { %v3305_v50 = vld [vmem:[%s3673_s24 + $0x28] sm:$0xff] }
 0x3d6   : > { %2039 = vmatpush.bf16.msra.mxu1 %v3305_v50 }
 0x3f4   : > { %v1695_v51 = vpop.f32.mrf.mxu2 }
 0x3f5   : > { %1703 = vrot.lane.b32.xlu0 %v1695_v51, %s3498_s8 }
 0x3fc   : > { %v1697_v53 = vpop.f32.mrf.mxu2 }
 0x3fd   : > { %v3300_v53 = vld [vmem:[%s3673_s24] sm:$0xff] }
 0x3fe   : > { %2004 = vmatpush.bf16.msra.mxu0 %v3300_v53 }
 0x40c   : > { %v1450_v54 = vpop.permute.xlu2 %1449 }
 0x40d   : > { %1455 = vst.msk [vmem:[#allocation2 + $0x8] sm:$0xff] %vm1453_vm11, %v1450_v54 }
 0x416   : > { %v1448_v55 = vpop.permute.xlu0 %1447 }
 0x417   : > { %1454 = vst.msk [vmem:[#allocation2] sm:$0xff] %vm1453_vm11, %v1448_v55 }
 0x427   : > { %v1702_v47 = vpop.permute.xlu2 %1701 }
 0x42f   : > { %v1575_v56 = vpop.permute.xlu0 %1574 }
 0x430   : > { %1581 = vst.msk [vmem:[#allocation2] sm:$0xff] %vm1580_vm12, %v1575_v56 }
 0x431   : > { %1708 = vst.msk [vmem:[#allocation2] sm:$0xff] %vm1707_vm13, %v1702_v47 }
 0x434   : > { %v1577_v57 = vpop.permute.xlu1 %1576 }
 0x435   : > { %1582 = vst.msk [vmem:[#allocation2 + $0x8] sm:$0xff] %vm1580_vm12, %v1577_v57 }
 0x438   : > { %v1710_v62 = vld [vmem:[#allocation2] sm:$0xff] }
 0x467   : > { %v1704_v61 = vpop.permute.xlu0 %1703 }
 0x468   : > { %1709 = vst.msk [vmem:[#allocation2 + $0x8] sm:$0xff] %vm1707_vm13, %v1704_v61 }
 0x46f   : > { %v1711_v63 = vld [vmem:[#allocation2 + $0x8] sm:$0xff] }
 0x470   : > { %v1712_v0 = vpack.c.bf16 %v1711_v63, %v1710_v62  ;;  %v3304_v62 = vld [vmem:[%s3673_s24 + $0x20] sm:$0xff] }
 0x471   : > { %v3349_v63 = vld [vmem:[%s4339_s29] ss:$0 sm:$0xff]  ;;  %2040 = vmatpush.bf16.msra.mxu1 %v3304_v62  ;;  %s4349_s29 = sld [smem:[#allocation23_spill]] }
 0x472   : > { %3171 = vmatmul.msk.bf16.vlgmr.msra.gmra.mxu3 %vm1103_vm1, %v1712_v0 }
 0x477   : > { %s4350_s14 = scalar_lea.vmem %s4349_s29, %s3639_s27 }
 0x482   : > { %3207 = vmatmul.msk.bf16.vlgmr.msrb.gmra.mxu3 %vm1103_vm1, %v1952_v45 }
 0x4f5   : > { %v1740_v2 = vpop.f32.mrf.mxu3 }
 0x4f6   : > { %v1741_v3 = vadd.f32 %v3348_v1, %v1740_v2 }
 0x4f8   : > { %v1745_v4 = vadd.f32 %v1741_v3, %v3743_v8  ;;  %v3945_v8 = vsel %vm1760_vm14, %v3393_v14, %v1759_v19  ;;  %v3350_v3 = vld [vmem:[%s4340_s23] ss:$0 sm:$0xff]  ;;  %s4347_s23 = sld [smem:[#allocation22_spill]] }
 0x4fa   : > { %v1749_v59 = vsel %vm1103_vm1, %v1745_v4, 0.0 }
 0x4fb   : > { %1750 = vadd.xlane.f32.xlu2 %v1749_v59 }
 0x4fd   : > { %v1742_v6 = vpop.f32.mrf.mxu3 }
 0x4fe   : > { %v1743_v7 = vadd.f32 %v3348_v1, %v1742_v6  ;;  %s4348_s0 = scalar_lea.vmem %s4347_s23, %s3639_s27 }
 0x500   : > { %v1746_v11 = vadd.f32 %v1743_v7, %v3745_v9 }
 0x502   : > { %v1752_v12 = vsel %vm1103_vm1, %v1746_v11, 0.0 }
 0x503   : > { %1753 = vadd.xlane.f32.xlu0 %v1752_v12 }
 0x505   : > { %v1977_v50 = vpop.f32.mrf.mxu3 }
 0x56e   : > { %v1751_v20 = vpop.xlane.xlu2 %1750 }
 0x56f   : > { %v1762_v21 = vmul.f32 %v3945_v8, %v1751_v20 }
 0x571   : > { %v1764_v23 = vsub.f32 %v1745_v4, %v1762_v21 }
 0x573   : > { %v1766_v9 = vmul.f32 %v1764_v23, %v1764_v23 }
 0x575   : > { %v1768_v26 = vsel %vm1103_vm1, %v1766_v9, 0.0 }
 0x576   : > { %v1754_v27 = vpop.xlane.xlu0 %1753  ;;  %1769 = vadd.xlane.f32.xlu1 %v1768_v26 }
 0x577   : > { %v1763_v29 = vmul.f32 %v3945_v8, %v1754_v27 }
 0x579   : > { %v3950_v30 = vsub.f32 %v1746_v11, %v1763_v29 }
 0x57b   : > { %v1767_v31 = vmul.f32 %v3950_v30, %v3950_v30 }
 0x57d   : > { %v1771_v32 = vsel %vm1103_vm1, %v1767_v31, 0.0  ;;  %v1945_v31 = vrot.slane %v3964_v39, 7  ;;  %v2016_v39 = vsel %vm3783_vm7, %v2014_v40, 0.0 }
 0x57e   : > { %1772 = vadd.xlane.f32.xlu2 %v1771_v32  ;;  %v1946_v32 = vrot.slane %v3969_v41, 7 }
 0x5e9   : > { %v1770_v33 = vpop.xlane.xlu1 %1769 }
 0x5ea   : > { %v1774_v16 = vmul.f32 %v1770_v33, %v3945_v8 }
 0x5ec   : > { %v1776_v34 = vadd.f32 1e-05, %v1774_v16  ;;  %v1947_v16 = vsel %vm1082_vm2, %v1945_v31, %v1946_v32 }
 0x5ed   : > { %v1950_v35 = vsel %vm3775_vm6, %v1947_v16, 0.0 }
 0x5ee   : > { %3394 = vrsqrt.f32 %v1776_v34  ;;  %vm1784_vm0 = vweird.f32 %v1776_v34 }
 0x5f1   : > { %v1773_v37 = vpop.xlane.xlu2 %1772 }
 0x5f2   : > { %v1775_v44 = vmul.f32 %v1773_v37, %v3945_v8  ;;  %v2015_v37 = vsel %vm3771_vm5, %v2013_v42, 0.0 }
 0x5f3   : > { %v2017_v41 = vpack.c.bf16 %v2016_v39, %v2015_v37 }
 0x5f4   : > { %v3395_v46 = vpop.eup %3394  ;;  %v1777_v48 = vadd.f32 1e-05, %v1775_v44 }
 0x5f5   : > { %v1779_v51 = vmul.f32 %v3395_v46, %v1776_v34  ;;  %vm1785_vm15 = vweird.f32 %v3395_v46  ;;  %v1948_v34 = vsel %vm1082_vm2, %v1946_v32, %v1945_v31 }
 0x5f6   : > { %3396 = vrsqrt.f32 %v1777_v48  ;;  %vm1786_vm9 = vmor %vm1784_vm0, %vm1785_vm15  ;;  %vm1794_vm15 = vweird.f32 %v1777_v48  ;;  %v1949_v38 = vsel %vm3764_vm3, %v1948_v34, 0.0 }
 0x5f7   : > { %v1780_v54 = vmul.f32 %v3395_v46, %v1779_v51  ;;  %v1951_v43 = vpack.c.bf16 %v1950_v35, %v1949_v38 }
 0x5f9   : > { %v1781_v55 = vmul.f32 0.5, %v1780_v54 }
 0x5fb   : > { %v1782_v56 = vsub.f32 1.5, %v1781_v55 }
 0x5fc   : > { %v3397_v47 = vpop.eup %3396 }
 0x5fd   : > { %v1783_v57 = vmul.f32 %v3395_v46, %v1782_v56  ;;  %v1789_v58 = vmul.f32 %v3397_v47, %v1777_v48  ;;  %vm1795_vm14 = vweird.f32 %v3397_v47 }
 0x5fe   : > { %vm1796_vm0 = vmor %vm1794_vm15, %vm1795_vm14 }
 0x5ff   : > { %v1787_v60 = vsel %vm1786_vm9, %v3395_v46, %v1783_v57  ;;  %v1790_v61 = vmul.f32 %v3397_v47, %v1789_v58 }
 0x600   : > { %v1798_v0 = vmul.f32 %v1787_v60, %v1764_v23 }
 0x601   : > { %v1791_v1 = vmul.f32 0.5, %v1790_v61 }
 0x602   : > { %v1803_v4 = vmul.f32 %v3349_v63, %v1798_v0 }
 0x603   : > { %v1792_v2 = vsub.f32 1.5, %v1791_v1 }
 0x604   : > { %v3993_v11 = vadd.f32 %v3350_v3, %v1803_v4 }
 0x605   : > { %v1793_v59 = vmul.f32 %v3397_v47, %v1792_v2  ;;  %v1979_v2 = vpop.f32.mrf.mxu3 }
 0x606   : > { %v1823_v14 = vrot.slane %v3993_v11, 7  ;;  %v1889_v18 = vrot.slane %v3993_v11, 1 }
 0x607   : > { %v1797_v6 = vsel %vm1796_vm0, %v3397_v47, %v1793_v59  ;;  %v3352_v47 = vld [vmem:[%s4343_s15] ss:$0 sm:$0xff] }
 0x608   : > { %v1799_v7 = vmul.f32 %v1797_v6, %v3950_v30 }
 0x60a   : > { %v1804_v12 = vmul.f32 %v3349_v63, %v1799_v7 }
 0x60c   : > { %v3995_v13 = vadd.f32 %v3350_v3, %v1804_v12 }
 0x60e   : > { %v1830_v15 = vpack.c.bf16 %v3995_v13, %v3993_v11  ;;  %v1824_v17 = vrot.slane %v3995_v13, 7  ;;  %v1890_v19 = vrot.slane %v3995_v13, 1 }
 0x610   : > { %3180 = vmatmul.msk.bf16.vlgmr.msrb.gmra.mxu0 %vm1103_vm1, %v1830_v15  ;;  %v1825_v20 = vsel %vm1082_vm2, %v1823_v14, %v1824_v17  ;;  %v1826_v21 = vsel %vm1082_vm2, %v1824_v17, %v1823_v14  ;;  %v1891_v23 = vsel %vm1152_vm4, %v1889_v18, %v1890_v19  ;;  %v1892_v9 = vsel %vm1152_vm4, %v1890_v19, %v1889_v18 }
 0x611   : > { %v1827_v26 = vsel %vm3764_vm3, %v1826_v21, 0.0  ;;  %v1828_v27 = vsel %vm3775_vm6, %v1825_v20, 0.0  ;;  %v1893_v29 = vsel %vm3771_vm5, %v1891_v23, 0.0  ;;  %v1894_v30 = vsel %vm3783_vm7, %v1892_v9, 0.0 }
 0x612   : > { %v1829_v5 = vpack.c.bf16 %v1828_v27, %v1827_v26  ;;  %v1895_v33 = vpack.c.bf16 %v1894_v30, %v1893_v29 }
 0x614   : > { %3189 = vmatmul.msk.bf16.vlgmr.msrb.gmra.mxu1 %vm1103_vm1, %v1829_v5  ;;  %3198 = vmatmul.msk.bf16.vlgmr.msrb.gmra.mxu2 %vm1103_vm1, %v1895_v33 }
 0x620   : > { %3216 = vmatmul.msk.bf16.vlgmr.msra.gmra.mxu0 %vm1103_vm1, %v1951_v43 }
 0x624   : > { %3225 = vmatmul.msk.bf16.vlgmr.msra.gmra.mxu1 %vm1103_vm1, %v2017_v41 }
 0x68d   : > { %v1855_v22 = vpop.f32.mrf.mxu0 }
 0x691   : > { %v1884_v25 = vpop.f32.mrf.mxu1 }
 0x692   : > { %v1885_v45 = vadd.f32 %v1884_v25, %v1855_v22 }
 0x695   : > { %v1857_v44 = vpop.f32.mrf.mxu0 }
 0x697   : > { %v1920_v24 = vpop.f32.mrf.mxu2 }
 0x698   : > { %v1925_v46 = vadd.f32 %v1920_v24, %v1885_v45 }
 0x699   : > { %v1886_v48 = vpop.f32.mrf.mxu1 }
 0x69a   : > { %v1930_v28 = vadd.f32 %v3351_v10, %v1925_v46  ;;  %v1887_v56 = vadd.f32 %v1886_v48, %v1857_v44 }
 0x69c   : > { %v2059_v49 = vpack.c.bf16 %v1930_v28, %v1930_v28 }
 0x69d   : > { %v2006_v51 = vpop.f32.mrf.mxu0 }
 0x69e   : > { %v2007_v53 = vadd.f32 %v2006_v51, %v1977_v50  ;;  %v2178_v54 = vunpack.c.l.b16 %v2059_v49 }
 0x69f   : > { %v1922_v55 = vpop.f32.mrf.mxu2 }
 0x6a0   : > { %v2179_v57 = vpack.c.b16 %v2178_v54, %v2178_v54  ;;  %v1926_v60 = vadd.f32 %v1922_v55, %v1887_v56 }
 0x6a1   : > { %v2042_v58 = vpop.f32.mrf.mxu1 }
 0x6a2   : > { %v2047_v61 = vadd.f32 %v2042_v58, %v2007_v53  ;;  %2180 = vrot.lane.b32.xlu1 %v2179_v57, %s3484_s22  ;;  %v1931_v0 = vadd.f32 %v3351_v10, %v1926_v60 }
 0x6a4   : > { %v2052_v62 = vadd.f32 %v3352_v47, %v2047_v61  ;;  %v2060_v7 = vpack.c.bf16 %v1931_v0, %v1931_v0 }
 0x6a5   : > { %v2008_v63 = vpop.f32.mrf.mxu0 }
 0x6a6   : > { %v2061_v1 = vpack.c.bf16 %v2052_v62, %v2052_v62  ;;  %v2009_v4 = vadd.f32 %v2008_v63, %v1979_v2  ;;  %v2204_v18 = vunpack.c.l.b16 %v2060_v7 }
 0x6a8   : > { %v2128_v3 = vunpack.c.l.b16 %v2061_v1  ;;  %v2067_v59 = vsel %vm1212_vm8, %v2061_v1, 0  ;;  %v2205_v23 = vpack.c.b16 %v2204_v18, %v2204_v18 }
 0x6a9   : > { %v2044_v6 = vpop.f32.mrf.mxu1  ;;  %2076 = vmatpush.bf16.xpose.msra.mxu2 %v2067_v59 }
 0x6aa   : > { %v4056_v12 = vpack.c.b16 %v2128_v3, %v2128_v3  ;;  %v2048_v14 = vadd.f32 %v2044_v6, %v2009_v4  ;;  %2307 = vrot.lane.b32.xlu1 %v2179_v57, %s3487_s2 }
 0x6ac   : > { %v2053_v15 = vadd.f32 %v3352_v47, %v2048_v14  ;;  %2182 = vrot.lane.b32.xlu0 %v4056_v12, %s3484_s22 }
 0x6ae   : > { %v2062_v17 = vpack.c.bf16 %v2053_v15, %v2053_v15 }
 0x6b0   : > { %v2152_v19 = vunpack.c.l.b16 %v2062_v17  ;;  %3226 = vmatmul.msk.bf16.vlgmr.msra.gmra.mxu2 %vm1212_vm8, %v2059_v49  ;;  %v2086_v20 = vsel %vm1212_vm8, %v2062_v17, 0 }
 0x6b1   : > { %2095 = vmatpush.bf16.xpose.msra.mxu3 %v2086_v20 }
 0x6b2   : > { %v4063_v21 = vpack.c.b16 %v2152_v19, %v2152_v19 }
 0x6b4   : > { %2208 = vrot.lane.b32.xlu2 %v4063_v21, %s3484_s22  ;;  %2206 = vrot.lane.b32.xlu0 %v2205_v23, %s3484_s22 }
 0x6b5   : > { %2456 = vrot.lane.b32.xlu1 %v4063_v21, %s3490_s28 }
 0x6b8   : > { %3227 = vmatmul.msk.bf16.vlgmr.msra.gmra.mxu3 %vm1212_vm8, %v2060_v7 }
 0x6bc   : > { %2332 = vrot.lane.b32.xlu2 %v4063_v21, %s3487_s2  ;;  %2309 = vrot.lane.b32.xlu0 %v4056_v12, %s3487_s2 }
 0x6c4   : > { %2433 = vrot.lane.b32.xlu2 %v4056_v12, %s3490_s28  ;;  %2330 = vrot.lane.b32.xlu0 %v2205_v23, %s3487_s2 }
 0x6cc   : > { %2454 = vrot.lane.b32.xlu2 %v2205_v23, %s3490_s28  ;;  %2431 = vrot.lane.b32.xlu0 %v2179_v57, %s3490_s28 }
 0x6d4   : > { %2130 = vrot.lane.b32.xlu0 %v4056_v12, %s3486_s5 }
 0x70e   : > { %v2209_v9 = vpop.permute.xlu2 %2208 }
 0x70f   : > { %v2214_v26 = vsel %vm1212_vm8, %v2209_v9, 0 }
 0x710   : > { %2223 = vmatpush.bf16.xpose.msrb.mxu3 %v2214_v26 }
 0x714   : > { %v2181_v27 = vpop.permute.xlu1 %2180 }
 0x716   : > { %v2333_v29 = vpop.permute.xlu2 %2332 }
 0x717   : > { %v2338_v30 = vsel %vm1212_vm8, %v2333_v29, 0 }
 0x718   : > { %2347 = vmatpush.bf16.xpose.msra.mxu3 %v2338_v30 }
 0x71c   : > { %v2308_v32 = vpop.permute.xlu1 %2307 }
 0x71e   : > { %v2183_v31 = vpop.permute.xlu0 %2182  ;;  %v2434_v36 = vpop.permute.xlu2 %2433 }
 0x71f   : > { %v2188_v5 = vsel %vm1212_vm8, %v2183_v31, 0  ;;  %v2439_v35 = vsel %vm1212_vm8, %v2434_v36, 0 }
 0x720   : > { %2197 = vmatpush.bf16.xpose.msrb.mxu2 %v2188_v5 }
 0x726   : > { %v2207_v33 = vpop.permute.xlu0 %2206  ;;  %v2455_v10 = vpop.permute.xlu2 %2454 }
 0x727   : > { %v2457_v16 = vpop.permute.xlu1 %2456  ;;  %3230 = vmatmul.msk.bf16.vlgmr.msrb.gmra.mxu2 %vm1212_vm8, %v2181_v27  ;;  %3231 = vmatmul.msk.bf16.vlgmr.msrb.gmra.mxu3 %vm1212_vm8, %v2207_v33 }
 0x728   : > { %v2462_v34 = vsel %vm1212_vm8, %v2457_v16, 0 }
 0x729   : > { %2471 = vmatpush.bf16.xpose.msrb.mxu3 %v2462_v34 }
 0x72e   : > { %v2310_v52 = vpop.permute.xlu0 %2309 }
 0x72f   : > { %v2315_v38 = vsel %vm1212_vm8, %v2310_v52, 0 }
 0x730   : > { %2324 = vmatpush.bf16.xpose.msra.mxu2 %v2315_v38 }
 0x733   : > { %v2078_v42 = vpop.f32.mrf.mxu2 }
 0x734   : > { %v2101_v40 = vmul.f32 0.35355338, %v2078_v42 }
 0x736   : > { %v2331_v43 = vpop.permute.xlu0 %2330  ;;  %v2103_v37 = vsel %vm1212_vm8, %v2101_v40, -inf }
 0x737   : > { %3234 = vmatmul.msk.bf16.vlgmr.msra.gmra.mxu2 %vm1212_vm8, %v2308_v32  ;;  %3235 = vmatmul.msk.bf16.vlgmr.msra.gmra.mxu3 %vm1212_vm8, %v2331_v43 }
 0x738   : > { %2448 = vmatpush.bf16.xpose.msrb.mxu2 %v2439_v35  ;;  %2104 = vmax.xlane.f32.xlu1 %v2103_v37 }
 0x73b   : > { %v2080_v39 = vpop.f32.mrf.mxu2  ;;  %v2097_v41 = vpop.f32.mrf.mxu3 }
 0x73c   : > { %v2102_v22 = vmul.f32 0.35355338, %v2097_v41 }
 0x73e   : > { %v2432_v25 = vpop.permute.xlu0 %2431  ;;  %v2106_v44 = vsel %vm1212_vm8, %v2102_v22, -inf }
 0x73f   : > { %2107 = vmax.xlane.f32.xlu0 %v2106_v44 }
 0x743   : > { %v2099_v45 = vpop.f32.mrf.mxu3 }
 0x746   : > { %v2131_v24 = vpop.permute.xlu0 %2130 }
 0x747   : > { %v2136_v46 = vsel %vm1289_vm10, %v2131_v24, 0  ;;  %3238 = vmatmul.msk.bf16.vlgmr.msrb.gmra.mxu2 %vm1212_vm8, %v2432_v25  ;;  %3239 = vmatmul.msk.bf16.vlgmr.msrb.gmra.mxu3 %vm1212_vm8, %v2455_v10 }
 0x748   : > { %2145 = vmatpush.bf16.msrb.mxu0 %v2136_v46 }
 0x7aa   : > { %v2225_v48 = vpop.f32.mrf.mxu3  ;;  %v2199_v28 = vpop.f32.mrf.mxu2 }
 0x7ab   : > { %v2230_v49 = vmul.f32 0.35355338, %v2225_v48  ;;  %v2105_v50 = vpop.xlane.xlu1 %2104  ;;  %v2229_v51 = vmul.f32 0.35355338, %v2199_v28 }
 0x7ac   : > { %v2109_v53 = vsub.f32 %v2101_v40, %v2105_v50 }
 0x7ad   : > { %v2234_v54 = vsel %vm1212_vm8, %v2230_v49, -inf  ;;  %v2231_v55 = vsel %vm1212_vm8, %v2229_v51, -inf }
 0x7ae   : > { %v2111_v56 = vmul.f32 1.442695, %v2109_v53  ;;  %2235 = vmax.xlane.f32.xlu1 %v2234_v54  ;;  %2232 = vmax.xlane.f32.xlu2 %v2231_v55 }
 0x7b0   : > { %3398 = vpow2.f32 %v2111_v56 }
 0x7b2   : > { %v2227_v47 = vpop.f32.mrf.mxu3  ;;  %v2108_v57 = vpop.xlane.xlu0 %2107 }
 0x7b3   : > { %v2110_v58 = vsub.f32 %v2102_v22, %v2108_v57  ;;  %v2201_v60 = vpop.f32.mrf.mxu2 }
 0x7b5   : > { %v2113_v61 = vmul.f32 1.442695, %v2110_v58 }
 0x7b6   : > { %v3399_v62 = vpop.eup %3398 }
 0x7b7   : > { %3400 = vpow2.f32 %v2113_v61  ;;  %v2115_v63 = vsel %vm1212_vm8, %v3399_v62, 0.0 }
 0x7b8   : > { %2116 = vadd.xlane.f32.xlu2 %v2115_v63 }
 0x7ba   : > { %v2349_v0 = vpop.f32.mrf.mxu3 }
 0x7bb   : > { %v2326_v1 = vpop.f32.mrf.mxu2  ;;  %v2354_v2 = vmul.f32 0.35355338, %v2349_v0 }
 0x7bc   : > { %v2353_v3 = vmul.f32 0.35355338, %v2326_v1 }
 0x7bd   : > { %v3401_v4 = vpop.eup %3400  ;;  %v2358_v59 = vsel %vm1212_vm8, %v2354_v2, -inf }
 0x7be   : > { %v2355_v6 = vsel %vm1212_vm8, %v2353_v3, -inf  ;;  %v2118_v7 = vsel %vm1212_vm8, %v3401_v4, 0.0 }
 0x7bf   : > { %2356 = vmax.xlane.f32.xlu0 %v2355_v6  ;;  %2119 = vadd.xlane.f32.xlu1 %v2118_v7 }
 0x7c0   : > { %2359 = vmax.xlane.f32.xlu2 %v2358_v59 }
 0x7c2   : > { %v2351_v14 = vpop.f32.mrf.mxu3 }
 0x7c3   : > { %v2328_v15 = vpop.f32.mrf.mxu2 }
 0x7ca   : > { %v2473_v17 = vpop.f32.mrf.mxu3 }
 0x7cb   : > { %v2450_v18 = vpop.f32.mrf.mxu2  ;;  %v2478_v19 = vmul.f32 0.35355338, %v2473_v17 }
 0x7cc   : > { %v4103_v20 = vmul.f32 0.35355338, %v2450_v18 }
 0x7cd   : > { %v2482_v23 = vsel %vm1212_vm8, %v2478_v19, -inf }
 0x7ce   : > { %2483 = vmax.xlane.f32.xlu0 %v2482_v23  ;;  %v2479_v9 = vsel %vm1212_vm8, %v4103_v20, -inf }
 0x7cf   : > { %2480 = vmax.xlane.f32.xlu1 %v2479_v9 }
 0x7d2   : > { %v2475_v26 = vpop.f32.mrf.mxu3 }
 0x7d3   : > { %v2452_v27 = vpop.f32.mrf.mxu2 }
 0x7d8   : > { %2154 = vrot.lane.b32.xlu2 %v4063_v21, %s3486_s5  ;;  %s4344_s5 = scalar_lea.vmem %s4267_s11, %s3639_s27 }
 0x7e2   : > { %2255 = vrot.lane.b32.xlu0 %v4056_v12, %s3485_s26 }
 0x7e8   : > { %2276 = vrot.lane.b32.xlu1 %v4063_v21, %s3485_s26  ;;  %s4351_s26 = sld [smem:[#allocation24_spill]] }
 0x7f0   : > { %2379 = vrot.lane.b32.xlu1 %v4056_v12, %s3488_s7 }
 0x821   : > { %v2233_v29 = vpop.xlane.xlu2 %2232  ;;  %v2236_v30 = vpop.xlane.xlu1 %2235 }
 0x822   : > { %v2237_v31 = vsub.f32 %v2229_v51, %v2233_v29  ;;  %v2238_v5 = vsub.f32 %v2230_v49, %v2236_v30 }
 0x824   : > { %v2239_v32 = vmul.f32 1.442695, %v2237_v31  ;;  %v2241_v33 = vmul.f32 1.442695, %v2238_v5 }
 0x826   : > { %3402 = vpow2.f32 %v2239_v32 }
 0x82b   : > { %v2117_v16 = vpop.xlane.xlu2 %2116 }
 0x82c   : > { %3404 = vrcp.f32 %v2117_v16  ;;  %v4116_v34 = vpop.eup %3402 }
 0x82d   : > { %3406 = vpow2.f32 %v2241_v33  ;;  %v2243_v36 = vsel %vm1212_vm8, %v4116_v34, 0.0 }
 0x82e   : > { %2244 = vadd.xlane.f32.xlu1 %v2243_v36 }
 0x832   : > { %v3405_v52 = vpop.eup %3404  ;;  %v2357_v38 = vpop.xlane.xlu0 %2356 }
 0x833   : > { %v2120_v35 = vpop.xlane.xlu1 %2119  ;;  %v3407_v42 = vpop.eup %3406  ;;  %v2123_v40 = vmul.f32 %v3405_v52, %v3399_v62  ;;  %v2361_v43 = vsub.f32 %v2353_v3, %v2357_v38 }
 0x834   : > { %3408 = vrcp.f32 %v2120_v35  ;;  %v2360_v37 = vpop.xlane.xlu2 %2359  ;;  %v2246_v44 = vsel %vm1212_vm8, %v3407_v42, 0.0 }
 0x835   : > { %v2362_v39 = vsub.f32 %v2354_v2, %v2360_v37  ;;  %v2125_v41 = vpack.c.bf16 %v2123_v40, %v2123_v40  ;;  %v2363_v22 = vmul.f32 1.442695, %v2361_v43 }
 0x836   : > { %2247 = vadd.xlane.f32.xlu1 %v2246_v44 }
 0x837   : > { %v2365_v25 = vmul.f32 1.442695, %v2362_v39  ;;  %3410 = vpow2.f32 %v2363_v22  ;;  %3228 = vmatmul.msk.bf16.vlgmr.msrb.gmra.mxu0 %vm1212_vm8, %v2125_v41 }
 0x839   : > { %3412 = vpow2.f32 %v2365_v25 }
 0x83a   : > { %v3409_v45 = vpop.eup %3408 }
 0x83b   : > { %v2124_v10 = vmul.f32 %v3409_v45, %v3401_v4 }
 0x83c   : > { %v2155_v24 = vpop.permute.xlu2 %2154 }
 0x83d   : > { %v2126_v46 = vpack.c.bf16 %v2124_v10, %v2124_v10  ;;  %v2160_v48 = vsel %vm1289_vm10, %v2155_v24, 0  ;;  %v3411_v28 = vpop.eup %3410 }
 0x83e   : > { %2169 = vmatpush.bf16.msrb.mxu1 %v2160_v48  ;;  %v2367_v50 = vsel %vm1212_vm8, %v3411_v28, 0.0 }
 0x83f   : > { %v3413_v49 = vpop.eup %3412  ;;  %2368 = vadd.xlane.f32.xlu2 %v2367_v50 }
 0x840   : > { %v2370_v51 = vsel %vm1212_vm8, %v3413_v49, 0.0 }
 0x841   : > { %3229 = vmatmul.msk.bf16.vlgmr.msrb.gmra.mxu1 %vm1212_vm8, %v2126_v46  ;;  %2371 = vadd.xlane.f32.xlu0 %v2370_v51  ;;  %v2484_v53 = vpop.xlane.xlu0 %2483 }
 0x842   : > { %v2486_v54 = vsub.f32 %v2478_v19, %v2484_v53  ;;  %v2481_v57 = vpop.xlane.xlu1 %2480 }
 0x843   : > { %v2485_v1 = vsub.f32 %v4103_v20, %v2481_v57 }
 0x844   : > { %v2489_v55 = vmul.f32 1.442695, %v2486_v54 }
 0x845   : > { %v2487_v2 = vmul.f32 1.442695, %v2485_v1  ;;  %v3353_v1 = vld [vmem:[%s4344_s5] ss:$0 sm:$0xff]  ;;  %s4352_s5 = scalar_lea.vmem %s4351_s26, %s3639_s27 }
 0x846   : > { %3414 = vpow2.f32 %v2489_v55 }
 0x847   : > { %3416 = vpow2.f32 %v2487_v2 }
 0x84c   : > { %v4126_v56 = vpop.eup %3414 }
 0x84d   : > { %v2494_v47 = vsel %vm1212_vm8, %v4126_v56, 0.0 }
 0x84e   : > { %2495 = vadd.xlane.f32.xlu2 %v2494_v47 }
 0x84f   : > { %2400 = vrot.lane.b32.xlu1 %v4063_v21, %s3488_s7 }
 0x854   : > { %v2256_v58 = vpop.permute.xlu0 %2255 }
 0x855   : > { %2503 = vrot.lane.b32.xlu0 %v4056_v12, %s3489_s25  ;;  %v2261_v60 = vsel %vm1289_vm10, %v2256_v58, 0  ;;  %v3417_v12 = vpop.eup %3416  ;;  %v3307_v58 = vld [vmem:[%s3682_s6 + $0x8] sm:$0xff] }
 0x856   : > { %2270 = vmatpush.bf16.msra.mxu0 %v2261_v60  ;;  %v2491_v3 = vsel %vm1212_vm8, %v3417_v12, 0.0  ;;  %2582 = vmatpush.bf16.msra.mxu2 %v3307_v58  ;;  %v3306_v60 = vld [vmem:[%s3682_s6] sm:$0xff] }
 0x85a   : > { %v2277_v61 = vpop.permute.xlu1 %2276  ;;  %2583 = vmatpush.bf16.msra.mxu2 %v3306_v60 }
 0x85b   : > { %v2282_v62 = vsel %vm1289_vm10, %v2277_v61, 0 }
 0x85c   : > { %2291 = vmatpush.bf16.msra.mxu1 %v2282_v62 }
 0x862   : > { %v2380_v63 = vpop.permute.xlu1 %2379 }
 0x863   : > { %v2385_v0 = vsel %vm1289_vm10, %v2380_v63, 0 }
 0x864   : > { %2394 = vmatpush.bf16.msrb.mxu0 %v2385_v0 }
 0x866   : > { %2524 = vrot.lane.b32.xlu2 %v4063_v21, %s3489_s25  ;;  %s4345_s25 = scalar_lea.vmem %s4275_s19, %s3639_s27 }
 0x879   : > { %2492 = vadd.xlane.f32.xlu1 %v2491_v3 }
 0x8a1   : > { %v2245_v4 = vpop.xlane.xlu1 %2244 }
 0x8a2   : > { %3418 = vrcp.f32 %v2245_v4 }
 0x8a8   : > { %v3419_v59 = vpop.eup %3418 }
 0x8a9   : > { %v2251_v6 = vmul.f32 %v3419_v59, %v4116_v34  ;;  %v2248_v7 = vpop.xlane.xlu1 %2247 }
 0x8aa   : > { %3420 = vrcp.f32 %v2248_v7 }
 0x8ab   : > { %v2253_v14 = vpack.c.bf16 %v2251_v6, %v2251_v6 }
 0x8ad   : > { %3232 = vmatmul.msk.bf16.vlgmr.msra.gmra.mxu0 %vm1212_vm8, %v2253_v14 }
 0x8b0   : > { %v3421_v15 = vpop.eup %3420 }
 0x8b1   : > { %v2252_v21 = vmul.f32 %v3421_v15, %v3407_v42 }
 0x8b2   : > { %v2369_v17 = vpop.xlane.xlu2 %2368 }
 0x8b3   : > { %3422 = vrcp.f32 %v2369_v17  ;;  %v2254_v18 = vpack.c.bf16 %v2252_v21, %v2252_v21 }
 0x8b4   : > { %v2147_v19 = vpop.f32.mrf.mxu0  ;;  %v2372_v20 = vpop.xlane.xlu0 %2371 }
 0x8b5   : > { %2175 = vst.msk [vmem:[#allocation2] sm:$0xff] %vm1212_vm8, %v2147_v19  ;;  %3233 = vmatmul.msk.bf16.vlgmr.msra.gmra.mxu1 %vm1212_vm8, %v2254_v18  ;;  %3424 = vrcp.f32 %v2372_v20 }
 0x8b9   : > { %v3423_v23 = vpop.eup %3422 }
 0x8ba   : > { %v2375_v9 = vmul.f32 %v3423_v23, %v3411_v28 }
 0x8bb   : > { %v3425_v30 = vpop.eup %3424 }
 0x8bc   : > { %v2377_v26 = vpack.c.bf16 %v2375_v9, %v2375_v9  ;;  %v2149_v27 = vpop.f32.mrf.mxu0  ;;  %v2376_v31 = vmul.f32 %v3425_v30, %v3413_v49  ;;  %v3308_v30 = vld [vmem:[%s3691_s4] sm:$0xff] }
 0x8be   : > { %v2171_v29 = vpop.f32.mrf.mxu1  ;;  %3236 = vmatmul.msk.bf16.vlgmr.msrb.gmra.mxu0 %vm1212_vm8, %v2377_v26  ;;  %v2378_v16 = vpack.c.bf16 %v2376_v31, %v2376_v31 }
 0x8bf   : > { %2176 = vst.msk [vmem:[#allocation2 + $0x8] sm:$0xff] %vm1212_vm8, %v2171_v29 }
 0x8c1   : > { %v2496_v32 = vpop.xlane.xlu2 %2495  ;;  %v2401_v5 = vpop.permute.xlu1 %2400 }
 0x8c2   : > { %v2406_v33 = vsel %vm1289_vm10, %v2401_v5, 0  ;;  %3426 = vrcp.f32 %v2496_v32 }
 0x8c3   : > { %2415 = vmatpush.bf16.msrb.mxu1 %v2406_v33 }
 0x8c6   : > { %v2173_v34 = vpop.f32.mrf.mxu1  ;;  %3237 = vmatmul.msk.bf16.vlgmr.msrb.gmra.mxu1 %vm1212_vm8, %v2378_v16 }
 0x8c7   : > { %v2504_v36 = vpop.permute.xlu0 %2503 }
 0x8c8   : > { %v2509_v52 = vsel %vm1289_vm10, %v2504_v36, 0  ;;  %v3427_v42 = vpop.eup %3426 }
 0x8c9   : > { %2518 = vmatpush.bf16.msra.mxu0 %v2509_v52  ;;  %v2525_v38 = vpop.permute.xlu2 %2524  ;;  %v2500_v40 = vmul.f32 %v3427_v42, %v4126_v56 }
 0x8ca   : > { %v2530_v35 = vsel %vm1289_vm10, %v2525_v38, 0 }
 0x8cb   : > { %2539 = vmatpush.bf16.msra.mxu1 %v2530_v35  ;;  %v2502_v43 = vpack.c.bf16 %v2500_v40, %v2500_v40 }
 0x8d6   : > { %3241 = vmatmul.msk.bf16.vlgmr.msra.gmra.mxu1 %vm1212_vm8, %v2502_v43 }
 0x8ec   : > { %v2493_v37 = vpop.xlane.xlu1 %2492 }
 0x8ed   : > { %3428 = vrcp.f32 %v2493_v37 }
 0x8f3   : > { %v3429_v39 = vpop.eup %3428 }
 0x8f4   : > { %v2499_v41 = vmul.f32 %v3429_v39, %v3417_v12 }
 0x8f6   : > { %v2501_v22 = vpack.c.bf16 %v2499_v41, %v2499_v41 }
 0x8f8   : > { %3240 = vmatmul.msk.bf16.vlgmr.msra.gmra.mxu0 %vm1212_vm8, %v2501_v22  ;;  %v3354_v22 = vld [vmem:[%s1016_s1] ss:$0 sm:$0xff]  ;;  %vm2725_vm8 = vcmask 523264  }
 0x92a   : > { %v2272_v25 = vpop.f32.mrf.mxu0 }
 0x92b   : > { %2299 = vrot.lane.b32.xlu0 %v2272_v25, %s3496_s20 }
 0x932   : > { %v2274_v44 = vpop.f32.mrf.mxu0  ;;  %v2293_v45 = vpop.f32.mrf.mxu1 }
 0x933   : > { %2301 = vrot.lane.b32.xlu2 %v2293_v45, %s3496_s20 }
 0x93a   : > { %v2295_v10 = vpop.f32.mrf.mxu1 }
 0x93b   : > { %v2396_v24 = vpop.f32.mrf.mxu0  ;;  %v3355_v10 = vld [vmem:[%s4345_s25] ss:$0 sm:$0xff] }
 0x93c   : > { %2423 = vrot.lane.b32.xlu0 %v2396_v24, %s3497_s3 }
 0x943   : > { %v2398_v46 = vpop.f32.mrf.mxu0  ;;  %v2417_v48 = vpop.f32.mrf.mxu1 }
 0x944   : > { %2425 = vrot.lane.b32.xlu2 %v2417_v48, %s3497_s3  ;;  %s4346_s3 = scalar_lea.vmem %s4269_s13, %s3639_s27 }
 0x94b   : > { %v2419_v28 = vpop.f32.mrf.mxu1 }
 0x953   : > { %v2541_v49 = vpop.f32.mrf.mxu1 }
 0x954   : > { %2549 = vrot.lane.b32.xlu1 %v2541_v49, %s3498_s8 }
 0x95b   : > { %v2543_v50 = vpop.f32.mrf.mxu1 }
 0x975   : > { %v2520_v51 = vpop.f32.mrf.mxu0 }
 0x976   : > { %2547 = vrot.lane.b32.xlu0 %v2520_v51, %s3498_s8  ;;  %v3313_v51 = vld [vmem:[%s3705_s10 + $0x18] sm:$0xff] }
 0x977   : > { %2733 = vmatpush.bf16.msrb.mxu0 %v3313_v51 }
 0x97d   : > { %v2522_v53 = vpop.f32.mrf.mxu0 }
 0x97e   : > { %v3312_v53 = vld [vmem:[%s3705_s10 + $0x10] sm:$0xff] }
 0x97f   : > { %2734 = vmatpush.bf16.msrb.mxu0 %v3312_v53 }
 0x98d   : > { %v2302_v54 = vpop.permute.xlu2 %2301 }
 0x98e   : > { %2306 = vst.msk [vmem:[#allocation2 + $0x8] sm:$0xff] %vm1453_vm11, %v2302_v54  ;;  %v3311_v54 = vld [vmem:[%s3705_s10 + $0x8] sm:$0xff] }
 0x98f   : > { %2735 = vmatpush.bf16.msrb.mxu0 %v3311_v54 }
 0x99d   : > { %v2300_v55 = vpop.permute.xlu0 %2299 }
 0x99e   : > { %2305 = vst.msk [vmem:[#allocation2] sm:$0xff] %vm1453_vm11, %v2300_v55  ;;  %v2426_v56 = vpop.permute.xlu2 %2425  ;;  %v3310_v55 = vld [vmem:[%s3705_s10] sm:$0xff] }
 0x99f   : > { %2430 = vst.msk [vmem:[#allocation2 + $0x8] sm:$0xff] %vm1580_vm12, %v2426_v56  ;;  %2736 = vmatpush.bf16.msrb.mxu0 %v3310_v55 }
 0x9ae   : > { %v2424_v47 = vpop.permute.xlu0 %2423 }
 0x9af   : > { %2429 = vst.msk [vmem:[#allocation2] sm:$0xff] %vm1580_vm12, %v2424_v47  ;;  %v3356_v47 = vld [vmem:[%s4346_s3] ss:$0 sm:$0xff] }
 0x9c6   : > { %v2550_v57 = vpop.permute.xlu1 %2549 }
 0x9c7   : > { %2554 = vst.msk [vmem:[#allocation2 + $0x8] sm:$0xff] %vm1707_vm13, %v2550_v57 }
 0x9ce   : > { %v2556_v63 = vld [vmem:[#allocation2 + $0x8] sm:$0xff] }
 0x9e8   : > { %v2548_v61 = vpop.permute.xlu0 %2547 }
 0x9e9   : > { %2553 = vst.msk [vmem:[#allocation2] sm:$0xff] %vm1707_vm13, %v2548_v61 }
 0x9f0   : > { %v2555_v62 = vld [vmem:[#allocation2] sm:$0xff] }
 0x9f1   : > { %v2557_v0 = vpack.c.bf16 %v2556_v63, %v2555_v62 }
 0x9f3   : > { %3250 = vmatmul.msk.bf16.vlgmr.msra.gmra.mxu2 %vm1103_vm1, %v2557_v0  ;;  %v3357_v0 = vld [vmem:[%s4348_s0] ss:$0 sm:$0xff] }
 0xa76   : > { %v2585_v2 = vpop.f32.mrf.mxu2 }
 0xa77   : > { %v2586_v12 = vadd.f32 %v3353_v1, %v2585_v2 }
 0xa79   : > { %v2590_v3 = vadd.f32 %v2586_v12, %v3993_v11 }
 0xa7b   : > { %v2594_v4 = vsel %vm1103_vm1, %v2590_v3, 0.0 }
 0xa7c   : > { %2595 = vadd.xlane.f32.xlu2 %v2594_v4 }
 0xa7e   : > { %v2587_v59 = vpop.f32.mrf.mxu2 }
 0xa7f   : > { %v2588_v6 = vadd.f32 %v3353_v1, %v2587_v59 }
 0xa81   : > { %v2591_v7 = vadd.f32 %v2588_v6, %v3995_v13  ;;  %v3309_v13 = vld [vmem:[%s3691_s4 + $0x8] sm:$0xff]  ;;  %s4353_s4 = sld [smem:[#allocation7_spill]] }
 0xa82   : > { %2678 = vmatpush.bf16.msra.mxu3 %v3309_v13 }
 0xa83   : > { %v2597_v14 = vsel %vm1103_vm1, %v2591_v7, 0.0 }
 0xa84   : > { %2598 = vadd.xlane.f32.xlu0 %v2597_v14 }
 0xa86   : > { %2679 = vmatpush.bf16.msra.mxu3 %v3308_v30 }
 0xa87   : > { %p3277_p5 = scmp.ne.s32.totalorder %s4353_s4, 1 }
 0xa88   : > { %s4354_s2 = sld [smem:[#allocation25_spill]] (!%p3277_p5) }
 0xa89   : > { %s4355_s1 = sld [smem:[#allocation26_spill]] (!%p3277_p5) }
 0xaef   : > { %v2596_v15 = vpop.xlane.xlu2 %2595 }
 0xaf0   : > { %v2600_v21 = vmul.f32 %v2596_v15, %v3945_v8 }
 0xaf2   : > { %v2602_v17 = vsub.f32 %v2590_v3, %v2600_v21 }
 0xaf4   : > { %v2604_v18 = vmul.f32 %v2602_v17, %v2602_v17 }
 0xaf6   : > { %v2606_v19 = vsel %vm1103_vm1, %v2604_v18, 0.0 }
 0xaf7   : > { %v2599_v11 = vpop.xlane.xlu0 %2598  ;;  %2607 = vadd.xlane.f32.xlu1 %v2606_v19 }
 0xaf8   : > { %v2601_v20 = vmul.f32 %v2599_v11, %v3945_v8 }
 0xafa   : > { %v2603_v23 = vsub.f32 %v2591_v7, %v2601_v20 }
 0xafc   : > { %v2605_v9 = vmul.f32 %v2603_v23, %v2603_v23 }
 0xafe   : > { %v2609_v26 = vsel %vm1103_vm1, %v2605_v9, 0.0 }
 0xaff   : > { %2610 = vadd.xlane.f32.xlu2 %v2609_v26 }
 0xb6a   : > { %v2608_v27 = vpop.xlane.xlu1 %2607 }
 0xb6b   : > { %v2612_v29 = vmul.f32 %v2608_v27, %v3945_v8 }
 0xb6d   : > { %v2614_v31 = vadd.f32 1e-05, %v2612_v29 }
 0xb6f   : > { %3430 = vrsqrt.f32 %v2614_v31  ;;  %vm2622_vm3 = vweird.f32 %v2614_v31 }
 0xb72   : > { %v2611_v32 = vpop.xlane.xlu2 %2610 }
 0xb73   : > { %v2613_v5 = vmul.f32 %v2611_v32, %v3945_v8 }
 0xb75   : > { %v3431_v33 = vpop.eup %3430  ;;  %v2615_v16 = vadd.f32 1e-05, %v2613_v5 }
 0xb76   : > { %v2617_v34 = vmul.f32 %v3431_v33, %v2614_v31  ;;  %vm2623_vm2 = vweird.f32 %v3431_v33 }
 0xb77   : > { %3432 = vrsqrt.f32 %v2615_v16  ;;  %vm2624_vm4 = vmor %vm2622_vm3, %vm2623_vm2  ;;  %vm2632_vm6 = vweird.f32 %v2615_v16 }
 0xb78   : > { %v2618_v36 = vmul.f32 %v3431_v33, %v2617_v34 }
 0xb7a   : > { %v2619_v52 = vmul.f32 0.5, %v2618_v36 }
 0xb7c   : > { %v2620_v38 = vsub.f32 1.5, %v2619_v52 }
 0xb7d   : > { %v3433_v35 = vpop.eup %3432 }
 0xb7e   : > { %v2621_v42 = vmul.f32 %v3431_v33, %v2620_v38  ;;  %v2627_v40 = vmul.f32 %v3433_v35, %v2615_v16  ;;  %vm2633_vm5 = vweird.f32 %v3433_v35 }
 0xb7f   : > { %vm2634_vm7 = vmor %vm2632_vm6, %vm2633_vm5 }
 0xb80   : > { %v2628_v43 = vmul.f32 %v3433_v35, %v2627_v40  ;;  %v2625_v37 = vsel %vm2624_vm4, %v3431_v33, %v2621_v42 }
 0xb81   : > { %v2636_v25 = vmul.f32 %v2625_v37, %v2602_v17 }
 0xb82   : > { %v2629_v39 = vmul.f32 0.5, %v2628_v43  ;;  %v3359_v43 = vld [vmem:[%s4352_s5] ss:$0 sm:$0xff] }
 0xb83   : > { %v2641_v24 = vmul.f32 %v3354_v22, %v2636_v25 }
 0xb84   : > { %v2630_v41 = vsub.f32 1.5, %v2629_v39 }
 0xb85   : > { %v2646_v28 = vadd.f32 %v3355_v10, %v2641_v24 }
 0xb86   : > { %v2631_v44 = vmul.f32 %v3433_v35, %v2630_v41 }
 0xb88   : > { %v2635_v45 = vsel %vm2634_vm7, %v3433_v35, %v2631_v44  ;;  %v3358_v35 = vld [vmem:[%s4350_s14] ss:$0 sm:$0xff] }
 0xb89   : > { %v2637_v46 = vmul.f32 %v2635_v45, %v2603_v23 }
 0xb8b   : > { %v2642_v48 = vmul.f32 %v3354_v22, %v2637_v46 }
 0xb8d   : > { %v2647_v49 = vadd.f32 %v3355_v10, %v2642_v48 }
 0xb8f   : > { %v2653_v50 = vpack.c.bf16 %v2647_v49, %v2646_v28 }
 0xb91   : > { %3259 = vmatmul.msk.bf16.vlgmr.msra.gmra.mxu3 %vm1103_vm1, %v2653_v50 }
 0xc14   : > { %v2681_v56 = vpop.f32.mrf.mxu3 }
 0xc15   : > { %v2682_v57 = vadd.f32 %v3356_v47, %v2681_v56 }
 0xc17   : > { %v2686_v61 = vmax.f32 %v2682_v57, 0.0 }
 0xc1c   : > { %v2683_v58 = vpop.f32.mrf.mxu3 }
 0xc1d   : > { %v2684_v60 = vadd.f32 %v3356_v47, %v2683_v58 }
 0xc1f   : > { %v2687_v62 = vmax.f32 %v2684_v60, 0.0 }
 0xc21   : > { %v2697_v63 = vpack.c.bf16 %v2687_v62, %v2686_v61 }
 0xc23   : > { %3276 = vmatmul.msk.bf16.vlgmr.msrb.gmra.mxu0 %vm2725_vm8, %v2697_v63 }
 0xca0   : > { %v2738_v1 = vpop.f32.mrf.mxu0 }
 0xca1   : > { %v2739_v2 = vadd.f32 %v3357_v0, %v2738_v1 }
 0xca3   : > { %v2743_v12 = vadd.f32 %v2739_v2, %v2646_v28 }
 0xca5   : > { %v2747_v3 = vsel %vm1103_vm1, %v2743_v12, 0.0 }
 0xca6   : > { %2748 = vadd.xlane.f32.xlu0 %v2747_v3 }
 0xca8   : > { %v2740_v4 = vpop.f32.mrf.mxu0 }
 0xca9   : > { %v2741_v59 = vadd.f32 %v3357_v0, %v2740_v4 }
 0xcab   : > { %v2744_v6 = vadd.f32 %v2741_v59, %v2647_v49 }
 0xcad   : > { %v2750_v7 = vsel %vm1103_vm1, %v2744_v6, 0.0 }
 0xcae   : > { %2751 = vadd.xlane.f32.xlu2 %v2750_v7 }
 0xd19   : > { %v2749_v14 = vpop.xlane.xlu0 %2748 }
 0xd1a   : > { %v2753_v15 = vmul.f32 %v2749_v14, %v3945_v8 }
 0xd1c   : > { %v2755_v21 = vsub.f32 %v2743_v12, %v2753_v15 }
 0xd1e   : > { %v2757_v17 = vmul.f32 %v2755_v21, %v2755_v21 }
 0xd20   : > { %v2759_v18 = vsel %vm1103_vm1, %v2757_v17, 0.0 }
 0xd21   : > { %v2752_v19 = vpop.xlane.xlu2 %2751  ;;  %2760 = vadd.xlane.f32.xlu0 %v2759_v18 }
 0xd22   : > { %v2754_v11 = vmul.f32 %v2752_v19, %v3945_v8 }
 0xd24   : > { %v2756_v20 = vsub.f32 %v2744_v6, %v2754_v11 }
 0xd26   : > { %v2758_v23 = vmul.f32 %v2756_v20, %v2756_v20 }
 0xd28   : > { %v2762_v9 = vsel %vm1103_vm1, %v2758_v23, 0.0 }
 0xd29   : > { %2763 = vadd.xlane.f32.xlu2 %v2762_v9 }
 0xd94   : > { %v2761_v26 = vpop.xlane.xlu0 %2760 }
 0xd95   : > { %v2765_v13 = vmul.f32 %v2761_v26, %v3945_v8 }
 0xd97   : > { %v2767_v27 = vadd.f32 1e-05, %v2765_v13 }
 0xd99   : > { %3434 = vrsqrt.f32 %v2767_v27  ;;  %vm2775_vm11 = vweird.f32 %v2767_v27 }
 0xd9c   : > { %v2764_v29 = vpop.xlane.xlu2 %2763 }
 0xd9d   : > { %v2766_v30 = vmul.f32 %v2764_v29, %v3945_v8 }
 0xd9f   : > { %v3435_v31 = vpop.eup %3434  ;;  %v2768_v32 = vadd.f32 1e-05, %v2766_v30 }
 0xda0   : > { %v2770_v5 = vmul.f32 %v3435_v31, %v2767_v27  ;;  %vm2776_vm10 = vweird.f32 %v3435_v31 }
 0xda1   : > { %3436 = vrsqrt.f32 %v2768_v32  ;;  %vm2777_vm12 = vmor %vm2775_vm11, %vm2776_vm10  ;;  %vm2785_vm9 = vweird.f32 %v2768_v32 }
 0xda2   : > { %v2771_v33 = vmul.f32 %v3435_v31, %v2770_v5 }
 0xda4   : > { %v2772_v16 = vmul.f32 0.5, %v2771_v33 }
 0xda6   : > { %v2773_v34 = vsub.f32 1.5, %v2772_v16 }
 0xda7   : > { %v3437_v36 = vpop.eup %3436 }
 0xda8   : > { %v2774_v52 = vmul.f32 %v3435_v31, %v2773_v34  ;;  %v2780_v38 = vmul.f32 %v3437_v36, %v2768_v32  ;;  %vm2786_vm13 = vweird.f32 %v3437_v36 }
 0xda9   : > { %vm2787_vm14 = vmor %vm2785_vm9, %vm2786_vm13 }
 0xdaa   : > { %v2778_v42 = vsel %vm2777_vm12, %v3435_v31, %v2774_v52  ;;  %v2781_v40 = vmul.f32 %v3437_v36, %v2780_v38 }
 0xdab   : > { %v2789_v37 = vmul.f32 %v2778_v42, %v2755_v21 }
 0xdac   : > { %v2782_v39 = vmul.f32 0.5, %v2781_v40 }
 0xdad   : > { %v2794_v41 = vmul.f32 %v3358_v35, %v2789_v37 }
 0xdae   : > { %v2783_v22 = vsub.f32 1.5, %v2782_v39 }
 0xdaf   : > { %v2799_v25 = vadd.f32 %v3359_v43, %v2794_v41 }
 0xdb0   : > { %v2784_v44 = vmul.f32 %v3437_v36, %v2783_v22 }
 0xdb1   : > { %2801 = vst.msk [vmem:[#allocation3] sm:$0xff] %vm1103_vm1, %v2799_v25 }
 0xdb2   : > { %v2788_v45 = vsel %vm2787_vm14, %v3437_v36, %v2784_v44 }
 0xdb3   : > { %v2790_v10 = vmul.f32 %v2788_v45, %v2756_v20 }
 0xdb5   : > { %v2795_v24 = vmul.f32 %v3358_v35, %v2790_v10  ;;  %2806 = sbr.rel (%p3277_p5) target bundleno = 3791 (0xecf), region = 124 }
 0xdb7   : > { %v2800_v46 = vadd.f32 %v3359_v43, %v2795_v24 }
 0xdb9   : > { %2802 = vst.msk [vmem:[#allocation3 + $0x8] sm:$0xff] %vm1103_vm1, %v2800_v46 }
 0xdba   : > { %v2809_v48 = vsel %vm1103_vm1, %v2799_v25, 0.0  ;;  %v2812_v28 = vsel %vm1103_vm1, %v2800_v46, 0.0  ;;  %v3438_v15 = vld [vmem:[%s4354_s2] ss:$0 sm:$0xff] }
 0xdbb   : > { %2810 = vadd.xlane.f32.xlu0 %v2809_v48  ;;  %v3439_v18 = vld [vmem:[%s4355_s1] ss:$0 sm:$0xff] }
 0xdc3   : > { %2813 = vadd.xlane.f32.xlu0 %v2812_v28 }
 0xe2e   : > { %v2811_v49 = vpop.xlane.xlu0 %2810 }
 0xe2f   : > { %v2815_v50 = vmul.f32 %v2811_v49, %v3945_v8 }
 0xe31   : > { %v2817_v51 = vsub.f32 %v2799_v25, %v2815_v50 }
 0xe33   : > { %v2819_v53 = vmul.f32 %v2817_v51, %v2817_v51 }
 0xe35   : > { %v2821_v54 = vsel %vm1103_vm1, %v2819_v53, 0.0 }
 0xe36   : > { %2822 = vadd.xlane.f32.xlu1 %v2821_v54  ;;  %v2814_v55 = vpop.xlane.xlu0 %2813 }
 0xe37   : > { %v2816_v56 = vmul.f32 %v2814_v55, %v3945_v8 }
 0xe39   : > { %v2818_v47 = vsub.f32 %v2800_v46, %v2816_v56 }
 0xe3b   : > { %v2820_v57 = vmul.f32 %v2818_v47, %v2818_v47 }
 0xe3d   : > { %v2824_v58 = vsel %vm1103_vm1, %v2820_v57, 0.0 }
 0xe3e   : > { %2825 = vadd.xlane.f32.xlu1 %v2824_v58 }
 0xea9   : > { %v2823_v60 = vpop.xlane.xlu1 %2822 }
 0xeaa   : > { %v2827_v61 = vmul.f32 %v2823_v60, %v3945_v8 }
 0xeac   : > { %v2829_v62 = vadd.f32 1e-05, %v2827_v61 }
 0xeae   : > { %3440 = vrsqrt.f32 %v2829_v62  ;;  %vm2837_vm0 = vweird.f32 %v2829_v62 }
 0xeb1   : > { %v2826_v63 = vpop.xlane.xlu1 %2825 }
 0xeb2   : > { %v2828_v0 = vmul.f32 %v2826_v63, %v3945_v8 }
 0xeb4   : > { %v3441_v1 = vpop.eup %3440  ;;  %v2830_v2 = vadd.f32 1e-05, %v2828_v0 }
 0xeb5   : > { %v2832_v12 = vmul.f32 %v3441_v1, %v2829_v62  ;;  %vm2838_vm15 = vweird.f32 %v3441_v1 }
 0xeb6   : > { %3442 = vrsqrt.f32 %v2830_v2  ;;  %vm2839_vm2 = vmor %vm2837_vm0, %vm2838_vm15  ;;  %vm2847_vm4 = vweird.f32 %v2830_v2 }
 0xeb7   : > { %v2833_v3 = vmul.f32 %v3441_v1, %v2832_v12 }
 0xeb9   : > { %v2834_v4 = vmul.f32 0.5, %v2833_v3 }
 0xebb   : > { %v2835_v59 = vsub.f32 1.5, %v2834_v4 }
 0xebc   : > { %v3443_v6 = vpop.eup %3442 }
 0xebd   : > { %v2836_v7 = vmul.f32 %v3441_v1, %v2835_v59  ;;  %v2842_v14 = vmul.f32 %v3443_v6, %v2830_v2  ;;  %vm2848_vm3 = vweird.f32 %v3443_v6 }
 0xebe   : > { %vm2849_vm5 = vmor %vm2847_vm4, %vm2848_vm3 }
 0xebf   : > { %v2840_v21 = vsel %vm2839_vm2, %v3441_v1, %v2836_v7  ;;  %v2843_v17 = vmul.f32 %v3443_v6, %v2842_v14 }
 0xec0   : > { %v2851_v8 = vmul.f32 %v2840_v21, %v2817_v51 }
 0xec1   : > { %v2844_v19 = vmul.f32 0.5, %v2843_v17 }
 0xec2   : > { %v2856_v11 = vmul.f32 %v3438_v15, %v2851_v8 }
 0xec3   : > { %v2845_v20 = vsub.f32 1.5, %v2844_v19 }
 0xec4   : > { %v2861_v23 = vadd.f32 %v3439_v18, %v2856_v11 }
 0xec5   : > { %v2846_v9 = vmul.f32 %v3443_v6, %v2845_v20 }
 0xec6   : > { %2863 = vst.msk [vmem:[#allocation3] sm:$0xff] %vm1103_vm1, %v2861_v23 }
 0xec7   : > { %v2850_v26 = vsel %vm2849_vm5, %v3443_v6, %v2846_v9 }
 0xec8   : > { %v2852_v13 = vmul.f32 %v2850_v26, %v2818_v47 }
 0xeca   : > { %v2857_v27 = vmul.f32 %v3438_v15, %v2852_v13 }
 0xecc   : > { %v2862_v29 = vadd.f32 %v3439_v18, %v2857_v27 }
 0xece   : > { %2864 = vst.msk [vmem:[#allocation3 + $0x8] sm:$0xff] %vm1103_vm1, %v2862_v29 }
 0xecf PF: > { %s4356_s28 = sld [smem:[#allocation7_spill]]  ;;  %s3500_s3 = smov [#allocation3]  }
 0xed0   : > { %s2870_s8 = sshll.u32 %s3500_s3, 4  ;;  %s4357_s0 = sld [smem:[#allocation27_spill]]  ;;  %s2871_s8 = int_to_ptr.vmem [resolvable:$true] %s2870_s8 }
 0xed1   : > { %s3501_s21 = smov 128  }
 0xed5   : > { %p3319_p6 = scmp.eq.s32.totalorder %s4356_s28, 1 }
 0xed6   : > { %s2872_s10 = sshll.u32 %s4357_s0, 4  ;;  %s2873_s10 = int_to_ptr.hbm [resolvable:$true] %s2872_s10 }
 0xed7   : > { %3316 = dma.vmem_to_hbm [thread:$0]  (%p3319_p6), %s2871_s8, 256, %s2873_s10, [#allocation4], %s3501_s21, %s3501_s21, %s3496_s20  }
 0xed8   : > { %3477 = dma.done.wait (%p3319_p6), [#allocation4], 256  }
 0xed9   : > { %3479 = vsyncadd (%p3319_p6), [#allocation4], 4294967040 }
 0xeda PF: > { %s4358_s29 = sld [smem:[#allocation6_spill]] }
 0xee0   : > { %s35_s5 = sadd.s32 1, %s4358_s29  }
 0xee1   : > { %p32_p7 = scmp.ge.s32.totalorder %s35_s5, 4  }
 0xee3   :  { %34 = sbr.rel (!%p32_p7) target bundleno = 20 (0x14), region = 208 }
 0xee8   :  { %2889 = vsyncpa [#allocation4], 1 }
 0xee9   :  { %2891 = vsyncpa [#allocation4 + $0x1], 1 }

</bundles_post_ra>
